<compile_context>
chip_gen: v7x
topology: tpu7x:2x2x1
jax: 0.10.0
libtpu: 0.0.40
codegen_flags: <defaults>
</compile_context>

<pallas_src>
import functools
import math

import jax
import jax.numpy as jnp
from jax.experimental import pallas as pl
from jax.experimental.pallas import tpu as pltpu

# ----------------------------- model config ---------------------------------
IMG_SIZE = 16
PATCH_SIZE = 4
IN_CHANNELS = 4
EMBED_DIM = 32
ENC_DEPTH = 2
DEC_DEPTH = 2
NUM_HEADS = 4
MLP_RATIO = 4.0
LN_EPS = 1e-5

N_PATCHES = (IMG_SIZE // PATCH_SIZE) ** 2                  # 16
PATCH_DIM = IN_CHANNELS * PATCH_SIZE * PATCH_SIZE          # 64
MLP_DIM = int(EMBED_DIM * MLP_RATIO)                       # 128


# --------------------- static parameter-slab layout --------------------------
def _param_entries():
    """Static list of (name, kind, shape) for every parameter tensor.

    kind 'c': matrix with EMBED_DIM rows  -> column slab, carved as [:, off:off+w]
    kind 'r': matrix with EMBED_DIM cols  -> row slab,    carved as [off:off+r, :]
    kind 'v': 1-D vector                  -> vector slab, one 128-lane row each
    """
    D, Hm, pd = EMBED_DIM, MLP_DIM, PATCH_DIM

    def attn(p):
        return [(p + ".w_in", "c", (D, 3 * D)), (p + ".b_in", "v", (3 * D,)),
                (p + ".w_out", "c", (D, D)), (p + ".b_out", "v", (D,))]

    def ln(p):
        return [(p + ".g", "v", (D,)), (p + ".b", "v", (D,))]

    def ffn(p):
        return [(p + ".w1", "c", (D, Hm)), (p + ".b1", "v", (Hm,)),
                (p + ".w2", "r", (Hm, D)), (p + ".b2", "v", (D,))]

    entries = [("pe.w", "r", (pd, D)), ("pe.b", "v", (D,))]
    for i in range(ENC_DEPTH):
        p = f"e{i}"
        entries += attn(p + ".attn") + ln(p + ".ln1") + ffn(p + ".ffn") + ln(p + ".ln2")
    for i in range(DEC_DEPTH):
        p = f"d{i}"
        entries += (attn(p + ".sa") + ln(p + ".ln1") + attn(p + ".ca") + ln(p + ".ln2")
                    + ffn(p + ".ffn") + ln(p + ".ln3"))
    entries += [("head.w", "c", (D, pd)), ("head.b", "v", (pd,))]
    return entries


def _build_layout():
    """Map name -> (kind, offset, true_size); plus padded slab extents."""
    layout, c_off, r_off, v_row = {}, 0, 0, 0
    for name, kind, shape in _param_entries():
        if kind == "c":
            layout[name] = ("c", c_off, shape[1])
            c_off += -(-shape[1] // 128) * 128        # 128-lane aligned slots
        elif kind == "r":
            layout[name] = ("r", r_off, shape[0])
            r_off += -(-shape[0] // 8) * 8            # 8-sublane aligned slots
        else:
            assert shape[0] <= 128
            layout[name] = ("v", v_row, shape[0])
            v_row += 1
    return layout, c_off, r_off, -(-v_row // 8) * 8


_LAYOUT, _C_COLS, _R_ROWS, _V_ROWS = _build_layout()


# --------------------------- parameter packing --------------------------------
def _named_params(params):
    """Flatten the nested param tree into {name: array}, folding the attention
    score scale 1/sqrt(head_dim) into the Q projection weights/bias (free)."""
    D = EMBED_DIM
    scale = 1.0 / math.sqrt(D // NUM_HEADS)
    out = {"pe.w": params["patch_embed"]["w"], "pe.b": params["patch_embed"]["b"],
           "head.w": params["head"]["w"], "head.b": params["head"]["b"]}

    def attn(p, ap):
        out[p + ".w_in"] = ap["w_in"].at[:, :D].multiply(scale)
        out[p + ".b_in"] = ap["b_in"].at[:D].multiply(scale)
        out[p + ".w_out"] = ap["w_out"]
        out[p + ".b_out"] = ap["b_out"]

    def ln(p, lp):
        out[p + ".g"], out[p + ".b"] = lp["gamma"], lp["beta"]

    def ffn(p, fp):
        out[p + ".w1"], out[p + ".b1"] = fp["w1"], fp["b1"]
        out[p + ".w2"], out[p + ".b2"] = fp["w2"], fp["b2"]

    for i, l in enumerate(params["encoder"]):
        attn(f"e{i}.attn", l["attn"]); ln(f"e{i}.ln1", l["ln1"])
        ffn(f"e{i}.ffn", l["ffn"]); ln(f"e{i}.ln2", l["ln2"])
    for i, l in enumerate(params["decoder"]):
        attn(f"d{i}.sa", l["self_attn"]); ln(f"d{i}.ln1", l["ln1"])
        attn(f"d{i}.ca", l["cross_attn"]); ln(f"d{i}.ln2", l["ln2"])
        ffn(f"d{i}.ffn", l["ffn"]); ln(f"d{i}.ln3", l["ln3"])
    return out


def _pack_params(params):
    """Concatenate every parameter into 3 VMEM slabs (col-mats, row-mats, vecs)."""
    named = _named_params(params)
    col_parts, row_parts, vec_parts = [], [], []
    for name, kind, shape in _param_entries():
        a = named[name].astype(jnp.float32)
        if kind == "c":
            pad = -(-shape[1] // 128) * 128 - shape[1]
            col_parts.append(jnp.pad(a, ((0, 0), (0, pad))))
        elif kind == "r":
            pad = -(-shape[0] // 8) * 8 - shape[0]
            row_parts.append(jnp.pad(a, ((0, pad), (0, 0))))
        else:
            vec_parts.append(jnp.pad(a.reshape(1, -1), ((0, 0), (0, 128 - shape[0]))))
    wcol = jnp.concatenate(col_parts, axis=1)                       # (D, _C_COLS)
    wrow = jnp.concatenate(row_parts, axis=0)                       # (_R_ROWS, D)
    vecs = jnp.concatenate(vec_parts, axis=0)
    vecs = jnp.pad(vecs, ((0, _V_ROWS - vecs.shape[0]), (0, 0)))    # (_V_ROWS, 128)
    assert wcol.shape == (EMBED_DIM, _C_COLS)
    assert wrow.shape == (_R_ROWS, EMBED_DIM)
    return wcol, wrow, vecs


# ------------------------------- the kernel -----------------------------------
def _fused_vit_kernel(patches_ref, pos_ref, wcol_ref, wrow_ref, vec_ref, o_ref,
                      *, layout, num_heads):
    """One grid step == the full ViT-autoencoder forward for one image."""
    D = EMBED_DIM
    hd = D // num_heads

    def P(name):                                   # carve a parameter from its slab
        kind, off, size = layout[name]
        if kind == "c":
            return wcol_ref[:, off:off + size]     # (D, size)
        if kind == "r":
            return wrow_ref[off:off + size, :]     # (size, D)
        return vec_ref[off:off + 1, :size]         # (1, size)

    def layer_norm(x, p):
        mean = jnp.mean(x, axis=-1, keepdims=True)
        c = x - mean
        var = jnp.mean(c * c, axis=-1, keepdims=True)
        return c * jax.lax.rsqrt(var + LN_EPS) * P(p + ".g") + P(p + ".b")

    def split_heads(x):                            # (N, D) -> (H, N, hd) via lane slices
        return jnp.stack([x[:, h * hd:(h + 1) * hd] for h in range(num_heads)], axis=0)

    def attention(xq, xkv, p, fuse_qkv):
        """Multi-head attention; 1/sqrt(hd) is already folded into the Q proj."""
        w_in, b_in = P(p + ".w_in"), P(p + ".b_in")
        if fuse_qkv:                               # self-attn: one (N, D) @ (D, 3D)
            qkv = jnp.dot(xq, w_in, preferred_element_type=jnp.float32) + b_in
            q, k, v = qkv[:, :D], qkv[:, D:2 * D], qkv[:, 2 * D:]
        else:                                      # cross-attn: q from queries, kv from memory
            q = jnp.dot(xq, w_in[:, :D], preferred_element_type=jnp.float32) + b_in[:, :D]
            kv = jnp.dot(xkv, w_in[:, D:], preferred_element_type=jnp.float32) + b_in[:, D:]
            k, v = kv[:, :D], kv[:, D:]
        qh, kh, vh = split_heads(q), split_heads(k), split_heads(v)      # (H, N, hd)
        s = jnp.einsum("hqd,hkd->hqk", qh, kh, preferred_element_type=jnp.float32)
        s = s - jnp.max(s, axis=-1, keepdims=True)
        e = jnp.exp(s)
        pr = e / jnp.sum(e, axis=-1, keepdims=True)                      # exact softmax
        ctx = jnp.einsum("hqk,hkd->hqd", pr, vh, preferred_element_type=jnp.float32)
        ctx = jnp.concatenate([ctx[h] for h in range(num_heads)], axis=1)  # (N, D)
        return jnp.dot(ctx, P(p + ".w_out"),
                       preferred_element_type=jnp.float32) + P(p + ".b_out")

    def ffn(x, p):                                 # Linear -> ReLU -> Linear
        h = jnp.dot(x, P(p + ".w1"), preferred_element_type=jnp.float32) + P(p + ".b1")
        h = jnp.maximum(h, 0.0)
        return jnp.dot(h, P(p + ".w2"), preferred_element_type=jnp.float32) + P(p + ".b2")

    # Patch-embed projection (Conv2d(k=s=p) == unfold + linear) + positional.
    pos = pos_ref[...]
    tok = jnp.dot(patches_ref[...], P("pe.w"),
                  preferred_element_type=jnp.float32) + P("pe.b")
    enc = tok + pos

    # Transformer encoder (post-norm, ReLU FFN).  Dropout == identity.
    for i in range(ENC_DEPTH):
        enc = layer_norm(enc + attention(enc, enc, f"e{i}.attn", True), f"e{i}.ln1")
        enc = layer_norm(enc + ffn(enc, f"e{i}.ffn"), f"e{i}.ln2")

    # Transformer decoder; queries are the positional embedding.
    dec = pos
    for i in range(DEC_DEPTH):
        dec = layer_norm(dec + attention(dec, dec, f"d{i}.sa", True), f"d{i}.ln1")
        dec = layer_norm(dec + attention(dec, enc, f"d{i}.ca", False), f"d{i}.ln2")
        dec = layer_norm(dec + ffn(dec, f"d{i}.ffn"), f"d{i}.ln3")

    # Reconstruction head: Linear + exact (erf) GELU == torch nn.GELU('none').
    rec = jnp.dot(dec, P("head.w"), preferred_element_type=jnp.float32) + P("head.b")
    rec = 0.5 * rec * (1.0 + jax.lax.erf(rec * (1.0 / math.sqrt(2.0))))
    o_ref[...] = rec.astype(o_ref.dtype)


# ------------------------------- model glue -----------------------------------
def patchify(x):
    """NCHW image -> (B, N, C*p*p), matching Conv2d(k=s=p) weight flattening."""
    B, C, H, W = x.shape
    p = PATCH_SIZE
    h, w = H // p, W // p
    x = x.reshape(B, C, h, p, w, p)
    x = x.transpose(0, 2, 4, 1, 3, 5)              # (B, h, w, C, p, p)
    return x.reshape(B, h * w, C * p * p)


def unpatchify(patches):
    B, N, _ = patches.shape
    p, c = PATCH_SIZE, IN_CHANNELS
    h = w = int(round(N ** 0.5))
    x = patches.reshape(B, h, w, p, p, c)
    x = jnp.einsum("nhwpqc->nchpwq", x)
    return x.reshape(B, c, h * p, w * p)


def vit_autoencoder_forward(params, x):
    B = x.shape[0]
    N, pd, D = N_PATCHES, PATCH_DIM, EMBED_DIM

    patches = patchify(x).reshape(B * N, pd).astype(jnp.float32)
    pos = params["pos_embed"].reshape(N, D).astype(jnp.float32)
    wcol, wrow, vecs = _pack_params(params)

    kernel = functools.partial(_fused_vit_kernel, layout=_LAYOUT, num_heads=NUM_HEADS)
    rec = pl.pallas_call(
        kernel,
        out_shape=jax.ShapeDtypeStruct((B * N, pd), jnp.float32),
        grid=(B,),
        in_specs=[
            pl.BlockSpec((N, pd), lambda b: (b, 0)),      # this image's patches
            pl.BlockSpec((N, D), lambda b: (0, 0)),       # shared pos embed
            pl.BlockSpec(wcol.shape, lambda b: (0, 0)),   # weight column slab (resident)
            pl.BlockSpec(wrow.shape, lambda b: (0, 0)),   # weight row slab (resident)
            pl.BlockSpec(vecs.shape, lambda b: (0, 0)),   # bias / LN slab (resident)
        ],
        out_specs=pl.BlockSpec((N, pd), lambda b: (b, 0)),
        compiler_params=pltpu.CompilerParams(
            dimension_semantics=("parallel",)),
    )(patches, pos, wcol, wrow, vecs)
    return unpatchify(rec.reshape(B, N, pd))


# ----------------------------- parameter init ---------------------------------
def init_params(key):
    keys = [key]

    def nk():
        keys[0], sub = jax.random.split(keys[0])
        return sub

    D = EMBED_DIM
    Hmlp = MLP_DIM

    def attn():
        return {"w_in": 0.05 * jax.random.normal(nk(), (D, 3 * D), jnp.float32),
                "b_in": 0.01 * jax.random.normal(nk(), (3 * D,), jnp.float32),
                "w_out": 0.05 * jax.random.normal(nk(), (D, D), jnp.float32),
                "b_out": 0.01 * jax.random.normal(nk(), (D,), jnp.float32)}

    def ln():
        return {"gamma": jnp.ones((D,), jnp.float32),
                "beta": jnp.zeros((D,), jnp.float32)}

    def ffn_p():
        return {"w1": 0.05 * jax.random.normal(nk(), (D, Hmlp), jnp.float32),
                "b1": 0.01 * jax.random.normal(nk(), (Hmlp,), jnp.float32),
                "w2": 0.05 * jax.random.normal(nk(), (Hmlp, D), jnp.float32),
                "b2": 0.01 * jax.random.normal(nk(), (D,), jnp.float32)}

    return {
        "patch_embed": {"w": 0.05 * jax.random.normal(nk(), (PATCH_DIM, D), jnp.float32),
                        "b": 0.01 * jax.random.normal(nk(), (D,), jnp.float32)},
        # nn.Parameter is zero-init in PyTorch; small random values are used here
        # so the forward exercises non-degenerate attention paths.
        "pos_embed": 0.02 * jax.random.normal(nk(), (1, N_PATCHES, D), jnp.float32),
        "encoder": [{"attn": attn(), "ln1": ln(), "ffn": ffn_p(), "ln2": ln()}
                    for _ in range(ENC_DEPTH)],
        "decoder": [{"self_attn": attn(), "ln1": ln(),
                     "cross_attn": attn(), "ln2": ln(),
                     "ffn": ffn_p(), "ln3": ln()}
                    for _ in range(DEC_DEPTH)],
        "head": {"w": 0.05 * jax.random.normal(nk(), (D, PATCH_DIM), jnp.float32),
                 "b": 0.01 * jax.random.normal(nk(), (PATCH_DIM,), jnp.float32)},
    }


# ----------------------------------- main --------------------------------------
if __name__ == "__main__":
    root = jax.random.PRNGKey(0)
    pkey, xkey = jax.random.split(root)
    params = init_params(pkey)
    x = jax.random.normal(xkey, (2, IN_CHANNELS, IMG_SIZE, IMG_SIZE), jnp.float32)

    fwd = jax.jit(vit_autoencoder_forward)
    out = jax.block_until_ready(fwd(params, x))
    assert out.shape == (2, IN_CHANNELS, IMG_SIZE, IMG_SIZE), out.shape
    assert bool(jnp.all(jnp.isfinite(out)))
    print("KERNEL_OK")
</pallas_src>

<mosaic_0001>
module attributes {stable_mosaic.version = 11 : i64} {
  func.func @_fused_vit_kernel(%arg0: i32, %arg1: memref<16x64xf32, #tpu.memory_space<vmem>>, %arg2: memref<16x32xf32, #tpu.memory_space<vmem>>, %arg3: memref<32x2176xf32, #tpu.memory_space<vmem>>, %arg4: memref<576x32xf32, #tpu.memory_space<vmem>>, %arg5: memref<48x128xf32, #tpu.memory_space<vmem>>, %arg6: memref<16x64xf32, #tpu.memory_space<vmem>>) attributes {dimension_semantics = [#tpu.dimension_semantics<parallel>], iteration_bounds = array<i64: 2>, scalar_prefetch = 0 : i64, scratch_operands = 0 : i64, tpu.core_type = #tpu.core_type<tc>, window_params = [{transform_indices = @transform_0, window_bounds = array<i64: 16, 64>}, {pipeline_mode = #tpu.pipeline_mode<synchronous>, transform_indices = @transform_1, window_bounds = array<i64: 16, 32>}, {pipeline_mode = #tpu.pipeline_mode<synchronous>, transform_indices = @transform_2, window_bounds = array<i64: 32, 2176>}, {pipeline_mode = #tpu.pipeline_mode<synchronous>, transform_indices = @transform_3, window_bounds = array<i64: 576, 32>}, {pipeline_mode = #tpu.pipeline_mode<synchronous>, transform_indices = @transform_4, window_bounds = array<i64: 48, 128>}, {transform_indices = @transform_5, window_bounds = array<i64: 16, 64>}]} {
    %c0 = arith.constant 0 : index
    %c0_0 = arith.constant 0 : index
    %0 = vector.load %arg2[%c0, %c0_0] : memref<16x32xf32, #tpu.memory_space<vmem>>, vector<16x32xf32>
    %c0_1 = arith.constant 0 : index
    %c0_2 = arith.constant 0 : index
    %1 = vector.load %arg1[%c0_1, %c0_2] : memref<16x64xf32, #tpu.memory_space<vmem>>, vector<16x64xf32>
    %c0_3 = arith.constant 0 : index
    %c0_4 = arith.constant 0 : index
    %2 = vector.load %arg4[%c0_3, %c0_4] : memref<576x32xf32, #tpu.memory_space<vmem>>, vector<64x32xf32>
    %cst = arith.constant dense<0.000000e+00> : vector<16x32xf32>
    %3 = tpu.matmul %1, %2, %cst {dimension_numbers = #tpu.dot_dimension_numbers<[1], [0], [0], [1], [0, 0, 1, 1], [], []>} : vector<16x64xf32>, vector<64x32xf32>, vector<16x32xf32> -> vector<16x32xf32>
    %c0_5 = arith.constant 0 : index
    %c0_6 = arith.constant 0 : index
    %4 = vector.load %arg5[%c0_5, %c0_6] : memref<48x128xf32, #tpu.memory_space<vmem>>, vector<1x32xf32>
    %5 = vector.broadcast %4 : vector<1x32xf32> to vector<16x32xf32>
    %6 = arith.addf %3, %5 : vector<16x32xf32>
    %7 = arith.addf %6, %0 : vector<16x32xf32>
    %c0_7 = arith.constant 0 : index
    %c0_8 = arith.constant 0 : index
    %8 = vector.load %arg3[%c0_7, %c0_8] : memref<32x2176xf32, #tpu.memory_space<vmem>>, vector<32x96xf32>
    %c1 = arith.constant 1 : index
    %c0_9 = arith.constant 0 : index
    %9 = vector.load %arg5[%c1, %c0_9] : memref<48x128xf32, #tpu.memory_space<vmem>>, vector<1x96xf32>
    %cst_10 = arith.constant dense<0.000000e+00> : vector<16x96xf32>
    %10 = tpu.matmul %7, %8, %cst_10 {dimension_numbers = #tpu.dot_dimension_numbers<[1], [0], [0], [1], [0, 0, 1, 1], [], []>} : vector<16x32xf32>, vector<32x96xf32>, vector<16x96xf32> -> vector<16x96xf32>
    %11 = vector.broadcast %9 : vector<1x96xf32> to vector<16x96xf32>
    %12 = arith.addf %10, %11 : vector<16x96xf32>
    %13 = vector.extract_strided_slice %12 {offsets = [0, 0], sizes = [16, 32], strides = [1, 1]} : vector<16x96xf32> to vector<16x32xf32>
    %14 = vector.extract_strided_slice %12 {offsets = [0, 32], sizes = [16, 32], strides = [1, 1]} : vector<16x96xf32> to vector<16x32xf32>
    %15 = vector.extract_strided_slice %12 {offsets = [0, 64], sizes = [16, 32], strides = [1, 1]} : vector<16x96xf32> to vector<16x32xf32>
    %16 = vector.extract_strided_slice %13 {offsets = [0, 0], sizes = [16, 8], strides = [1, 1]} : vector<16x32xf32> to vector<16x8xf32>
    %17 = vector.extract_strided_slice %13 {offsets = [0, 8], sizes = [16, 8], strides = [1, 1]} : vector<16x32xf32> to vector<16x8xf32>
    %18 = vector.extract_strided_slice %13 {offsets = [0, 16], sizes = [16, 8], strides = [1, 1]} : vector<16x32xf32> to vector<16x8xf32>
    %19 = vector.extract_strided_slice %13 {offsets = [0, 24], sizes = [16, 8], strides = [1, 1]} : vector<16x32xf32> to vector<16x8xf32>
    %20 = vector.shape_cast %16 : vector<16x8xf32> to vector<1x16x8xf32>
    %21 = vector.shape_cast %17 : vector<16x8xf32> to vector<1x16x8xf32>
    %22 = vector.shape_cast %18 : vector<16x8xf32> to vector<1x16x8xf32>
    %23 = vector.shape_cast %19 : vector<16x8xf32> to vector<1x16x8xf32>
    %24 = tpu.concatenate %20, %21, %22, %23 in 0 : vector<1x16x8xf32>, vector<1x16x8xf32>, vector<1x16x8xf32>, vector<1x16x8xf32> -> vector<4x16x8xf32>
    %25 = vector.extract_strided_slice %14 {offsets = [0, 0], sizes = [16, 8], strides = [1, 1]} : vector<16x32xf32> to vector<16x8xf32>
    %26 = vector.extract_strided_slice %14 {offsets = [0, 8], sizes = [16, 8], strides = [1, 1]} : vector<16x32xf32> to vector<16x8xf32>
    %27 = vector.extract_strided_slice %14 {offsets = [0, 16], sizes = [16, 8], strides = [1, 1]} : vector<16x32xf32> to vector<16x8xf32>
    %28 = vector.extract_strided_slice %14 {offsets = [0, 24], sizes = [16, 8], strides = [1, 1]} : vector<16x32xf32> to vector<16x8xf32>
    %29 = vector.shape_cast %25 : vector<16x8xf32> to vector<1x16x8xf32>
    %30 = vector.shape_cast %26 : vector<16x8xf32> to vector<1x16x8xf32>
    %31 = vector.shape_cast %27 : vector<16x8xf32> to vector<1x16x8xf32>
    %32 = vector.shape_cast %28 : vector<16x8xf32> to vector<1x16x8xf32>
    %33 = tpu.concatenate %29, %30, %31, %32 in 0 : vector<1x16x8xf32>, vector<1x16x8xf32>, vector<1x16x8xf32>, vector<1x16x8xf32> -> vector<4x16x8xf32>
    %34 = vector.extract_strided_slice %15 {offsets = [0, 0], sizes = [16, 8], strides = [1, 1]} : vector<16x32xf32> to vector<16x8xf32>
    %35 = vector.extract_strided_slice %15 {offsets = [0, 8], sizes = [16, 8], strides = [1, 1]} : vector<16x32xf32> to vector<16x8xf32>
    %36 = vector.extract_strided_slice %15 {offsets = [0, 16], sizes = [16, 8], strides = [1, 1]} : vector<16x32xf32> to vector<16x8xf32>
    %37 = vector.extract_strided_slice %15 {offsets = [0, 24], sizes = [16, 8], strides = [1, 1]} : vector<16x32xf32> to vector<16x8xf32>
    %38 = vector.shape_cast %34 : vector<16x8xf32> to vector<1x16x8xf32>
    %39 = vector.shape_cast %35 : vector<16x8xf32> to vector<1x16x8xf32>
    %40 = vector.shape_cast %36 : vector<16x8xf32> to vector<1x16x8xf32>
    %41 = vector.shape_cast %37 : vector<16x8xf32> to vector<1x16x8xf32>
    %42 = tpu.concatenate %38, %39, %40, %41 in 0 : vector<1x16x8xf32>, vector<1x16x8xf32>, vector<1x16x8xf32>, vector<1x16x8xf32> -> vector<4x16x8xf32>
    "tpu.trace_start"() <{level = 10 : i32, message = "hqd,hkd->hqk"}> : () -> ()
    %cst_11 = arith.constant dense<0.000000e+00> : vector<4x16x16xf32>
    %43 = tpu.matmul %24, %33, %cst_11 {dimension_numbers = #tpu.dot_dimension_numbers<[2], [2], [1], [1], [0, 0, 0, 1, 1, 1], [0], [0]>} : vector<4x16x8xf32>, vector<4x16x8xf32>, vector<4x16x16xf32> -> vector<4x16x16xf32>
    "tpu.trace_stop"() : () -> ()
    %cst_12 = arith.constant dense<0xFF800000> : vector<4x16xf32>
    %44 = vector.multi_reduction <maximumf>, %43, %cst_12 [2] : vector<4x16x16xf32> to vector<4x16xf32>
    %45 = vector.shape_cast %44 : vector<4x16xf32> to vector<4x16x1xf32>
    %46 = vector.broadcast %45 : vector<4x16x1xf32> to vector<4x16x16xf32>
    %47 = arith.subf %43, %46 : vector<4x16x16xf32>
    %48 = math.exp %47 : vector<4x16x16xf32>
    %cst_13 = arith.constant dense<0.000000e+00> : vector<4x16xf32>
    %49 = vector.multi_reduction <add>, %48, %cst_13 [2] : vector<4x16x16xf32> to vector<4x16xf32>
    %50 = vector.shape_cast %49 : vector<4x16xf32> to vector<4x16x1xf32>
    %51 = vector.broadcast %50 : vector<4x16x1xf32> to vector<4x16x16xf32>
    %52 = arith.divf %48, %51 : vector<4x16x16xf32>
    "tpu.trace_start"() <{level = 10 : i32, message = "hqk,hkd->hqd"}> : () -> ()
    %cst_14 = arith.constant dense<0.000000e+00> : vector<4x16x8xf32>
    %53 = tpu.matmul %52, %42, %cst_14 {dimension_numbers = #tpu.dot_dimension_numbers<[2], [1], [1], [2], [0, 0, 0, 1, 1, 2], [0], [0]>} : vector<4x16x16xf32>, vector<4x16x8xf32>, vector<4x16x8xf32> -> vector<4x16x8xf32>
    "tpu.trace_stop"() : () -> ()
    %54 = vector.extract_strided_slice %53 {offsets = [0, 0, 0], sizes = [1, 16, 8], strides = [1, 1, 1]} : vector<4x16x8xf32> to vector<1x16x8xf32>
    %55 = vector.shape_cast %54 : vector<1x16x8xf32> to vector<16x8xf32>
    %56 = vector.extract_strided_slice %53 {offsets = [1, 0, 0], sizes = [1, 16, 8], strides = [1, 1, 1]} : vector<4x16x8xf32> to vector<1x16x8xf32>
    %57 = vector.shape_cast %56 : vector<1x16x8xf32> to vector<16x8xf32>
    %58 = vector.extract_strided_slice %53 {offsets = [2, 0, 0], sizes = [1, 16, 8], strides = [1, 1, 1]} : vector<4x16x8xf32> to vector<1x16x8xf32>
    %59 = vector.shape_cast %58 : vector<1x16x8xf32> to vector<16x8xf32>
    %60 = vector.extract_strided_slice %53 {offsets = [3, 0, 0], sizes = [1, 16, 8], strides = [1, 1, 1]} : vector<4x16x8xf32> to vector<1x16x8xf32>
    %61 = vector.shape_cast %60 : vector<1x16x8xf32> to vector<16x8xf32>
    %62 = tpu.concatenate %55, %57, %59, %61 in 1 : vector<16x8xf32>, vector<16x8xf32>, vector<16x8xf32>, vector<16x8xf32> -> vector<16x32xf32>
    %c0_15 = arith.constant 0 : index
    %c128 = arith.constant 128 : index
    %63 = vector.load %arg3[%c0_15, %c128] : memref<32x2176xf32, #tpu.memory_space<vmem>>, vector<32x32xf32>
    %cst_16 = arith.constant dense<0.000000e+00> : vector<16x32xf32>
    %64 = tpu.matmul %62, %63, %cst_16 {dimension_numbers = #tpu.dot_dimension_numbers<[1], [0], [0], [1], [0, 0, 1, 1], [], []>} : vector<16x32xf32>, vector<32x32xf32>, vector<16x32xf32> -> vector<16x32xf32>
    %c2 = arith.constant 2 : index
    %c0_17 = arith.constant 0 : index
    %65 = vector.load %arg5[%c2, %c0_17] : memref<48x128xf32, #tpu.memory_space<vmem>>, vector<1x32xf32>
    %66 = vector.broadcast %65 : vector<1x32xf32> to vector<16x32xf32>
    %67 = arith.addf %64, %66 : vector<16x32xf32>
    %68 = arith.addf %7, %67 : vector<16x32xf32>
    %cst_18 = arith.constant dense<0.000000e+00> : vector<16xf32>
    %69 = vector.multi_reduction <add>, %68, %cst_18 [1] : vector<16x32xf32> to vector<16xf32>
    %70 = vector.shape_cast %69 : vector<16xf32> to vector<16x1xf32>
    %cst_19 = arith.constant 3.200000e+01 : f32
    %71 = vector.broadcast %cst_19 : f32 to vector<16x1xf32>
    %72 = arith.divf %70, %71 : vector<16x1xf32>
    %73 = vector.broadcast %72 : vector<16x1xf32> to vector<16x32xf32>
    %74 = arith.subf %68, %73 : vector<16x32xf32>
    %75 = arith.mulf %74, %74 : vector<16x32xf32>
    %cst_20 = arith.constant dense<0.000000e+00> : vector<16xf32>
    %76 = vector.multi_reduction <add>, %75, %cst_20 [1] : vector<16x32xf32> to vector<16xf32>
    %77 = vector.shape_cast %76 : vector<16xf32> to vector<16x1xf32>
    %cst_21 = arith.constant 3.200000e+01 : f32
    %78 = vector.broadcast %cst_21 : f32 to vector<16x1xf32>
    %79 = arith.divf %77, %78 : vector<16x1xf32>
    %cst_22 = arith.constant 9.99999974E-6 : f32
    %80 = vector.broadcast %cst_22 : f32 to vector<16x1xf32>
    %81 = arith.addf %79, %80 : vector<16x1xf32>
    %82 = math.rsqrt %81 : vector<16x1xf32>
    %83 = vector.broadcast %82 : vector<16x1xf32> to vector<16x32xf32>
    %84 = arith.mulf %74, %83 : vector<16x32xf32>
    %c3 = arith.constant 3 : index
    %c0_23 = arith.constant 0 : index
    %85 = vector.load %arg5[%c3, %c0_23] : memref<48x128xf32, #tpu.memory_space<vmem>>, vector<1x32xf32>
    %86 = vector.broadcast %85 : vector<1x32xf32> to vector<16x32xf32>
    %87 = arith.mulf %84, %86 : vector<16x32xf32>
    %c4 = arith.constant 4 : index
    %c0_24 = arith.constant 0 : index
    %88 = vector.load %arg5[%c4, %c0_24] : memref<48x128xf32, #tpu.memory_space<vmem>>, vector<1x32xf32>
    %89 = vector.broadcast %88 : vector<1x32xf32> to vector<16x32xf32>
    %90 = arith.addf %87, %89 : vector<16x32xf32>
    %c0_25 = arith.constant 0 : index
    %c256 = arith.constant 256 : index
    %91 = vector.load %arg3[%c0_25, %c256] : memref<32x2176xf32, #tpu.memory_space<vmem>>, vector<32x128xf32>
    %cst_26 = arith.constant dense<0.000000e+00> : vector<16x128xf32>
    %92 = tpu.matmul %90, %91, %cst_26 {dimension_numbers = #tpu.dot_dimension_numbers<[1], [0], [0], [1], [0, 0, 1, 1], [], []>} : vector<16x32xf32>, vector<32x128xf32>, vector<16x128xf32> -> vector<16x128xf32>
    %c5 = arith.constant 5 : index
    %c0_27 = arith.constant 0 : index
    %93 = vector.load %arg5[%c5, %c0_27] : memref<48x128xf32, #tpu.memory_space<vmem>>, vector<1x128xf32>
    %94 = vector.broadcast %93 : vector<1x128xf32> to vector<16x128xf32>
    %95 = arith.addf %92, %94 : vector<16x128xf32>
    %cst_28 = arith.constant 0.000000e+00 : f32
    %96 = vector.broadcast %cst_28 : f32 to vector<16x128xf32>
    %97 = arith.maximumf %95, %96 : vector<16x128xf32>
    %c64 = arith.constant 64 : index
    %c0_29 = arith.constant 0 : index
    %98 = vector.load %arg4[%c64, %c0_29] : memref<576x32xf32, #tpu.memory_space<vmem>>, vector<128x32xf32>
    %cst_30 = arith.constant dense<0.000000e+00> : vector<16x32xf32>
    %99 = tpu.matmul %97, %98, %cst_30 {dimension_numbers = #tpu.dot_dimension_numbers<[1], [0], [0], [1], [0, 0, 1, 1], [], []>} : vector<16x128xf32>, vector<128x32xf32>, vector<16x32xf32> -> vector<16x32xf32>
    %c6 = arith.constant 6 : index
    %c0_31 = arith.constant 0 : index
    %100 = vector.load %arg5[%c6, %c0_31] : memref<48x128xf32, #tpu.memory_space<vmem>>, vector<1x32xf32>
    %101 = vector.broadcast %100 : vector<1x32xf32> to vector<16x32xf32>
    %102 = arith.addf %99, %101 : vector<16x32xf32>
    %103 = arith.addf %90, %102 : vector<16x32xf32>
    %cst_32 = arith.constant dense<0.000000e+00> : vector<16xf32>
    %104 = vector.multi_reduction <add>, %103, %cst_32 [1] : vector<16x32xf32> to vector<16xf32>
    %105 = vector.shape_cast %104 : vector<16xf32> to vector<16x1xf32>
    %cst_33 = arith.constant 3.200000e+01 : f32
    %106 = vector.broadcast %cst_33 : f32 to vector<16x1xf32>
    %107 = arith.divf %105, %106 : vector<16x1xf32>
    %108 = vector.broadcast %107 : vector<16x1xf32> to vector<16x32xf32>
    %109 = arith.subf %103, %108 : vector<16x32xf32>
    %110 = arith.mulf %109, %109 : vector<16x32xf32>
    %cst_34 = arith.constant dense<0.000000e+00> : vector<16xf32>
    %111 = vector.multi_reduction <add>, %110, %cst_34 [1] : vector<16x32xf32> to vector<16xf32>
    %112 = vector.shape_cast %111 : vector<16xf32> to vector<16x1xf32>
    %cst_35 = arith.constant 3.200000e+01 : f32
    %113 = vector.broadcast %cst_35 : f32 to vector<16x1xf32>
    %114 = arith.divf %112, %113 : vector<16x1xf32>
    %cst_36 = arith.constant 9.99999974E-6 : f32
    %115 = vector.broadcast %cst_36 : f32 to vector<16x1xf32>
    %116 = arith.addf %114, %115 : vector<16x1xf32>
    %117 = math.rsqrt %116 : vector<16x1xf32>
    %118 = vector.broadcast %117 : vector<16x1xf32> to vector<16x32xf32>
    %119 = arith.mulf %109, %118 : vector<16x32xf32>
    %c7 = arith.constant 7 : index
    %c0_37 = arith.constant 0 : index
    %120 = vector.load %arg5[%c7, %c0_37] : memref<48x128xf32, #tpu.memory_space<vmem>>, vector<1x32xf32>
    %121 = vector.broadcast %120 : vector<1x32xf32> to vector<16x32xf32>
    %122 = arith.mulf %119, %121 : vector<16x32xf32>
    %c8 = arith.constant 8 : index
    %c0_38 = arith.constant 0 : index
    %123 = vector.load %arg5[%c8, %c0_38] : memref<48x128xf32, #tpu.memory_space<vmem>>, vector<1x32xf32>
    %124 = vector.broadcast %123 : vector<1x32xf32> to vector<16x32xf32>
    %125 = arith.addf %122, %124 : vector<16x32xf32>
    %c0_39 = arith.constant 0 : index
    %c384 = arith.constant 384 : index
    %126 = vector.load %arg3[%c0_39, %c384] : memref<32x2176xf32, #tpu.memory_space<vmem>>, vector<32x96xf32>
    %c9 = arith.constant 9 : index
    %c0_40 = arith.constant 0 : index
    %127 = vector.load %arg5[%c9, %c0_40] : memref<48x128xf32, #tpu.memory_space<vmem>>, vector<1x96xf32>
    %cst_41 = arith.constant dense<0.000000e+00> : vector<16x96xf32>
    %128 = tpu.matmul %125, %126, %cst_41 {dimension_numbers = #tpu.dot_dimension_numbers<[1], [0], [0], [1], [0, 0, 1, 1], [], []>} : vector<16x32xf32>, vector<32x96xf32>, vector<16x96xf32> -> vector<16x96xf32>
    %129 = vector.broadcast %127 : vector<1x96xf32> to vector<16x96xf32>
    %130 = arith.addf %128, %129 : vector<16x96xf32>
    %131 = vector.extract_strided_slice %130 {offsets = [0, 0], sizes = [16, 32], strides = [1, 1]} : vector<16x96xf32> to vector<16x32xf32>
    %132 = vector.extract_strided_slice %130 {offsets = [0, 32], sizes = [16, 32], strides = [1, 1]} : vector<16x96xf32> to vector<16x32xf32>
    %133 = vector.extract_strided_slice %130 {offsets = [0, 64], sizes = [16, 32], strides = [1, 1]} : vector<16x96xf32> to vector<16x32xf32>
    %134 = vector.extract_strided_slice %131 {offsets = [0, 0], sizes = [16, 8], strides = [1, 1]} : vector<16x32xf32> to vector<16x8xf32>
    %135 = vector.extract_strided_slice %131 {offsets = [0, 8], sizes = [16, 8], strides = [1, 1]} : vector<16x32xf32> to vector<16x8xf32>
    %136 = vector.extract_strided_slice %131 {offsets = [0, 16], sizes = [16, 8], strides = [1, 1]} : vector<16x32xf32> to vector<16x8xf32>
    %137 = vector.extract_strided_slice %131 {offsets = [0, 24], sizes = [16, 8], strides = [1, 1]} : vector<16x32xf32> to vector<16x8xf32>
    %138 = vector.shape_cast %134 : vector<16x8xf32> to vector<1x16x8xf32>
    %139 = vector.shape_cast %135 : vector<16x8xf32> to vector<1x16x8xf32>
    %140 = vector.shape_cast %136 : vector<16x8xf32> to vector<1x16x8xf32>
    %141 = vector.shape_cast %137 : vector<16x8xf32> to vector<1x16x8xf32>
    %142 = tpu.concatenate %138, %139, %140, %141 in 0 : vector<1x16x8xf32>, vector<1x16x8xf32>, vector<1x16x8xf32>, vector<1x16x8xf32> -> vector<4x16x8xf32>
    %143 = vector.extract_strided_slice %132 {offsets = [0, 0], sizes = [16, 8], strides = [1, 1]} : vector<16x32xf32> to vector<16x8xf32>
    %144 = vector.extract_strided_slice %132 {offsets = [0, 8], sizes = [16, 8], strides = [1, 1]} : vector<16x32xf32> to vector<16x8xf32>
    %145 = vector.extract_strided_slice %132 {offsets = [0, 16], sizes = [16, 8], strides = [1, 1]} : vector<16x32xf32> to vector<16x8xf32>
    %146 = vector.extract_strided_slice %132 {offsets = [0, 24], sizes = [16, 8], strides = [1, 1]} : vector<16x32xf32> to vector<16x8xf32>
    %147 = vector.shape_cast %143 : vector<16x8xf32> to vector<1x16x8xf32>
    %148 = vector.shape_cast %144 : vector<16x8xf32> to vector<1x16x8xf32>
    %149 = vector.shape_cast %145 : vector<16x8xf32> to vector<1x16x8xf32>
    %150 = vector.shape_cast %146 : vector<16x8xf32> to vector<1x16x8xf32>
    %151 = tpu.concatenate %147, %148, %149, %150 in 0 : vector<1x16x8xf32>, vector<1x16x8xf32>, vector<1x16x8xf32>, vector<1x16x8xf32> -> vector<4x16x8xf32>
    %152 = vector.extract_strided_slice %133 {offsets = [0, 0], sizes = [16, 8], strides = [1, 1]} : vector<16x32xf32> to vector<16x8xf32>
    %153 = vector.extract_strided_slice %133 {offsets = [0, 8], sizes = [16, 8], strides = [1, 1]} : vector<16x32xf32> to vector<16x8xf32>
    %154 = vector.extract_strided_slice %133 {offsets = [0, 16], sizes = [16, 8], strides = [1, 1]} : vector<16x32xf32> to vector<16x8xf32>
    %155 = vector.extract_strided_slice %133 {offsets = [0, 24], sizes = [16, 8], strides = [1, 1]} : vector<16x32xf32> to vector<16x8xf32>
    %156 = vector.shape_cast %152 : vector<16x8xf32> to vector<1x16x8xf32>
    %157 = vector.shape_cast %153 : vector<16x8xf32> to vector<1x16x8xf32>
    %158 = vector.shape_cast %154 : vector<16x8xf32> to vector<1x16x8xf32>
    %159 = vector.shape_cast %155 : vector<16x8xf32> to vector<1x16x8xf32>
    %160 = tpu.concatenate %156, %157, %158, %159 in 0 : vector<1x16x8xf32>, vector<1x16x8xf32>, vector<1x16x8xf32>, vector<1x16x8xf32> -> vector<4x16x8xf32>
    "tpu.trace_start"() <{level = 10 : i32, message = "hqd,hkd->hqk"}> : () -> ()
    %cst_42 = arith.constant dense<0.000000e+00> : vector<4x16x16xf32>
    %161 = tpu.matmul %142, %151, %cst_42 {dimension_numbers = #tpu.dot_dimension_numbers<[2], [2], [1], [1], [0, 0, 0, 1, 1, 1], [0], [0]>} : vector<4x16x8xf32>, vector<4x16x8xf32>, vector<4x16x16xf32> -> vector<4x16x16xf32>
    "tpu.trace_stop"() : () -> ()
    %cst_43 = arith.constant dense<0xFF800000> : vector<4x16xf32>
    %162 = vector.multi_reduction <maximumf>, %161, %cst_43 [2] : vector<4x16x16xf32> to vector<4x16xf32>
    %163 = vector.shape_cast %162 : vector<4x16xf32> to vector<4x16x1xf32>
    %164 = vector.broadcast %163 : vector<4x16x1xf32> to vector<4x16x16xf32>
    %165 = arith.subf %161, %164 : vector<4x16x16xf32>
    %166 = math.exp %165 : vector<4x16x16xf32>
    %cst_44 = arith.constant dense<0.000000e+00> : vector<4x16xf32>
    %167 = vector.multi_reduction <add>, %166, %cst_44 [2] : vector<4x16x16xf32> to vector<4x16xf32>
    %168 = vector.shape_cast %167 : vector<4x16xf32> to vector<4x16x1xf32>
    %169 = vector.broadcast %168 : vector<4x16x1xf32> to vector<4x16x16xf32>
    %170 = arith.divf %166, %169 : vector<4x16x16xf32>
    "tpu.trace_start"() <{level = 10 : i32, message = "hqk,hkd->hqd"}> : () -> ()
    %cst_45 = arith.constant dense<0.000000e+00> : vector<4x16x8xf32>
    %171 = tpu.matmul %170, %160, %cst_45 {dimension_numbers = #tpu.dot_dimension_numbers<[2], [1], [1], [2], [0, 0, 0, 1, 1, 2], [0], [0]>} : vector<4x16x16xf32>, vector<4x16x8xf32>, vector<4x16x8xf32> -> vector<4x16x8xf32>
    "tpu.trace_stop"() : () -> ()
    %172 = vector.extract_strided_slice %171 {offsets = [0, 0, 0], sizes = [1, 16, 8], strides = [1, 1, 1]} : vector<4x16x8xf32> to vector<1x16x8xf32>
    %173 = vector.shape_cast %172 : vector<1x16x8xf32> to vector<16x8xf32>
    %174 = vector.extract_strided_slice %171 {offsets = [1, 0, 0], sizes = [1, 16, 8], strides = [1, 1, 1]} : vector<4x16x8xf32> to vector<1x16x8xf32>
    %175 = vector.shape_cast %174 : vector<1x16x8xf32> to vector<16x8xf32>
    %176 = vector.extract_strided_slice %171 {offsets = [2, 0, 0], sizes = [1, 16, 8], strides = [1, 1, 1]} : vector<4x16x8xf32> to vector<1x16x8xf32>
    %177 = vector.shape_cast %176 : vector<1x16x8xf32> to vector<16x8xf32>
    %178 = vector.extract_strided_slice %171 {offsets = [3, 0, 0], sizes = [1, 16, 8], strides = [1, 1, 1]} : vector<4x16x8xf32> to vector<1x16x8xf32>
    %179 = vector.shape_cast %178 : vector<1x16x8xf32> to vector<16x8xf32>
    %180 = tpu.concatenate %173, %175, %177, %179 in 1 : vector<16x8xf32>, vector<16x8xf32>, vector<16x8xf32>, vector<16x8xf32> -> vector<16x32xf32>
    %c0_46 = arith.constant 0 : index
    %c512 = arith.constant 512 : index
    %181 = vector.load %arg3[%c0_46, %c512] : memref<32x2176xf32, #tpu.memory_space<vmem>>, vector<32x32xf32>
    %cst_47 = arith.constant dense<0.000000e+00> : vector<16x32xf32>
    %182 = tpu.matmul %180, %181, %cst_47 {dimension_numbers = #tpu.dot_dimension_numbers<[1], [0], [0], [1], [0, 0, 1, 1], [], []>} : vector<16x32xf32>, vector<32x32xf32>, vector<16x32xf32> -> vector<16x32xf32>
    %c10 = arith.constant 10 : index
    %c0_48 = arith.constant 0 : index
    %183 = vector.load %arg5[%c10, %c0_48] : memref<48x128xf32, #tpu.memory_space<vmem>>, vector<1x32xf32>
    %184 = vector.broadcast %183 : vector<1x32xf32> to vector<16x32xf32>
    %185 = arith.addf %182, %184 : vector<16x32xf32>
    %186 = arith.addf %125, %185 : vector<16x32xf32>
    %cst_49 = arith.constant dense<0.000000e+00> : vector<16xf32>
    %187 = vector.multi_reduction <add>, %186, %cst_49 [1] : vector<16x32xf32> to vector<16xf32>
    %188 = vector.shape_cast %187 : vector<16xf32> to vector<16x1xf32>
    %cst_50 = arith.constant 3.200000e+01 : f32
    %189 = vector.broadcast %cst_50 : f32 to vector<16x1xf32>
    %190 = arith.divf %188, %189 : vector<16x1xf32>
    %191 = vector.broadcast %190 : vector<16x1xf32> to vector<16x32xf32>
    %192 = arith.subf %186, %191 : vector<16x32xf32>
    %193 = arith.mulf %192, %192 : vector<16x32xf32>
    %cst_51 = arith.constant dense<0.000000e+00> : vector<16xf32>
    %194 = vector.multi_reduction <add>, %193, %cst_51 [1] : vector<16x32xf32> to vector<16xf32>
    %195 = vector.shape_cast %194 : vector<16xf32> to vector<16x1xf32>
    %cst_52 = arith.constant 3.200000e+01 : f32
    %196 = vector.broadcast %cst_52 : f32 to vector<16x1xf32>
    %197 = arith.divf %195, %196 : vector<16x1xf32>
    %cst_53 = arith.constant 9.99999974E-6 : f32
    %198 = vector.broadcast %cst_53 : f32 to vector<16x1xf32>
    %199 = arith.addf %197, %198 : vector<16x1xf32>
    %200 = math.rsqrt %199 : vector<16x1xf32>
    %201 = vector.broadcast %200 : vector<16x1xf32> to vector<16x32xf32>
    %202 = arith.mulf %192, %201 : vector<16x32xf32>
    %c11 = arith.constant 11 : index
    %c0_54 = arith.constant 0 : index
    %203 = vector.load %arg5[%c11, %c0_54] : memref<48x128xf32, #tpu.memory_space<vmem>>, vector<1x32xf32>
    %204 = vector.broadcast %203 : vector<1x32xf32> to vector<16x32xf32>
    %205 = arith.mulf %202, %204 : vector<16x32xf32>
    %c12 = arith.constant 12 : index
    %c0_55 = arith.constant 0 : index
    %206 = vector.load %arg5[%c12, %c0_55] : memref<48x128xf32, #tpu.memory_space<vmem>>, vector<1x32xf32>
    %207 = vector.broadcast %206 : vector<1x32xf32> to vector<16x32xf32>
    %208 = arith.addf %205, %207 : vector<16x32xf32>
    %c0_56 = arith.constant 0 : index
    %c640 = arith.constant 640 : index
    %209 = vector.load %arg3[%c0_56, %c640] : memref<32x2176xf32, #tpu.memory_space<vmem>>, vector<32x128xf32>
    %cst_57 = arith.constant dense<0.000000e+00> : vector<16x128xf32>
    %210 = tpu.matmul %208, %209, %cst_57 {dimension_numbers = #tpu.dot_dimension_numbers<[1], [0], [0], [1], [0, 0, 1, 1], [], []>} : vector<16x32xf32>, vector<32x128xf32>, vector<16x128xf32> -> vector<16x128xf32>
    %c13 = arith.constant 13 : index
    %c0_58 = arith.constant 0 : index
    %211 = vector.load %arg5[%c13, %c0_58] : memref<48x128xf32, #tpu.memory_space<vmem>>, vector<1x128xf32>
    %212 = vector.broadcast %211 : vector<1x128xf32> to vector<16x128xf32>
    %213 = arith.addf %210, %212 : vector<16x128xf32>
    %cst_59 = arith.constant 0.000000e+00 : f32
    %214 = vector.broadcast %cst_59 : f32 to vector<16x128xf32>
    %215 = arith.maximumf %213, %214 : vector<16x128xf32>
    %c192 = arith.constant 192 : index
    %c0_60 = arith.constant 0 : index
    %216 = vector.load %arg4[%c192, %c0_60] : memref<576x32xf32, #tpu.memory_space<vmem>>, vector<128x32xf32>
    %cst_61 = arith.constant dense<0.000000e+00> : vector<16x32xf32>
    %217 = tpu.matmul %215, %216, %cst_61 {dimension_numbers = #tpu.dot_dimension_numbers<[1], [0], [0], [1], [0, 0, 1, 1], [], []>} : vector<16x128xf32>, vector<128x32xf32>, vector<16x32xf32> -> vector<16x32xf32>
    %c14 = arith.constant 14 : index
    %c0_62 = arith.constant 0 : index
    %218 = vector.load %arg5[%c14, %c0_62] : memref<48x128xf32, #tpu.memory_space<vmem>>, vector<1x32xf32>
    %219 = vector.broadcast %218 : vector<1x32xf32> to vector<16x32xf32>
    %220 = arith.addf %217, %219 : vector<16x32xf32>
    %221 = arith.addf %208, %220 : vector<16x32xf32>
    %cst_63 = arith.constant dense<0.000000e+00> : vector<16xf32>
    %222 = vector.multi_reduction <add>, %221, %cst_63 [1] : vector<16x32xf32> to vector<16xf32>
    %223 = vector.shape_cast %222 : vector<16xf32> to vector<16x1xf32>
    %cst_64 = arith.constant 3.200000e+01 : f32
    %224 = vector.broadcast %cst_64 : f32 to vector<16x1xf32>
    %225 = arith.divf %223, %224 : vector<16x1xf32>
    %226 = vector.broadcast %225 : vector<16x1xf32> to vector<16x32xf32>
    %227 = arith.subf %221, %226 : vector<16x32xf32>
    %228 = arith.mulf %227, %227 : vector<16x32xf32>
    %cst_65 = arith.constant dense<0.000000e+00> : vector<16xf32>
    %229 = vector.multi_reduction <add>, %228, %cst_65 [1] : vector<16x32xf32> to vector<16xf32>
    %230 = vector.shape_cast %229 : vector<16xf32> to vector<16x1xf32>
    %cst_66 = arith.constant 3.200000e+01 : f32
    %231 = vector.broadcast %cst_66 : f32 to vector<16x1xf32>
    %232 = arith.divf %230, %231 : vector<16x1xf32>
    %cst_67 = arith.constant 9.99999974E-6 : f32
    %233 = vector.broadcast %cst_67 : f32 to vector<16x1xf32>
    %234 = arith.addf %232, %233 : vector<16x1xf32>
    %235 = math.rsqrt %234 : vector<16x1xf32>
    %236 = vector.broadcast %235 : vector<16x1xf32> to vector<16x32xf32>
    %237 = arith.mulf %227, %236 : vector<16x32xf32>
    %c15 = arith.constant 15 : index
    %c0_68 = arith.constant 0 : index
    %238 = vector.load %arg5[%c15, %c0_68] : memref<48x128xf32, #tpu.memory_space<vmem>>, vector<1x32xf32>
    %239 = vector.broadcast %238 : vector<1x32xf32> to vector<16x32xf32>
    %240 = arith.mulf %237, %239 : vector<16x32xf32>
    %c16 = arith.constant 16 : index
    %c0_69 = arith.constant 0 : index
    %241 = vector.load %arg5[%c16, %c0_69] : memref<48x128xf32, #tpu.memory_space<vmem>>, vector<1x32xf32>
    %242 = vector.broadcast %241 : vector<1x32xf32> to vector<16x32xf32>
    %243 = arith.addf %240, %242 : vector<16x32xf32>
    %c0_70 = arith.constant 0 : index
    %c768 = arith.constant 768 : index
    %244 = vector.load %arg3[%c0_70, %c768] : memref<32x2176xf32, #tpu.memory_space<vmem>>, vector<32x96xf32>
    %c17 = arith.constant 17 : index
    %c0_71 = arith.constant 0 : index
    %245 = vector.load %arg5[%c17, %c0_71] : memref<48x128xf32, #tpu.memory_space<vmem>>, vector<1x96xf32>
    %cst_72 = arith.constant dense<0.000000e+00> : vector<16x96xf32>
    %246 = tpu.matmul %0, %244, %cst_72 {dimension_numbers = #tpu.dot_dimension_numbers<[1], [0], [0], [1], [0, 0, 1, 1], [], []>} : vector<16x32xf32>, vector<32x96xf32>, vector<16x96xf32> -> vector<16x96xf32>
    %247 = vector.broadcast %245 : vector<1x96xf32> to vector<16x96xf32>
    %248 = arith.addf %246, %247 : vector<16x96xf32>
    %249 = vector.extract_strided_slice %248 {offsets = [0, 0], sizes = [16, 32], strides = [1, 1]} : vector<16x96xf32> to vector<16x32xf32>
    %250 = vector.extract_strided_slice %248 {offsets = [0, 32], sizes = [16, 32], strides = [1, 1]} : vector<16x96xf32> to vector<16x32xf32>
    %251 = vector.extract_strided_slice %248 {offsets = [0, 64], sizes = [16, 32], strides = [1, 1]} : vector<16x96xf32> to vector<16x32xf32>
    %252 = vector.extract_strided_slice %249 {offsets = [0, 0], sizes = [16, 8], strides = [1, 1]} : vector<16x32xf32> to vector<16x8xf32>
    %253 = vector.extract_strided_slice %249 {offsets = [0, 8], sizes = [16, 8], strides = [1, 1]} : vector<16x32xf32> to vector<16x8xf32>
    %254 = vector.extract_strided_slice %249 {offsets = [0, 16], sizes = [16, 8], strides = [1, 1]} : vector<16x32xf32> to vector<16x8xf32>
    %255 = vector.extract_strided_slice %249 {offsets = [0, 24], sizes = [16, 8], strides = [1, 1]} : vector<16x32xf32> to vector<16x8xf32>
    %256 = vector.shape_cast %252 : vector<16x8xf32> to vector<1x16x8xf32>
    %257 = vector.shape_cast %253 : vector<16x8xf32> to vector<1x16x8xf32>
    %258 = vector.shape_cast %254 : vector<16x8xf32> to vector<1x16x8xf32>
    %259 = vector.shape_cast %255 : vector<16x8xf32> to vector<1x16x8xf32>
    %260 = tpu.concatenate %256, %257, %258, %259 in 0 : vector<1x16x8xf32>, vector<1x16x8xf32>, vector<1x16x8xf32>, vector<1x16x8xf32> -> vector<4x16x8xf32>
    %261 = vector.extract_strided_slice %250 {offsets = [0, 0], sizes = [16, 8], strides = [1, 1]} : vector<16x32xf32> to vector<16x8xf32>
    %262 = vector.extract_strided_slice %250 {offsets = [0, 8], sizes = [16, 8], strides = [1, 1]} : vector<16x32xf32> to vector<16x8xf32>
    %263 = vector.extract_strided_slice %250 {offsets = [0, 16], sizes = [16, 8], strides = [1, 1]} : vector<16x32xf32> to vector<16x8xf32>
    %264 = vector.extract_strided_slice %250 {offsets = [0, 24], sizes = [16, 8], strides = [1, 1]} : vector<16x32xf32> to vector<16x8xf32>
    %265 = vector.shape_cast %261 : vector<16x8xf32> to vector<1x16x8xf32>
    %266 = vector.shape_cast %262 : vector<16x8xf32> to vector<1x16x8xf32>
    %267 = vector.shape_cast %263 : vector<16x8xf32> to vector<1x16x8xf32>
    %268 = vector.shape_cast %264 : vector<16x8xf32> to vector<1x16x8xf32>
    %269 = tpu.concatenate %265, %266, %267, %268 in 0 : vector<1x16x8xf32>, vector<1x16x8xf32>, vector<1x16x8xf32>, vector<1x16x8xf32> -> vector<4x16x8xf32>
    %270 = vector.extract_strided_slice %251 {offsets = [0, 0], sizes = [16, 8], strides = [1, 1]} : vector<16x32xf32> to vector<16x8xf32>
    %271 = vector.extract_strided_slice %251 {offsets = [0, 8], sizes = [16, 8], strides = [1, 1]} : vector<16x32xf32> to vector<16x8xf32>
    %272 = vector.extract_strided_slice %251 {offsets = [0, 16], sizes = [16, 8], strides = [1, 1]} : vector<16x32xf32> to vector<16x8xf32>
    %273 = vector.extract_strided_slice %251 {offsets = [0, 24], sizes = [16, 8], strides = [1, 1]} : vector<16x32xf32> to vector<16x8xf32>
    %274 = vector.shape_cast %270 : vector<16x8xf32> to vector<1x16x8xf32>
    %275 = vector.shape_cast %271 : vector<16x8xf32> to vector<1x16x8xf32>
    %276 = vector.shape_cast %272 : vector<16x8xf32> to vector<1x16x8xf32>
    %277 = vector.shape_cast %273 : vector<16x8xf32> to vector<1x16x8xf32>
    %278 = tpu.concatenate %274, %275, %276, %277 in 0 : vector<1x16x8xf32>, vector<1x16x8xf32>, vector<1x16x8xf32>, vector<1x16x8xf32> -> vector<4x16x8xf32>
    "tpu.trace_start"() <{level = 10 : i32, message = "hqd,hkd->hqk"}> : () -> ()
    %cst_73 = arith.constant dense<0.000000e+00> : vector<4x16x16xf32>
    %279 = tpu.matmul %260, %269, %cst_73 {dimension_numbers = #tpu.dot_dimension_numbers<[2], [2], [1], [1], [0, 0, 0, 1, 1, 1], [0], [0]>} : vector<4x16x8xf32>, vector<4x16x8xf32>, vector<4x16x16xf32> -> vector<4x16x16xf32>
    "tpu.trace_stop"() : () -> ()
    %cst_74 = arith.constant dense<0xFF800000> : vector<4x16xf32>
    %280 = vector.multi_reduction <maximumf>, %279, %cst_74 [2] : vector<4x16x16xf32> to vector<4x16xf32>
    %281 = vector.shape_cast %280 : vector<4x16xf32> to vector<4x16x1xf32>
    %282 = vector.broadcast %281 : vector<4x16x1xf32> to vector<4x16x16xf32>
    %283 = arith.subf %279, %282 : vector<4x16x16xf32>
    %284 = math.exp %283 : vector<4x16x16xf32>
    %cst_75 = arith.constant dense<0.000000e+00> : vector<4x16xf32>
    %285 = vector.multi_reduction <add>, %284, %cst_75 [2] : vector<4x16x16xf32> to vector<4x16xf32>
    %286 = vector.shape_cast %285 : vector<4x16xf32> to vector<4x16x1xf32>
    %287 = vector.broadcast %286 : vector<4x16x1xf32> to vector<4x16x16xf32>
    %288 = arith.divf %284, %287 : vector<4x16x16xf32>
    "tpu.trace_start"() <{level = 10 : i32, message = "hqk,hkd->hqd"}> : () -> ()
    %cst_76 = arith.constant dense<0.000000e+00> : vector<4x16x8xf32>
    %289 = tpu.matmul %288, %278, %cst_76 {dimension_numbers = #tpu.dot_dimension_numbers<[2], [1], [1], [2], [0, 0, 0, 1, 1, 2], [0], [0]>} : vector<4x16x16xf32>, vector<4x16x8xf32>, vector<4x16x8xf32> -> vector<4x16x8xf32>
    "tpu.trace_stop"() : () -> ()
    %290 = vector.extract_strided_slice %289 {offsets = [0, 0, 0], sizes = [1, 16, 8], strides = [1, 1, 1]} : vector<4x16x8xf32> to vector<1x16x8xf32>
    %291 = vector.shape_cast %290 : vector<1x16x8xf32> to vector<16x8xf32>
    %292 = vector.extract_strided_slice %289 {offsets = [1, 0, 0], sizes = [1, 16, 8], strides = [1, 1, 1]} : vector<4x16x8xf32> to vector<1x16x8xf32>
    %293 = vector.shape_cast %292 : vector<1x16x8xf32> to vector<16x8xf32>
    %294 = vector.extract_strided_slice %289 {offsets = [2, 0, 0], sizes = [1, 16, 8], strides = [1, 1, 1]} : vector<4x16x8xf32> to vector<1x16x8xf32>
    %295 = vector.shape_cast %294 : vector<1x16x8xf32> to vector<16x8xf32>
    %296 = vector.extract_strided_slice %289 {offsets = [3, 0, 0], sizes = [1, 16, 8], strides = [1, 1, 1]} : vector<4x16x8xf32> to vector<1x16x8xf32>
    %297 = vector.shape_cast %296 : vector<1x16x8xf32> to vector<16x8xf32>
    %298 = tpu.concatenate %291, %293, %295, %297 in 1 : vector<16x8xf32>, vector<16x8xf32>, vector<16x8xf32>, vector<16x8xf32> -> vector<16x32xf32>
    %c0_77 = arith.constant 0 : index
    %c896 = arith.constant 896 : index
    %299 = vector.load %arg3[%c0_77, %c896] : memref<32x2176xf32, #tpu.memory_space<vmem>>, vector<32x32xf32>
    %cst_78 = arith.constant dense<0.000000e+00> : vector<16x32xf32>
    %300 = tpu.matmul %298, %299, %cst_78 {dimension_numbers = #tpu.dot_dimension_numbers<[1], [0], [0], [1], [0, 0, 1, 1], [], []>} : vector<16x32xf32>, vector<32x32xf32>, vector<16x32xf32> -> vector<16x32xf32>
    %c18 = arith.constant 18 : index
    %c0_79 = arith.constant 0 : index
    %301 = vector.load %arg5[%c18, %c0_79] : memref<48x128xf32, #tpu.memory_space<vmem>>, vector<1x32xf32>
    %302 = vector.broadcast %301 : vector<1x32xf32> to vector<16x32xf32>
    %303 = arith.addf %300, %302 : vector<16x32xf32>
    %304 = arith.addf %0, %303 : vector<16x32xf32>
    %cst_80 = arith.constant dense<0.000000e+00> : vector<16xf32>
    %305 = vector.multi_reduction <add>, %304, %cst_80 [1] : vector<16x32xf32> to vector<16xf32>
    %306 = vector.shape_cast %305 : vector<16xf32> to vector<16x1xf32>
    %cst_81 = arith.constant 3.200000e+01 : f32
    %307 = vector.broadcast %cst_81 : f32 to vector<16x1xf32>
    %308 = arith.divf %306, %307 : vector<16x1xf32>
    %309 = vector.broadcast %308 : vector<16x1xf32> to vector<16x32xf32>
    %310 = arith.subf %304, %309 : vector<16x32xf32>
    %311 = arith.mulf %310, %310 : vector<16x32xf32>
    %cst_82 = arith.constant dense<0.000000e+00> : vector<16xf32>
    %312 = vector.multi_reduction <add>, %311, %cst_82 [1] : vector<16x32xf32> to vector<16xf32>
    %313 = vector.shape_cast %312 : vector<16xf32> to vector<16x1xf32>
    %cst_83 = arith.constant 3.200000e+01 : f32
    %314 = vector.broadcast %cst_83 : f32 to vector<16x1xf32>
    %315 = arith.divf %313, %314 : vector<16x1xf32>
    %cst_84 = arith.constant 9.99999974E-6 : f32
    %316 = vector.broadcast %cst_84 : f32 to vector<16x1xf32>
    %317 = arith.addf %315, %316 : vector<16x1xf32>
    %318 = math.rsqrt %317 : vector<16x1xf32>
    %319 = vector.broadcast %318 : vector<16x1xf32> to vector<16x32xf32>
    %320 = arith.mulf %310, %319 : vector<16x32xf32>
    %c19 = arith.constant 19 : index
    %c0_85 = arith.constant 0 : index
    %321 = vector.load %arg5[%c19, %c0_85] : memref<48x128xf32, #tpu.memory_space<vmem>>, vector<1x32xf32>
    %322 = vector.broadcast %321 : vector<1x32xf32> to vector<16x32xf32>
    %323 = arith.mulf %320, %322 : vector<16x32xf32>
    %c20 = arith.constant 20 : index
    %c0_86 = arith.constant 0 : index
    %324 = vector.load %arg5[%c20, %c0_86] : memref<48x128xf32, #tpu.memory_space<vmem>>, vector<1x32xf32>
    %325 = vector.broadcast %324 : vector<1x32xf32> to vector<16x32xf32>
    %326 = arith.addf %323, %325 : vector<16x32xf32>
    %c0_87 = arith.constant 0 : index
    %c1024 = arith.constant 1024 : index
    %327 = vector.load %arg3[%c0_87, %c1024] : memref<32x2176xf32, #tpu.memory_space<vmem>>, vector<32x96xf32>
    %c21 = arith.constant 21 : index
    %c0_88 = arith.constant 0 : index
    %328 = vector.load %arg5[%c21, %c0_88] : memref<48x128xf32, #tpu.memory_space<vmem>>, vector<1x96xf32>
    %329 = vector.extract_strided_slice %327 {offsets = [0, 0], sizes = [32, 32], strides = [1, 1]} : vector<32x96xf32> to vector<32x32xf32>
    %cst_89 = arith.constant dense<0.000000e+00> : vector<16x32xf32>
    %330 = tpu.matmul %326, %329, %cst_89 {dimension_numbers = #tpu.dot_dimension_numbers<[1], [0], [0], [1], [0, 0, 1, 1], [], []>} : vector<16x32xf32>, vector<32x32xf32>, vector<16x32xf32> -> vector<16x32xf32>
    %331 = vector.extract_strided_slice %328 {offsets = [0, 0], sizes = [1, 32], strides = [1, 1]} : vector<1x96xf32> to vector<1x32xf32>
    %332 = vector.broadcast %331 : vector<1x32xf32> to vector<16x32xf32>
    %333 = arith.addf %330, %332 : vector<16x32xf32>
    %334 = vector.extract_strided_slice %327 {offsets = [0, 32], sizes = [32, 64], strides = [1, 1]} : vector<32x96xf32> to vector<32x64xf32>
    %cst_90 = arith.constant dense<0.000000e+00> : vector<16x64xf32>
    %335 = tpu.matmul %243, %334, %cst_90 {dimension_numbers = #tpu.dot_dimension_numbers<[1], [0], [0], [1], [0, 0, 1, 1], [], []>} : vector<16x32xf32>, vector<32x64xf32>, vector<16x64xf32> -> vector<16x64xf32>
    %336 = vector.extract_strided_slice %328 {offsets = [0, 32], sizes = [1, 64], strides = [1, 1]} : vector<1x96xf32> to vector<1x64xf32>
    %337 = vector.broadcast %336 : vector<1x64xf32> to vector<16x64xf32>
    %338 = arith.addf %335, %337 : vector<16x64xf32>
    %339 = vector.extract_strided_slice %338 {offsets = [0, 0], sizes = [16, 32], strides = [1, 1]} : vector<16x64xf32> to vector<16x32xf32>
    %340 = vector.extract_strided_slice %338 {offsets = [0, 32], sizes = [16, 32], strides = [1, 1]} : vector<16x64xf32> to vector<16x32xf32>
    %341 = vector.extract_strided_slice %333 {offsets = [0, 0], sizes = [16, 8], strides = [1, 1]} : vector<16x32xf32> to vector<16x8xf32>
    %342 = vector.extract_strided_slice %333 {offsets = [0, 8], sizes = [16, 8], strides = [1, 1]} : vector<16x32xf32> to vector<16x8xf32>
    %343 = vector.extract_strided_slice %333 {offsets = [0, 16], sizes = [16, 8], strides = [1, 1]} : vector<16x32xf32> to vector<16x8xf32>
    %344 = vector.extract_strided_slice %333 {offsets = [0, 24], sizes = [16, 8], strides = [1, 1]} : vector<16x32xf32> to vector<16x8xf32>
    %345 = vector.shape_cast %341 : vector<16x8xf32> to vector<1x16x8xf32>
    %346 = vector.shape_cast %342 : vector<16x8xf32> to vector<1x16x8xf32>
    %347 = vector.shape_cast %343 : vector<16x8xf32> to vector<1x16x8xf32>
    %348 = vector.shape_cast %344 : vector<16x8xf32> to vector<1x16x8xf32>
    %349 = tpu.concatenate %345, %346, %347, %348 in 0 : vector<1x16x8xf32>, vector<1x16x8xf32>, vector<1x16x8xf32>, vector<1x16x8xf32> -> vector<4x16x8xf32>
    %350 = vector.extract_strided_slice %339 {offsets = [0, 0], sizes = [16, 8], strides = [1, 1]} : vector<16x32xf32> to vector<16x8xf32>
    %351 = vector.extract_strided_slice %339 {offsets = [0, 8], sizes = [16, 8], strides = [1, 1]} : vector<16x32xf32> to vector<16x8xf32>
    %352 = vector.extract_strided_slice %339 {offsets = [0, 16], sizes = [16, 8], strides = [1, 1]} : vector<16x32xf32> to vector<16x8xf32>
    %353 = vector.extract_strided_slice %339 {offsets = [0, 24], sizes = [16, 8], strides = [1, 1]} : vector<16x32xf32> to vector<16x8xf32>
    %354 = vector.shape_cast %350 : vector<16x8xf32> to vector<1x16x8xf32>
    %355 = vector.shape_cast %351 : vector<16x8xf32> to vector<1x16x8xf32>
    %356 = vector.shape_cast %352 : vector<16x8xf32> to vector<1x16x8xf32>
    %357 = vector.shape_cast %353 : vector<16x8xf32> to vector<1x16x8xf32>
    %358 = tpu.concatenate %354, %355, %356, %357 in 0 : vector<1x16x8xf32>, vector<1x16x8xf32>, vector<1x16x8xf32>, vector<1x16x8xf32> -> vector<4x16x8xf32>
    %359 = vector.extract_strided_slice %340 {offsets = [0, 0], sizes = [16, 8], strides = [1, 1]} : vector<16x32xf32> to vector<16x8xf32>
    %360 = vector.extract_strided_slice %340 {offsets = [0, 8], sizes = [16, 8], strides = [1, 1]} : vector<16x32xf32> to vector<16x8xf32>
    %361 = vector.extract_strided_slice %340 {offsets = [0, 16], sizes = [16, 8], strides = [1, 1]} : vector<16x32xf32> to vector<16x8xf32>
    %362 = vector.extract_strided_slice %340 {offsets = [0, 24], sizes = [16, 8], strides = [1, 1]} : vector<16x32xf32> to vector<16x8xf32>
    %363 = vector.shape_cast %359 : vector<16x8xf32> to vector<1x16x8xf32>
    %364 = vector.shape_cast %360 : vector<16x8xf32> to vector<1x16x8xf32>
    %365 = vector.shape_cast %361 : vector<16x8xf32> to vector<1x16x8xf32>
    %366 = vector.shape_cast %362 : vector<16x8xf32> to vector<1x16x8xf32>
    %367 = tpu.concatenate %363, %364, %365, %366 in 0 : vector<1x16x8xf32>, vector<1x16x8xf32>, vector<1x16x8xf32>, vector<1x16x8xf32> -> vector<4x16x8xf32>
    "tpu.trace_start"() <{level = 10 : i32, message = "hqd,hkd->hqk"}> : () -> ()
    %cst_91 = arith.constant dense<0.000000e+00> : vector<4x16x16xf32>
    %368 = tpu.matmul %349, %358, %cst_91 {dimension_numbers = #tpu.dot_dimension_numbers<[2], [2], [1], [1], [0, 0, 0, 1, 1, 1], [0], [0]>} : vector<4x16x8xf32>, vector<4x16x8xf32>, vector<4x16x16xf32> -> vector<4x16x16xf32>
    "tpu.trace_stop"() : () -> ()
    %cst_92 = arith.constant dense<0xFF800000> : vector<4x16xf32>
    %369 = vector.multi_reduction <maximumf>, %368, %cst_92 [2] : vector<4x16x16xf32> to vector<4x16xf32>
    %370 = vector.shape_cast %369 : vector<4x16xf32> to vector<4x16x1xf32>
    %371 = vector.broadcast %370 : vector<4x16x1xf32> to vector<4x16x16xf32>
    %372 = arith.subf %368, %371 : vector<4x16x16xf32>
    %373 = math.exp %372 : vector<4x16x16xf32>
    %cst_93 = arith.constant dense<0.000000e+00> : vector<4x16xf32>
    %374 = vector.multi_reduction <add>, %373, %cst_93 [2] : vector<4x16x16xf32> to vector<4x16xf32>
    %375 = vector.shape_cast %374 : vector<4x16xf32> to vector<4x16x1xf32>
    %376 = vector.broadcast %375 : vector<4x16x1xf32> to vector<4x16x16xf32>
    %377 = arith.divf %373, %376 : vector<4x16x16xf32>
    "tpu.trace_start"() <{level = 10 : i32, message = "hqk,hkd->hqd"}> : () -> ()
    %cst_94 = arith.constant dense<0.000000e+00> : vector<4x16x8xf32>
    %378 = tpu.matmul %377, %367, %cst_94 {dimension_numbers = #tpu.dot_dimension_numbers<[2], [1], [1], [2], [0, 0, 0, 1, 1, 2], [0], [0]>} : vector<4x16x16xf32>, vector<4x16x8xf32>, vector<4x16x8xf32> -> vector<4x16x8xf32>
    "tpu.trace_stop"() : () -> ()
    %379 = vector.extract_strided_slice %378 {offsets = [0, 0, 0], sizes = [1, 16, 8], strides = [1, 1, 1]} : vector<4x16x8xf32> to vector<1x16x8xf32>
    %380 = vector.shape_cast %379 : vector<1x16x8xf32> to vector<16x8xf32>
    %381 = vector.extract_strided_slice %378 {offsets = [1, 0, 0], sizes = [1, 16, 8], strides = [1, 1, 1]} : vector<4x16x8xf32> to vector<1x16x8xf32>
    %382 = vector.shape_cast %381 : vector<1x16x8xf32> to vector<16x8xf32>
    %383 = vector.extract_strided_slice %378 {offsets = [2, 0, 0], sizes = [1, 16, 8], strides = [1, 1, 1]} : vector<4x16x8xf32> to vector<1x16x8xf32>
    %384 = vector.shape_cast %383 : vector<1x16x8xf32> to vector<16x8xf32>
    %385 = vector.extract_strided_slice %378 {offsets = [3, 0, 0], sizes = [1, 16, 8], strides = [1, 1, 1]} : vector<4x16x8xf32> to vector<1x16x8xf32>
    %386 = vector.shape_cast %385 : vector<1x16x8xf32> to vector<16x8xf32>
    %387 = tpu.concatenate %380, %382, %384, %386 in 1 : vector<16x8xf32>, vector<16x8xf32>, vector<16x8xf32>, vector<16x8xf32> -> vector<16x32xf32>
    %c0_95 = arith.constant 0 : index
    %c1152 = arith.constant 1152 : index
    %388 = vector.load %arg3[%c0_95, %c1152] : memref<32x2176xf32, #tpu.memory_space<vmem>>, vector<32x32xf32>
    %cst_96 = arith.constant dense<0.000000e+00> : vector<16x32xf32>
    %389 = tpu.matmul %387, %388, %cst_96 {dimension_numbers = #tpu.dot_dimension_numbers<[1], [0], [0], [1], [0, 0, 1, 1], [], []>} : vector<16x32xf32>, vector<32x32xf32>, vector<16x32xf32> -> vector<16x32xf32>
    %c22 = arith.constant 22 : index
    %c0_97 = arith.constant 0 : index
    %390 = vector.load %arg5[%c22, %c0_97] : memref<48x128xf32, #tpu.memory_space<vmem>>, vector<1x32xf32>
    %391 = vector.broadcast %390 : vector<1x32xf32> to vector<16x32xf32>
    %392 = arith.addf %389, %391 : vector<16x32xf32>
    %393 = arith.addf %326, %392 : vector<16x32xf32>
    %cst_98 = arith.constant dense<0.000000e+00> : vector<16xf32>
    %394 = vector.multi_reduction <add>, %393, %cst_98 [1] : vector<16x32xf32> to vector<16xf32>
    %395 = vector.shape_cast %394 : vector<16xf32> to vector<16x1xf32>
    %cst_99 = arith.constant 3.200000e+01 : f32
    %396 = vector.broadcast %cst_99 : f32 to vector<16x1xf32>
    %397 = arith.divf %395, %396 : vector<16x1xf32>
    %398 = vector.broadcast %397 : vector<16x1xf32> to vector<16x32xf32>
    %399 = arith.subf %393, %398 : vector<16x32xf32>
    %400 = arith.mulf %399, %399 : vector<16x32xf32>
    %cst_100 = arith.constant dense<0.000000e+00> : vector<16xf32>
    %401 = vector.multi_reduction <add>, %400, %cst_100 [1] : vector<16x32xf32> to vector<16xf32>
    %402 = vector.shape_cast %401 : vector<16xf32> to vector<16x1xf32>
    %cst_101 = arith.constant 3.200000e+01 : f32
    %403 = vector.broadcast %cst_101 : f32 to vector<16x1xf32>
    %404 = arith.divf %402, %403 : vector<16x1xf32>
    %cst_102 = arith.constant 9.99999974E-6 : f32
    %405 = vector.broadcast %cst_102 : f32 to vector<16x1xf32>
    %406 = arith.addf %404, %405 : vector<16x1xf32>
    %407 = math.rsqrt %406 : vector<16x1xf32>
    %408 = vector.broadcast %407 : vector<16x1xf32> to vector<16x32xf32>
    %409 = arith.mulf %399, %408 : vector<16x32xf32>
    %c23 = arith.constant 23 : index
    %c0_103 = arith.constant 0 : index
    %410 = vector.load %arg5[%c23, %c0_103] : memref<48x128xf32, #tpu.memory_space<vmem>>, vector<1x32xf32>
    %411 = vector.broadcast %410 : vector<1x32xf32> to vector<16x32xf32>
    %412 = arith.mulf %409, %411 : vector<16x32xf32>
    %c24 = arith.constant 24 : index
    %c0_104 = arith.constant 0 : index
    %413 = vector.load %arg5[%c24, %c0_104] : memref<48x128xf32, #tpu.memory_space<vmem>>, vector<1x32xf32>
    %414 = vector.broadcast %413 : vector<1x32xf32> to vector<16x32xf32>
    %415 = arith.addf %412, %414 : vector<16x32xf32>
    %c0_105 = arith.constant 0 : index
    %c1280 = arith.constant 1280 : index
    %416 = vector.load %arg3[%c0_105, %c1280] : memref<32x2176xf32, #tpu.memory_space<vmem>>, vector<32x128xf32>
    %cst_106 = arith.constant dense<0.000000e+00> : vector<16x128xf32>
    %417 = tpu.matmul %415, %416, %cst_106 {dimension_numbers = #tpu.dot_dimension_numbers<[1], [0], [0], [1], [0, 0, 1, 1], [], []>} : vector<16x32xf32>, vector<32x128xf32>, vector<16x128xf32> -> vector<16x128xf32>
    %c25 = arith.constant 25 : index
    %c0_107 = arith.constant 0 : index
    %418 = vector.load %arg5[%c25, %c0_107] : memref<48x128xf32, #tpu.memory_space<vmem>>, vector<1x128xf32>
    %419 = vector.broadcast %418 : vector<1x128xf32> to vector<16x128xf32>
    %420 = arith.addf %417, %419 : vector<16x128xf32>
    %cst_108 = arith.constant 0.000000e+00 : f32
    %421 = vector.broadcast %cst_108 : f32 to vector<16x128xf32>
    %422 = arith.maximumf %420, %421 : vector<16x128xf32>
    %c320 = arith.constant 320 : index
    %c0_109 = arith.constant 0 : index
    %423 = vector.load %arg4[%c320, %c0_109] : memref<576x32xf32, #tpu.memory_space<vmem>>, vector<128x32xf32>
    %cst_110 = arith.constant dense<0.000000e+00> : vector<16x32xf32>
    %424 = tpu.matmul %422, %423, %cst_110 {dimension_numbers = #tpu.dot_dimension_numbers<[1], [0], [0], [1], [0, 0, 1, 1], [], []>} : vector<16x128xf32>, vector<128x32xf32>, vector<16x32xf32> -> vector<16x32xf32>
    %c26 = arith.constant 26 : index
    %c0_111 = arith.constant 0 : index
    %425 = vector.load %arg5[%c26, %c0_111] : memref<48x128xf32, #tpu.memory_space<vmem>>, vector<1x32xf32>
    %426 = vector.broadcast %425 : vector<1x32xf32> to vector<16x32xf32>
    %427 = arith.addf %424, %426 : vector<16x32xf32>
    %428 = arith.addf %415, %427 : vector<16x32xf32>
    %cst_112 = arith.constant dense<0.000000e+00> : vector<16xf32>
    %429 = vector.multi_reduction <add>, %428, %cst_112 [1] : vector<16x32xf32> to vector<16xf32>
    %430 = vector.shape_cast %429 : vector<16xf32> to vector<16x1xf32>
    %cst_113 = arith.constant 3.200000e+01 : f32
    %431 = vector.broadcast %cst_113 : f32 to vector<16x1xf32>
    %432 = arith.divf %430, %431 : vector<16x1xf32>
    %433 = vector.broadcast %432 : vector<16x1xf32> to vector<16x32xf32>
    %434 = arith.subf %428, %433 : vector<16x32xf32>
    %435 = arith.mulf %434, %434 : vector<16x32xf32>
    %cst_114 = arith.constant dense<0.000000e+00> : vector<16xf32>
    %436 = vector.multi_reduction <add>, %435, %cst_114 [1] : vector<16x32xf32> to vector<16xf32>
    %437 = vector.shape_cast %436 : vector<16xf32> to vector<16x1xf32>
    %cst_115 = arith.constant 3.200000e+01 : f32
    %438 = vector.broadcast %cst_115 : f32 to vector<16x1xf32>
    %439 = arith.divf %437, %438 : vector<16x1xf32>
    %cst_116 = arith.constant 9.99999974E-6 : f32
    %440 = vector.broadcast %cst_116 : f32 to vector<16x1xf32>
    %441 = arith.addf %439, %440 : vector<16x1xf32>
    %442 = math.rsqrt %441 : vector<16x1xf32>
    %443 = vector.broadcast %442 : vector<16x1xf32> to vector<16x32xf32>
    %444 = arith.mulf %434, %443 : vector<16x32xf32>
    %c27 = arith.constant 27 : index
    %c0_117 = arith.constant 0 : index
    %445 = vector.load %arg5[%c27, %c0_117] : memref<48x128xf32, #tpu.memory_space<vmem>>, vector<1x32xf32>
    %446 = vector.broadcast %445 : vector<1x32xf32> to vector<16x32xf32>
    %447 = arith.mulf %444, %446 : vector<16x32xf32>
    %c28 = arith.constant 28 : index
    %c0_118 = arith.constant 0 : index
    %448 = vector.load %arg5[%c28, %c0_118] : memref<48x128xf32, #tpu.memory_space<vmem>>, vector<1x32xf32>
    %449 = vector.broadcast %448 : vector<1x32xf32> to vector<16x32xf32>
    %450 = arith.addf %447, %449 : vector<16x32xf32>
    %c0_119 = arith.constant 0 : index
    %c1408 = arith.constant 1408 : index
    %451 = vector.load %arg3[%c0_119, %c1408] : memref<32x2176xf32, #tpu.memory_space<vmem>>, vector<32x96xf32>
    %c29 = arith.constant 29 : index
    %c0_120 = arith.constant 0 : index
    %452 = vector.load %arg5[%c29, %c0_120] : memref<48x128xf32, #tpu.memory_space<vmem>>, vector<1x96xf32>
    %cst_121 = arith.constant dense<0.000000e+00> : vector<16x96xf32>
    %453 = tpu.matmul %450, %451, %cst_121 {dimension_numbers = #tpu.dot_dimension_numbers<[1], [0], [0], [1], [0, 0, 1, 1], [], []>} : vector<16x32xf32>, vector<32x96xf32>, vector<16x96xf32> -> vector<16x96xf32>
    %454 = vector.broadcast %452 : vector<1x96xf32> to vector<16x96xf32>
    %455 = arith.addf %453, %454 : vector<16x96xf32>
    %456 = vector.extract_strided_slice %455 {offsets = [0, 0], sizes = [16, 32], strides = [1, 1]} : vector<16x96xf32> to vector<16x32xf32>
    %457 = vector.extract_strided_slice %455 {offsets = [0, 32], sizes = [16, 32], strides = [1, 1]} : vector<16x96xf32> to vector<16x32xf32>
    %458 = vector.extract_strided_slice %455 {offsets = [0, 64], sizes = [16, 32], strides = [1, 1]} : vector<16x96xf32> to vector<16x32xf32>
    %459 = vector.extract_strided_slice %456 {offsets = [0, 0], sizes = [16, 8], strides = [1, 1]} : vector<16x32xf32> to vector<16x8xf32>
    %460 = vector.extract_strided_slice %456 {offsets = [0, 8], sizes = [16, 8], strides = [1, 1]} : vector<16x32xf32> to vector<16x8xf32>
    %461 = vector.extract_strided_slice %456 {offsets = [0, 16], sizes = [16, 8], strides = [1, 1]} : vector<16x32xf32> to vector<16x8xf32>
    %462 = vector.extract_strided_slice %456 {offsets = [0, 24], sizes = [16, 8], strides = [1, 1]} : vector<16x32xf32> to vector<16x8xf32>
    %463 = vector.shape_cast %459 : vector<16x8xf32> to vector<1x16x8xf32>
    %464 = vector.shape_cast %460 : vector<16x8xf32> to vector<1x16x8xf32>
    %465 = vector.shape_cast %461 : vector<16x8xf32> to vector<1x16x8xf32>
    %466 = vector.shape_cast %462 : vector<16x8xf32> to vector<1x16x8xf32>
    %467 = tpu.concatenate %463, %464, %465, %466 in 0 : vector<1x16x8xf32>, vector<1x16x8xf32>, vector<1x16x8xf32>, vector<1x16x8xf32> -> vector<4x16x8xf32>
    %468 = vector.extract_strided_slice %457 {offsets = [0, 0], sizes = [16, 8], strides = [1, 1]} : vector<16x32xf32> to vector<16x8xf32>
    %469 = vector.extract_strided_slice %457 {offsets = [0, 8], sizes = [16, 8], strides = [1, 1]} : vector<16x32xf32> to vector<16x8xf32>
    %470 = vector.extract_strided_slice %457 {offsets = [0, 16], sizes = [16, 8], strides = [1, 1]} : vector<16x32xf32> to vector<16x8xf32>
    %471 = vector.extract_strided_slice %457 {offsets = [0, 24], sizes = [16, 8], strides = [1, 1]} : vector<16x32xf32> to vector<16x8xf32>
    %472 = vector.shape_cast %468 : vector<16x8xf32> to vector<1x16x8xf32>
    %473 = vector.shape_cast %469 : vector<16x8xf32> to vector<1x16x8xf32>
    %474 = vector.shape_cast %470 : vector<16x8xf32> to vector<1x16x8xf32>
    %475 = vector.shape_cast %471 : vector<16x8xf32> to vector<1x16x8xf32>
    %476 = tpu.concatenate %472, %473, %474, %475 in 0 : vector<1x16x8xf32>, vector<1x16x8xf32>, vector<1x16x8xf32>, vector<1x16x8xf32> -> vector<4x16x8xf32>
    %477 = vector.extract_strided_slice %458 {offsets = [0, 0], sizes = [16, 8], strides = [1, 1]} : vector<16x32xf32> to vector<16x8xf32>
    %478 = vector.extract_strided_slice %458 {offsets = [0, 8], sizes = [16, 8], strides = [1, 1]} : vector<16x32xf32> to vector<16x8xf32>
    %479 = vector.extract_strided_slice %458 {offsets = [0, 16], sizes = [16, 8], strides = [1, 1]} : vector<16x32xf32> to vector<16x8xf32>
    %480 = vector.extract_strided_slice %458 {offsets = [0, 24], sizes = [16, 8], strides = [1, 1]} : vector<16x32xf32> to vector<16x8xf32>
    %481 = vector.shape_cast %477 : vector<16x8xf32> to vector<1x16x8xf32>
    %482 = vector.shape_cast %478 : vector<16x8xf32> to vector<1x16x8xf32>
    %483 = vector.shape_cast %479 : vector<16x8xf32> to vector<1x16x8xf32>
    %484 = vector.shape_cast %480 : vector<16x8xf32> to vector<1x16x8xf32>
    %485 = tpu.concatenate %481, %482, %483, %484 in 0 : vector<1x16x8xf32>, vector<1x16x8xf32>, vector<1x16x8xf32>, vector<1x16x8xf32> -> vector<4x16x8xf32>
    "tpu.trace_start"() <{level = 10 : i32, message = "hqd,hkd->hqk"}> : () -> ()
    %cst_122 = arith.constant dense<0.000000e+00> : vector<4x16x16xf32>
    %486 = tpu.matmul %467, %476, %cst_122 {dimension_numbers = #tpu.dot_dimension_numbers<[2], [2], [1], [1], [0, 0, 0, 1, 1, 1], [0], [0]>} : vector<4x16x8xf32>, vector<4x16x8xf32>, vector<4x16x16xf32> -> vector<4x16x16xf32>
    "tpu.trace_stop"() : () -> ()
    %cst_123 = arith.constant dense<0xFF800000> : vector<4x16xf32>
    %487 = vector.multi_reduction <maximumf>, %486, %cst_123 [2] : vector<4x16x16xf32> to vector<4x16xf32>
    %488 = vector.shape_cast %487 : vector<4x16xf32> to vector<4x16x1xf32>
    %489 = vector.broadcast %488 : vector<4x16x1xf32> to vector<4x16x16xf32>
    %490 = arith.subf %486, %489 : vector<4x16x16xf32>
    %491 = math.exp %490 : vector<4x16x16xf32>
    %cst_124 = arith.constant dense<0.000000e+00> : vector<4x16xf32>
    %492 = vector.multi_reduction <add>, %491, %cst_124 [2] : vector<4x16x16xf32> to vector<4x16xf32>
    %493 = vector.shape_cast %492 : vector<4x16xf32> to vector<4x16x1xf32>
    %494 = vector.broadcast %493 : vector<4x16x1xf32> to vector<4x16x16xf32>
    %495 = arith.divf %491, %494 : vector<4x16x16xf32>
    "tpu.trace_start"() <{level = 10 : i32, message = "hqk,hkd->hqd"}> : () -> ()
    %cst_125 = arith.constant dense<0.000000e+00> : vector<4x16x8xf32>
    %496 = tpu.matmul %495, %485, %cst_125 {dimension_numbers = #tpu.dot_dimension_numbers<[2], [1], [1], [2], [0, 0, 0, 1, 1, 2], [0], [0]>} : vector<4x16x16xf32>, vector<4x16x8xf32>, vector<4x16x8xf32> -> vector<4x16x8xf32>
    "tpu.trace_stop"() : () -> ()
    %497 = vector.extract_strided_slice %496 {offsets = [0, 0, 0], sizes = [1, 16, 8], strides = [1, 1, 1]} : vector<4x16x8xf32> to vector<1x16x8xf32>
    %498 = vector.shape_cast %497 : vector<1x16x8xf32> to vector<16x8xf32>
    %499 = vector.extract_strided_slice %496 {offsets = [1, 0, 0], sizes = [1, 16, 8], strides = [1, 1, 1]} : vector<4x16x8xf32> to vector<1x16x8xf32>
    %500 = vector.shape_cast %499 : vector<1x16x8xf32> to vector<16x8xf32>
    %501 = vector.extract_strided_slice %496 {offsets = [2, 0, 0], sizes = [1, 16, 8], strides = [1, 1, 1]} : vector<4x16x8xf32> to vector<1x16x8xf32>
    %502 = vector.shape_cast %501 : vector<1x16x8xf32> to vector<16x8xf32>
    %503 = vector.extract_strided_slice %496 {offsets = [3, 0, 0], sizes = [1, 16, 8], strides = [1, 1, 1]} : vector<4x16x8xf32> to vector<1x16x8xf32>
    %504 = vector.shape_cast %503 : vector<1x16x8xf32> to vector<16x8xf32>
    %505 = tpu.concatenate %498, %500, %502, %504 in 1 : vector<16x8xf32>, vector<16x8xf32>, vector<16x8xf32>, vector<16x8xf32> -> vector<16x32xf32>
    %c0_126 = arith.constant 0 : index
    %c1536 = arith.constant 1536 : index
    %506 = vector.load %arg3[%c0_126, %c1536] : memref<32x2176xf32, #tpu.memory_space<vmem>>, vector<32x32xf32>
    %cst_127 = arith.constant dense<0.000000e+00> : vector<16x32xf32>
    %507 = tpu.matmul %505, %506, %cst_127 {dimension_numbers = #tpu.dot_dimension_numbers<[1], [0], [0], [1], [0, 0, 1, 1], [], []>} : vector<16x32xf32>, vector<32x32xf32>, vector<16x32xf32> -> vector<16x32xf32>
    %c30 = arith.constant 30 : index
    %c0_128 = arith.constant 0 : index
    %508 = vector.load %arg5[%c30, %c0_128] : memref<48x128xf32, #tpu.memory_space<vmem>>, vector<1x32xf32>
    %509 = vector.broadcast %508 : vector<1x32xf32> to vector<16x32xf32>
    %510 = arith.addf %507, %509 : vector<16x32xf32>
    %511 = arith.addf %450, %510 : vector<16x32xf32>
    %cst_129 = arith.constant dense<0.000000e+00> : vector<16xf32>
    %512 = vector.multi_reduction <add>, %511, %cst_129 [1] : vector<16x32xf32> to vector<16xf32>
    %513 = vector.shape_cast %512 : vector<16xf32> to vector<16x1xf32>
    %cst_130 = arith.constant 3.200000e+01 : f32
    %514 = vector.broadcast %cst_130 : f32 to vector<16x1xf32>
    %515 = arith.divf %513, %514 : vector<16x1xf32>
    %516 = vector.broadcast %515 : vector<16x1xf32> to vector<16x32xf32>
    %517 = arith.subf %511, %516 : vector<16x32xf32>
    %518 = arith.mulf %517, %517 : vector<16x32xf32>
    %cst_131 = arith.constant dense<0.000000e+00> : vector<16xf32>
    %519 = vector.multi_reduction <add>, %518, %cst_131 [1] : vector<16x32xf32> to vector<16xf32>
    %520 = vector.shape_cast %519 : vector<16xf32> to vector<16x1xf32>
    %cst_132 = arith.constant 3.200000e+01 : f32
    %521 = vector.broadcast %cst_132 : f32 to vector<16x1xf32>
    %522 = arith.divf %520, %521 : vector<16x1xf32>
    %cst_133 = arith.constant 9.99999974E-6 : f32
    %523 = vector.broadcast %cst_133 : f32 to vector<16x1xf32>
    %524 = arith.addf %522, %523 : vector<16x1xf32>
    %525 = math.rsqrt %524 : vector<16x1xf32>
    %526 = vector.broadcast %525 : vector<16x1xf32> to vector<16x32xf32>
    %527 = arith.mulf %517, %526 : vector<16x32xf32>
    %c31 = arith.constant 31 : index
    %c0_134 = arith.constant 0 : index
    %528 = vector.load %arg5[%c31, %c0_134] : memref<48x128xf32, #tpu.memory_space<vmem>>, vector<1x32xf32>
    %529 = vector.broadcast %528 : vector<1x32xf32> to vector<16x32xf32>
    %530 = arith.mulf %527, %529 : vector<16x32xf32>
    %c32 = arith.constant 32 : index
    %c0_135 = arith.constant 0 : index
    %531 = vector.load %arg5[%c32, %c0_135] : memref<48x128xf32, #tpu.memory_space<vmem>>, vector<1x32xf32>
    %532 = vector.broadcast %531 : vector<1x32xf32> to vector<16x32xf32>
    %533 = arith.addf %530, %532 : vector<16x32xf32>
    %c0_136 = arith.constant 0 : index
    %c1664 = arith.constant 1664 : index
    %534 = vector.load %arg3[%c0_136, %c1664] : memref<32x2176xf32, #tpu.memory_space<vmem>>, vector<32x96xf32>
    %c33 = arith.constant 33 : index
    %c0_137 = arith.constant 0 : index
    %535 = vector.load %arg5[%c33, %c0_137] : memref<48x128xf32, #tpu.memory_space<vmem>>, vector<1x96xf32>
    %536 = vector.extract_strided_slice %534 {offsets = [0, 0], sizes = [32, 32], strides = [1, 1]} : vector<32x96xf32> to vector<32x32xf32>
    %cst_138 = arith.constant dense<0.000000e+00> : vector<16x32xf32>
    %537 = tpu.matmul %533, %536, %cst_138 {dimension_numbers = #tpu.dot_dimension_numbers<[1], [0], [0], [1], [0, 0, 1, 1], [], []>} : vector<16x32xf32>, vector<32x32xf32>, vector<16x32xf32> -> vector<16x32xf32>
    %538 = vector.extract_strided_slice %535 {offsets = [0, 0], sizes = [1, 32], strides = [1, 1]} : vector<1x96xf32> to vector<1x32xf32>
    %539 = vector.broadcast %538 : vector<1x32xf32> to vector<16x32xf32>
    %540 = arith.addf %537, %539 : vector<16x32xf32>
    %541 = vector.extract_strided_slice %534 {offsets = [0, 32], sizes = [32, 64], strides = [1, 1]} : vector<32x96xf32> to vector<32x64xf32>
    %cst_139 = arith.constant dense<0.000000e+00> : vector<16x64xf32>
    %542 = tpu.matmul %243, %541, %cst_139 {dimension_numbers = #tpu.dot_dimension_numbers<[1], [0], [0], [1], [0, 0, 1, 1], [], []>} : vector<16x32xf32>, vector<32x64xf32>, vector<16x64xf32> -> vector<16x64xf32>
    %543 = vector.extract_strided_slice %535 {offsets = [0, 32], sizes = [1, 64], strides = [1, 1]} : vector<1x96xf32> to vector<1x64xf32>
    %544 = vector.broadcast %543 : vector<1x64xf32> to vector<16x64xf32>
    %545 = arith.addf %542, %544 : vector<16x64xf32>
    %546 = vector.extract_strided_slice %545 {offsets = [0, 0], sizes = [16, 32], strides = [1, 1]} : vector<16x64xf32> to vector<16x32xf32>
    %547 = vector.extract_strided_slice %545 {offsets = [0, 32], sizes = [16, 32], strides = [1, 1]} : vector<16x64xf32> to vector<16x32xf32>
    %548 = vector.extract_strided_slice %540 {offsets = [0, 0], sizes = [16, 8], strides = [1, 1]} : vector<16x32xf32> to vector<16x8xf32>
    %549 = vector.extract_strided_slice %540 {offsets = [0, 8], sizes = [16, 8], strides = [1, 1]} : vector<16x32xf32> to vector<16x8xf32>
    %550 = vector.extract_strided_slice %540 {offsets = [0, 16], sizes = [16, 8], strides = [1, 1]} : vector<16x32xf32> to vector<16x8xf32>
    %551 = vector.extract_strided_slice %540 {offsets = [0, 24], sizes = [16, 8], strides = [1, 1]} : vector<16x32xf32> to vector<16x8xf32>
    %552 = vector.shape_cast %548 : vector<16x8xf32> to vector<1x16x8xf32>
    %553 = vector.shape_cast %549 : vector<16x8xf32> to vector<1x16x8xf32>
    %554 = vector.shape_cast %550 : vector<16x8xf32> to vector<1x16x8xf32>
    %555 = vector.shape_cast %551 : vector<16x8xf32> to vector<1x16x8xf32>
    %556 = tpu.concatenate %552, %553, %554, %555 in 0 : vector<1x16x8xf32>, vector<1x16x8xf32>, vector<1x16x8xf32>, vector<1x16x8xf32> -> vector<4x16x8xf32>
    %557 = vector.extract_strided_slice %546 {offsets = [0, 0], sizes = [16, 8], strides = [1, 1]} : vector<16x32xf32> to vector<16x8xf32>
    %558 = vector.extract_strided_slice %546 {offsets = [0, 8], sizes = [16, 8], strides = [1, 1]} : vector<16x32xf32> to vector<16x8xf32>
    %559 = vector.extract_strided_slice %546 {offsets = [0, 16], sizes = [16, 8], strides = [1, 1]} : vector<16x32xf32> to vector<16x8xf32>
    %560 = vector.extract_strided_slice %546 {offsets = [0, 24], sizes = [16, 8], strides = [1, 1]} : vector<16x32xf32> to vector<16x8xf32>
    %561 = vector.shape_cast %557 : vector<16x8xf32> to vector<1x16x8xf32>
    %562 = vector.shape_cast %558 : vector<16x8xf32> to vector<1x16x8xf32>
    %563 = vector.shape_cast %559 : vector<16x8xf32> to vector<1x16x8xf32>
    %564 = vector.shape_cast %560 : vector<16x8xf32> to vector<1x16x8xf32>
    %565 = tpu.concatenate %561, %562, %563, %564 in 0 : vector<1x16x8xf32>, vector<1x16x8xf32>, vector<1x16x8xf32>, vector<1x16x8xf32> -> vector<4x16x8xf32>
    %566 = vector.extract_strided_slice %547 {offsets = [0, 0], sizes = [16, 8], strides = [1, 1]} : vector<16x32xf32> to vector<16x8xf32>
    %567 = vector.extract_strided_slice %547 {offsets = [0, 8], sizes = [16, 8], strides = [1, 1]} : vector<16x32xf32> to vector<16x8xf32>
    %568 = vector.extract_strided_slice %547 {offsets = [0, 16], sizes = [16, 8], strides = [1, 1]} : vector<16x32xf32> to vector<16x8xf32>
    %569 = vector.extract_strided_slice %547 {offsets = [0, 24], sizes = [16, 8], strides = [1, 1]} : vector<16x32xf32> to vector<16x8xf32>
    %570 = vector.shape_cast %566 : vector<16x8xf32> to vector<1x16x8xf32>
    %571 = vector.shape_cast %567 : vector<16x8xf32> to vector<1x16x8xf32>
    %572 = vector.shape_cast %568 : vector<16x8xf32> to vector<1x16x8xf32>
    %573 = vector.shape_cast %569 : vector<16x8xf32> to vector<1x16x8xf32>
    %574 = tpu.concatenate %570, %571, %572, %573 in 0 : vector<1x16x8xf32>, vector<1x16x8xf32>, vector<1x16x8xf32>, vector<1x16x8xf32> -> vector<4x16x8xf32>
    "tpu.trace_start"() <{level = 10 : i32, message = "hqd,hkd->hqk"}> : () -> ()
    %cst_140 = arith.constant dense<0.000000e+00> : vector<4x16x16xf32>
    %575 = tpu.matmul %556, %565, %cst_140 {dimension_numbers = #tpu.dot_dimension_numbers<[2], [2], [1], [1], [0, 0, 0, 1, 1, 1], [0], [0]>} : vector<4x16x8xf32>, vector<4x16x8xf32>, vector<4x16x16xf32> -> vector<4x16x16xf32>
    "tpu.trace_stop"() : () -> ()
    %cst_141 = arith.constant dense<0xFF800000> : vector<4x16xf32>
    %576 = vector.multi_reduction <maximumf>, %575, %cst_141 [2] : vector<4x16x16xf32> to vector<4x16xf32>
    %577 = vector.shape_cast %576 : vector<4x16xf32> to vector<4x16x1xf32>
    %578 = vector.broadcast %577 : vector<4x16x1xf32> to vector<4x16x16xf32>
    %579 = arith.subf %575, %578 : vector<4x16x16xf32>
    %580 = math.exp %579 : vector<4x16x16xf32>
    %cst_142 = arith.constant dense<0.000000e+00> : vector<4x16xf32>
    %581 = vector.multi_reduction <add>, %580, %cst_142 [2] : vector<4x16x16xf32> to vector<4x16xf32>
    %582 = vector.shape_cast %581 : vector<4x16xf32> to vector<4x16x1xf32>
    %583 = vector.broadcast %582 : vector<4x16x1xf32> to vector<4x16x16xf32>
    %584 = arith.divf %580, %583 : vector<4x16x16xf32>
    "tpu.trace_start"() <{level = 10 : i32, message = "hqk,hkd->hqd"}> : () -> ()
    %cst_143 = arith.constant dense<0.000000e+00> : vector<4x16x8xf32>
    %585 = tpu.matmul %584, %574, %cst_143 {dimension_numbers = #tpu.dot_dimension_numbers<[2], [1], [1], [2], [0, 0, 0, 1, 1, 2], [0], [0]>} : vector<4x16x16xf32>, vector<4x16x8xf32>, vector<4x16x8xf32> -> vector<4x16x8xf32>
    "tpu.trace_stop"() : () -> ()
    %586 = vector.extract_strided_slice %585 {offsets = [0, 0, 0], sizes = [1, 16, 8], strides = [1, 1, 1]} : vector<4x16x8xf32> to vector<1x16x8xf32>
    %587 = vector.shape_cast %586 : vector<1x16x8xf32> to vector<16x8xf32>
    %588 = vector.extract_strided_slice %585 {offsets = [1, 0, 0], sizes = [1, 16, 8], strides = [1, 1, 1]} : vector<4x16x8xf32> to vector<1x16x8xf32>
    %589 = vector.shape_cast %588 : vector<1x16x8xf32> to vector<16x8xf32>
    %590 = vector.extract_strided_slice %585 {offsets = [2, 0, 0], sizes = [1, 16, 8], strides = [1, 1, 1]} : vector<4x16x8xf32> to vector<1x16x8xf32>
    %591 = vector.shape_cast %590 : vector<1x16x8xf32> to vector<16x8xf32>
    %592 = vector.extract_strided_slice %585 {offsets = [3, 0, 0], sizes = [1, 16, 8], strides = [1, 1, 1]} : vector<4x16x8xf32> to vector<1x16x8xf32>
    %593 = vector.shape_cast %592 : vector<1x16x8xf32> to vector<16x8xf32>
    %594 = tpu.concatenate %587, %589, %591, %593 in 1 : vector<16x8xf32>, vector<16x8xf32>, vector<16x8xf32>, vector<16x8xf32> -> vector<16x32xf32>
    %c0_144 = arith.constant 0 : index
    %c1792 = arith.constant 1792 : index
    %595 = vector.load %arg3[%c0_144, %c1792] : memref<32x2176xf32, #tpu.memory_space<vmem>>, vector<32x32xf32>
    %cst_145 = arith.constant dense<0.000000e+00> : vector<16x32xf32>
    %596 = tpu.matmul %594, %595, %cst_145 {dimension_numbers = #tpu.dot_dimension_numbers<[1], [0], [0], [1], [0, 0, 1, 1], [], []>} : vector<16x32xf32>, vector<32x32xf32>, vector<16x32xf32> -> vector<16x32xf32>
    %c34 = arith.constant 34 : index
    %c0_146 = arith.constant 0 : index
    %597 = vector.load %arg5[%c34, %c0_146] : memref<48x128xf32, #tpu.memory_space<vmem>>, vector<1x32xf32>
    %598 = vector.broadcast %597 : vector<1x32xf32> to vector<16x32xf32>
    %599 = arith.addf %596, %598 : vector<16x32xf32>
    %600 = arith.addf %533, %599 : vector<16x32xf32>
    %cst_147 = arith.constant dense<0.000000e+00> : vector<16xf32>
    %601 = vector.multi_reduction <add>, %600, %cst_147 [1] : vector<16x32xf32> to vector<16xf32>
    %602 = vector.shape_cast %601 : vector<16xf32> to vector<16x1xf32>
    %cst_148 = arith.constant 3.200000e+01 : f32
    %603 = vector.broadcast %cst_148 : f32 to vector<16x1xf32>
    %604 = arith.divf %602, %603 : vector<16x1xf32>
    %605 = vector.broadcast %604 : vector<16x1xf32> to vector<16x32xf32>
    %606 = arith.subf %600, %605 : vector<16x32xf32>
    %607 = arith.mulf %606, %606 : vector<16x32xf32>
    %cst_149 = arith.constant dense<0.000000e+00> : vector<16xf32>
    %608 = vector.multi_reduction <add>, %607, %cst_149 [1] : vector<16x32xf32> to vector<16xf32>
    %609 = vector.shape_cast %608 : vector<16xf32> to vector<16x1xf32>
    %cst_150 = arith.constant 3.200000e+01 : f32
    %610 = vector.broadcast %cst_150 : f32 to vector<16x1xf32>
    %611 = arith.divf %609, %610 : vector<16x1xf32>
    %cst_151 = arith.constant 9.99999974E-6 : f32
    %612 = vector.broadcast %cst_151 : f32 to vector<16x1xf32>
    %613 = arith.addf %611, %612 : vector<16x1xf32>
    %614 = math.rsqrt %613 : vector<16x1xf32>
    %615 = vector.broadcast %614 : vector<16x1xf32> to vector<16x32xf32>
    %616 = arith.mulf %606, %615 : vector<16x32xf32>
    %c35 = arith.constant 35 : index
    %c0_152 = arith.constant 0 : index
    %617 = vector.load %arg5[%c35, %c0_152] : memref<48x128xf32, #tpu.memory_space<vmem>>, vector<1x32xf32>
    %618 = vector.broadcast %617 : vector<1x32xf32> to vector<16x32xf32>
    %619 = arith.mulf %616, %618 : vector<16x32xf32>
    %c36 = arith.constant 36 : index
    %c0_153 = arith.constant 0 : index
    %620 = vector.load %arg5[%c36, %c0_153] : memref<48x128xf32, #tpu.memory_space<vmem>>, vector<1x32xf32>
    %621 = vector.broadcast %620 : vector<1x32xf32> to vector<16x32xf32>
    %622 = arith.addf %619, %621 : vector<16x32xf32>
    %c0_154 = arith.constant 0 : index
    %c1920 = arith.constant 1920 : index
    %623 = vector.load %arg3[%c0_154, %c1920] : memref<32x2176xf32, #tpu.memory_space<vmem>>, vector<32x128xf32>
    %cst_155 = arith.constant dense<0.000000e+00> : vector<16x128xf32>
    %624 = tpu.matmul %622, %623, %cst_155 {dimension_numbers = #tpu.dot_dimension_numbers<[1], [0], [0], [1], [0, 0, 1, 1], [], []>} : vector<16x32xf32>, vector<32x128xf32>, vector<16x128xf32> -> vector<16x128xf32>
    %c37 = arith.constant 37 : index
    %c0_156 = arith.constant 0 : index
    %625 = vector.load %arg5[%c37, %c0_156] : memref<48x128xf32, #tpu.memory_space<vmem>>, vector<1x128xf32>
    %626 = vector.broadcast %625 : vector<1x128xf32> to vector<16x128xf32>
    %627 = arith.addf %624, %626 : vector<16x128xf32>
    %cst_157 = arith.constant 0.000000e+00 : f32
    %628 = vector.broadcast %cst_157 : f32 to vector<16x128xf32>
    %629 = arith.maximumf %627, %628 : vector<16x128xf32>
    %c448 = arith.constant 448 : index
    %c0_158 = arith.constant 0 : index
    %630 = vector.load %arg4[%c448, %c0_158] : memref<576x32xf32, #tpu.memory_space<vmem>>, vector<128x32xf32>
    %cst_159 = arith.constant dense<0.000000e+00> : vector<16x32xf32>
    %631 = tpu.matmul %629, %630, %cst_159 {dimension_numbers = #tpu.dot_dimension_numbers<[1], [0], [0], [1], [0, 0, 1, 1], [], []>} : vector<16x128xf32>, vector<128x32xf32>, vector<16x32xf32> -> vector<16x32xf32>
    %c38 = arith.constant 38 : index
    %c0_160 = arith.constant 0 : index
    %632 = vector.load %arg5[%c38, %c0_160] : memref<48x128xf32, #tpu.memory_space<vmem>>, vector<1x32xf32>
    %633 = vector.broadcast %632 : vector<1x32xf32> to vector<16x32xf32>
    %634 = arith.addf %631, %633 : vector<16x32xf32>
    %635 = arith.addf %622, %634 : vector<16x32xf32>
    %cst_161 = arith.constant dense<0.000000e+00> : vector<16xf32>
    %636 = vector.multi_reduction <add>, %635, %cst_161 [1] : vector<16x32xf32> to vector<16xf32>
    %637 = vector.shape_cast %636 : vector<16xf32> to vector<16x1xf32>
    %cst_162 = arith.constant 3.200000e+01 : f32
    %638 = vector.broadcast %cst_162 : f32 to vector<16x1xf32>
    %639 = arith.divf %637, %638 : vector<16x1xf32>
    %640 = vector.broadcast %639 : vector<16x1xf32> to vector<16x32xf32>
    %641 = arith.subf %635, %640 : vector<16x32xf32>
    %642 = arith.mulf %641, %641 : vector<16x32xf32>
    %cst_163 = arith.constant dense<0.000000e+00> : vector<16xf32>
    %643 = vector.multi_reduction <add>, %642, %cst_163 [1] : vector<16x32xf32> to vector<16xf32>
    %644 = vector.shape_cast %643 : vector<16xf32> to vector<16x1xf32>
    %cst_164 = arith.constant 3.200000e+01 : f32
    %645 = vector.broadcast %cst_164 : f32 to vector<16x1xf32>
    %646 = arith.divf %644, %645 : vector<16x1xf32>
    %cst_165 = arith.constant 9.99999974E-6 : f32
    %647 = vector.broadcast %cst_165 : f32 to vector<16x1xf32>
    %648 = arith.addf %646, %647 : vector<16x1xf32>
    %649 = math.rsqrt %648 : vector<16x1xf32>
    %650 = vector.broadcast %649 : vector<16x1xf32> to vector<16x32xf32>
    %651 = arith.mulf %641, %650 : vector<16x32xf32>
    %c39 = arith.constant 39 : index
    %c0_166 = arith.constant 0 : index
    %652 = vector.load %arg5[%c39, %c0_166] : memref<48x128xf32, #tpu.memory_space<vmem>>, vector<1x32xf32>
    %653 = vector.broadcast %652 : vector<1x32xf32> to vector<16x32xf32>
    %654 = arith.mulf %651, %653 : vector<16x32xf32>
    %c40 = arith.constant 40 : index
    %c0_167 = arith.constant 0 : index
    %655 = vector.load %arg5[%c40, %c0_167] : memref<48x128xf32, #tpu.memory_space<vmem>>, vector<1x32xf32>
    %656 = vector.broadcast %655 : vector<1x32xf32> to vector<16x32xf32>
    %657 = arith.addf %654, %656 : vector<16x32xf32>
    %c0_168 = arith.constant 0 : index
    %c2048 = arith.constant 2048 : index
    %658 = vector.load %arg3[%c0_168, %c2048] : memref<32x2176xf32, #tpu.memory_space<vmem>>, vector<32x64xf32>
    %cst_169 = arith.constant dense<0.000000e+00> : vector<16x64xf32>
    %659 = tpu.matmul %657, %658, %cst_169 {dimension_numbers = #tpu.dot_dimension_numbers<[1], [0], [0], [1], [0, 0, 1, 1], [], []>} : vector<16x32xf32>, vector<32x64xf32>, vector<16x64xf32> -> vector<16x64xf32>
    %c41 = arith.constant 41 : index
    %c0_170 = arith.constant 0 : index
    %660 = vector.load %arg5[%c41, %c0_170] : memref<48x128xf32, #tpu.memory_space<vmem>>, vector<1x64xf32>
    %661 = vector.broadcast %660 : vector<1x64xf32> to vector<16x64xf32>
    %662 = arith.addf %659, %661 : vector<16x64xf32>
    %cst_171 = arith.constant 5.000000e-01 : f32
    %663 = vector.broadcast %cst_171 : f32 to vector<16x64xf32>
    %664 = arith.mulf %663, %662 : vector<16x64xf32>
    %cst_172 = arith.constant 0.707106769 : f32
    %665 = vector.broadcast %cst_172 : f32 to vector<16x64xf32>
    %666 = arith.mulf %662, %665 : vector<16x64xf32>
    %667 = math.erf %666 : vector<16x64xf32>
    %cst_173 = arith.constant 1.000000e+00 : f32
    %668 = vector.broadcast %cst_173 : f32 to vector<16x64xf32>
    %669 = arith.addf %668, %667 : vector<16x64xf32>
    %670 = arith.mulf %664, %669 : vector<16x64xf32>
    %c0_174 = arith.constant 0 : index
    %c0_175 = arith.constant 0 : index
    %671 = vector.load %arg6[%c0_174, %c0_175] : memref<16x64xf32, #tpu.memory_space<vmem>>, vector<16x64xf32>
    tpu.vector_store %arg6[%c0_174, %c0_175], %670 {strides = array<i32>} : memref<16x64xf32, #tpu.memory_space<vmem>>, vector<16x64xf32>,
    return
  }
  func.func @transform_0(%arg0: i32) -> (i32, i32) {
    %c0_i32 = arith.constant 0 : i32
    %c0_i32_0 = arith.constant 0 : i32
    return %arg0, %c0_i32 : i32, i32
  }
  func.func @transform_1(%arg0: i32) -> (i32, i32) {
    %c0_i32 = arith.constant 0 : i32
    %c0_i32_0 = arith.constant 0 : i32
    %c0_i32_1 = arith.constant 0 : i32
    return %c0_i32, %c0_i32_0 : i32, i32
  }
  func.func @transform_2(%arg0: i32) -> (i32, i32) {
    %c0_i32 = arith.constant 0 : i32
    %c0_i32_0 = arith.constant 0 : i32
    %c0_i32_1 = arith.constant 0 : i32
    return %c0_i32, %c0_i32_0 : i32, i32
  }
  func.func @transform_3(%arg0: i32) -> (i32, i32) {
    %c0_i32 = arith.constant 0 : i32
    %c0_i32_0 = arith.constant 0 : i32
    %c0_i32_1 = arith.constant 0 : i32
    return %c0_i32, %c0_i32_0 : i32, i32
  }
  func.func @transform_4(%arg0: i32) -> (i32, i32) {
    %c0_i32 = arith.constant 0 : i32
    %c0_i32_0 = arith.constant 0 : i32
    %c0_i32_1 = arith.constant 0 : i32
    return %c0_i32, %c0_i32_0 : i32, i32
  }
  func.func @transform_5(%arg0: i32) -> (i32, i32) {
    %c0_i32 = arith.constant 0 : i32
    %c0_i32_0 = arith.constant 0 : i32
    return %arg0, %c0_i32 : i32, i32
  }
}

</mosaic_0001>

<bundles_post_ra>
// kernel: vit_autoencoder_forward.1
= control target key start
LH: loop header
LB: loop body
LE: loop exit
PB: predicated region body
PF: predicated region fallthrough
CT: control target
= control target key end

     0   :  { %s10319_s18 = smov 0   ;;  %s11750_s0 = inlined_call_operand.vmem [shape: f32[32,64], index: 0, kind: input, shape index: {}]   ;;  %s11751_s1 = inlined_call_operand.vmem [shape: f32[16,32], index: 1, kind: input, shape index: {}]   ;;  %s11752_s2 = inlined_call_operand.vmem [shape: f32[32,2176], index: 2, kind: input, shape index: {}]   ;;  %s11753_s3 = inlined_call_operand.vmem [shape: f32[576,32], index: 3, kind: input, shape index: {}]   ;;  %s11754_s4 = inlined_call_operand.vmem [shape: f32[48,128], index: 4, kind: input, shape index: {}]   ;;  %s11755_s5 = inlined_call_operand.vmem [shape: f32[32,64], index: 5, kind: output, shape index: {}]  }
   0x1 LB: > { %s7904_s19 = sadd.s32 4294967295, %s10279_s18   ;;  %p7908_p0 = scmp.ge.s32.totalorder %s10279_s18, 1  ;;  %s10279_s18 = sphi %s10319_s18, %s15_s18  }
   0x2   : > { %p188_p1 = scmp.lt.s32.totalorder %s10279_s18, 3 }
   0x4   : > { %p189_p2 = pnand %p7908_p0, %p188_p1 }
   0x5   : > { %v232_v0 = vld [vmem:[%s11753_s3] sm:$0xff] (!%p189_p2)  ;;  %v233_v1 = vld [vmem:[%s11753_s3 + $0x8] sm:$0xff] (!%p189_p2)  ;;  %v234_v2 = vld [vmem:[%s11753_s3 + $0x10] sm:$0xff] (!%p189_p2)  ;;  %s7909_s26 = sshll.u32 (!%p189_p2), %s7904_s19, 1  ;;  %vm245_vm0 = vcmask (!%p189_p2), 523264   ;;  %vm338_vm1 = vcmask (!%p189_p2), 261120  }
   0x6   : > { %192 = sbr.rel (%p189_p2) target bundleno = 13978 (0x369a), region = 40  ;;  %v9233_v3 = vpack.c.bf16 (!%p189_p2), %v233_v1, %v232_v0  ;;  %v235_v4 = vld [vmem:[%s11753_s3 + $0x18] sm:$0xff] (!%p189_p2)  ;;  %p217_p3 = scmp.lt.s32.totalorder (!%p189_p2), %s7909_s26, 3  ;;  %v236_v6 = vld [vmem:[%s11753_s3 + $0x20] sm:$0xff] (!%p189_p2)  ;;  %v237_v7 = vld [vmem:[%s11753_s3 + $0x28] sm:$0xff] (!%p189_p2)  ;;  %vm438_vm2 = vcmask (!%p189_p2), 64512  }
   0x7   : > { %v9237_v5 = vpack.c.bf16 (!%p189_p2), %v235_v4, %v234_v2  ;;  %v9241_v8 = vpack.c.bf16 (!%p189_p2), %v237_v7, %v236_v6  ;;  %v238_v9 = vld [vmem:[%s11753_s3 + $0x30] sm:$0xff] (!%p189_p2)  ;;  %v239_v10 = vld [vmem:[%s11753_s3 + $0x38] sm:$0xff] (!%p189_p2)  ;;  %v329_v13 = vld [vmem:[%s11752_s2] sm:$0xff] (!%p189_p2)  ;;  %s10281_s10 = smov (!%p189_p2), 112   ;;  %s10282_s11 = smov (!%p189_p2), 120   ;;  %vm783_vm4 = vcmask (!%p189_p2), 130048  }
   0x8   : > { %9234 = vmatprep.subr.bf16.mxu1 (!%p189_p2), %v9233_v3  ;;  %v9245_v12 = vpack.c.bf16 (!%p189_p2), %v239_v10, %v238_v9  ;;  %v330_v14 = vld [vmem:[%s11752_s2 + $0x88] sm:$0xff] (!%p189_p2)  ;;  %v331_v17 = vld [vmem:[%s11752_s2 + $0x110] sm:$0xff] (!%p189_p2)  ;;  %v332_v18 = vld [vmem:[%s11752_s2 + $0x198] sm:$0xff] (!%p189_p2)  ;;  %s10283_s12 = smov (!%p189_p2), 104   ;;  %s10284_s13 = smov (!%p189_p2), 96   ;;  %vm1248_vm5 = vcmask (!%p189_p2), 195584  }
   0x9   : > { %9236 = vmatpush3.bf16.msra.mxu1 (!%p189_p2), %v9233_v3  ;;  %v9249_v15 = vpack.c.bf16 (!%p189_p2), %v330_v14, %v329_v13  ;;  %v9253_v19 = vpack.c.bf16 (!%p189_p2), %v332_v18, %v331_v17  ;;  %v7913_v20 = vld [vmem:[%s11754_s4] ss:$0 sm:$0xff] (!%p189_p2)  ;;  %v229_v25 = vld [vmem:[%s11751_s1 + $0x8] sm:$0xff] (!%p189_p2)  ;;  %v7916_v29 = vld [vmem:[%s11754_s4 + $0x1] ss:$0 sm:$0xff] (!%p189_p2)  ;;  %s10285_s14 = smov (!%p189_p2), 64  }
   0xa   : > { %9238 = vmatprep.subr.bf16.mxu1 (!%p189_p2), %v9237_v5  ;;  %v228_v23 = vld [vmem:[%s11751_s1] sm:$0xff] (!%p189_p2)  ;;  %vm10419_vm3 = vmpackc.low (!%p189_p2), %vm438_vm2, %vm438_vm2  ;;  %s10286_s24 = smov (!%p189_p2), 8   ;;  %s10287_s25 = smov (!%p189_p2), 16  }
   0xb   : > { %s10288_s27 = smov (!%p189_p2), 24  }
   0xd   : > { %s11759_s26 = smov (!%p217_p3, %s7909_s26), 3  ;;  %9240 = vmatpush3.bf16.msra.mxu1 %v9237_v5 }
   0xe   : > { %s7910_s8 = sshll.u32 %s11759_s26, 3  ;;  %9242 = vmatprep.subr.bf16.mxu1 %v9241_v8 }
   0xf   : > { %s220_s15 = scalar_lea.vmem %s11750_s0, %s7910_s8 }
  0x10   : > { %v230_v11 = vld [vmem:[%s220_s15] sm:$0xff]  ;;  %v231_v16 = vld [vmem:[%s220_s15 + $0x8] sm:$0xff] }
  0x11   : > { %8545 = vmatprep.mubr.msk.f32.mxu1 %vm245_vm0, %v230_v11  ;;  %9244 = vmatpush3.bf16.msra.mxu1 %v9241_v8 }
  0x12   : > { %9246 = vmatprep.subr.bf16.mxu1 %v9245_v12 }
  0x15   : > { %9248 = vmatpush3.bf16.msra.mxu1 %v9245_v12 }
  0x16   : > { %9250 = vmatprep.subr.bf16.mxu1 %v9249_v15 }
  0x18   : > { %8546 = vmatmul.mubr.msk.f32.vlgmr.msra.gmra.mrb[0].mxu1 %vm245_vm0, %v231_v16 }
  0x19   : > { %9252 = vmatpush3.bf16.msra.mxu1 %v9249_v15 }
  0x1a   : > { %9254 = vmatprep.subr.bf16.mxu1 %v9253_v19 }
  0x1d   : > { %9256 = vmatpush3.bf16.msra.mxu1 %v9253_v19 }
  0xeb   : > { %v8547_v21 = vpop.f32.mrb[0].mxu1 }
  0xec   : > { %v324_v22 = vadd.f32 %v8547_v21, %v7913_v20  ;;  %v318_v24 = vpop.f32.mrb[1].mxu1 }
  0xed   : > { %v319_v26 = vadd.f32 %v7913_v20, %v318_v24 }
  0xee   : > { %v10384_v28 = vadd.f32 %v324_v22, %v229_v25 }
  0xef   : > { %v10382_v27 = vadd.f32 %v319_v26, %v228_v23 }
  0xf1   : > { %8556 = vmatprep.mubr.msk.f32.mxu1 %vm338_vm1, %v10382_v27 }
  0xf2   : > { %8557 = vmatmul.mubr.msk.f32.vlgmr.msra.gmra.mrb[2].mxu1 %vm338_vm1, %v10384_v28 }
 0x1c5   : > { %v8558_v30 = vpop.f32.mrb[2].mxu1 }
 0x1c6   : > { %v417_v31 = vadd.f32 %v8558_v30, %v7916_v29  ;;  %v411_v32 = vpop.f32.mrb[3].mxu1 }
 0x1c7   : > { %v412_v33 = vadd.f32 %v7916_v29, %v411_v32 }
 0x1c8   : > { %428 = vrot.lane.b32.xlu1 %v417_v31, %s10281_s10 }
 0x1c9   : > { %422 = vrot.lane.b32.xlu0 %v412_v33, %s10282_s11  ;;  %8563 = vmatprep.mubr.msk.f32.mxu1 %vm438_vm2, %v412_v33  ;;  %v10400_v34 = vpack.i.bf16 %v417_v31, %v412_v33 }
 0x1cc   : > { %426 = vrot.lane.b32.xlu1 %v412_v33, %s10281_s10 }
 0x1cd   : > { %424 = vrot.lane.b32.xlu0 %v417_v31, %s10282_s11 }
 0x1d0   : > { %432 = vrot.lane.b32.xlu1 %v417_v31, %s10283_s12 }
 0x1d1   : > { %430 = vrot.lane.b32.xlu0 %v412_v33, %s10283_s12 }
 0x1d5   : > { %9786 = vrot.lane.b32.xlu0 %v10400_v34, %s10284_s13 }
 0x23a   : > { %v429_v35 = vpop.permute.xlu1 %428 }
 0x23b   : > { %v423_v36 = vpop.permute.xlu0 %422 }
 0x23c   : > { %8570 = vmatprep.mubr.msk.f32.mxu0 %vm438_vm2, %v423_v36 }
 0x23e   : > { %v427_v37 = vpop.permute.xlu1 %426 }
 0x23f   : > { %v425_v38 = vpop.permute.xlu0 %424  ;;  %v10405_v39 = vpack.i.bf16 %v429_v35, %v427_v37 }
 0x240   : > { %v10407_v40 = vpack.i.bf16 %v425_v38, %v423_v36 }
 0x241   : > { %9796 = vrot.lane.b32.xlu0 %v10405_v39, %s10284_s13 }
 0x242   : > { %v433_v41 = vpop.permute.xlu1 %432  ;;  %9791 = vrot.lane.b32.xlu1 %v10407_v40, %s10284_s13 }
 0x243   : > { %v431_v42 = vpop.permute.xlu0 %430 }
 0x244   : > { %v10413_v43 = vpack.i.bf16 %v433_v41, %v431_v42 }
 0x246   : > { %9801 = vrot.lane.b32.xlu1 %v10413_v43, %s10284_s13 }
 0x247   : > { %v9787_v44 = vpop.permute.xlu0 %9786 }
 0x248   : > { %v9789_v45 = vunpack.i.h.bf16 %v9787_v44  ;;  %v9788_v46 = vunpack.i.l.bf16 %v9787_v44 }
 0x24a   : > { %v9257_v48 = vpack.c.bf16 %v9789_v45, %v9788_v46 }
 0x24c   : > { %9259 = vmatprep.subr.msk.bf16.mxu1 %vm10419_vm3, %v9257_v48 }
 0x24d   : > { %9262 = vmatpush3.bf16.xpose.msk.msra.mxu1 %vm10419_vm3, %v9257_v48 }
 0x254   : > { %8564 = vmatmul.mubr.msk.f32.vlgmr.msra.gmra.mrb[4].mxu1 %vm438_vm2, %v417_v31 }
 0x255   : > { %8577 = vmatprep.mubr.msk.f32.mxu1 %vm438_vm2, %v427_v37 }
 0x2b3   : > { %v9797_v49 = vpop.permute.xlu0 %9796 }
 0x2b4   : > { %v9799_v50 = vunpack.i.h.bf16 %v9797_v49  ;;  %v9798_v51 = vunpack.i.l.bf16 %v9797_v49  ;;  %v9792_v52 = vpop.permute.xlu1 %9791 }
 0x2b5   : > { %v9794_v53 = vunpack.i.h.bf16 %v9792_v52  ;;  %v9793_v54 = vunpack.i.l.bf16 %v9792_v52 }
 0x2b6   : > { %v9269_v55 = vpack.c.bf16 %v9799_v50, %v9798_v51 }
 0x2b7   : > { %v9263_v56 = vpack.c.bf16 %v9794_v53, %v9793_v54 }
 0x2b8   : > { %v9802_v57 = vpop.permute.xlu1 %9801  ;;  %9271 = vmatprep.subr.msk.bf16.mxu1 %vm10419_vm3, %v9269_v55 }
 0x2b9   : > { %v9804_v58 = vunpack.i.h.bf16 %v9802_v57  ;;  %v9803_v59 = vunpack.i.l.bf16 %v9802_v57  ;;  %9265 = vmatprep.subr.msk.bf16.mxu0 %vm10419_vm3, %v9263_v56  ;;  %9274 = vmatpush3.bf16.xpose.msk.msra.mxu1 %vm10419_vm3, %v9269_v55 }
 0x2ba   : > { %9268 = vmatpush3.bf16.xpose.msk.msra.mxu0 %vm10419_vm3, %v9263_v56 }
 0x2bb   : > { %v9275_v60 = vpack.c.bf16 %v9804_v58, %v9803_v59 }
 0x2bd   : > { %9277 = vmatprep.subr.msk.bf16.mxu0 %vm10419_vm3, %v9275_v60 }
 0x2c0   : > { %8578 = vmatmul.mubr.msk.f32.vlgmr.msra.gmra.mrb[6].mxu1 %vm438_vm2, %v429_v35 }
 0x2c1   : > { %8571 = vmatmul.mubr.msk.f32.vlgmr.msra.gmra.mrb[0].mxu0 %vm438_vm2, %v425_v38 }
 0x2c2   : > { %9280 = vmatpush3.bf16.xpose.msk.msra.mxu0 %vm10419_vm3, %v9275_v60  ;;  %8584 = vmatprep.mubr.msk.f32.mxu0 %vm438_vm2, %v431_v42 }
 0x2c9   : > { %8585 = vmatmul.mubr.msk.f32.vlgmr.msra.gmra.mrb[2].mxu0 %vm438_vm2, %v433_v41 }
 0x327   : > { %v8565_v61 = vpop.f32.mrb[4].mxu1 }
 0x328   : > { %v513_v62 = vpop.f32.mrb[5].mxu1  ;;  %v787_v63 = vsel %vm783_vm4, %v8565_v61, -inf }
 0x329   : > { %788 = vmax.xlane.f32.xlu1 %v787_v63  ;;  %v784_v0 = vsel %vm783_vm4, %v513_v62, -inf }
 0x32a   : > { %785 = vmax.xlane.f32.xlu0 %v784_v0 }
 0x393   : > { %v8579_v1 = vpop.f32.mrb[6].mxu1 }
 0x394   : > { %v8572_v2 = vpop.f32.mrb[0].mxu0  ;;  %v687_v3 = vpop.f32.mrb[7].mxu1  ;;  %v799_v10 = vsel %vm783_vm4, %v8579_v1, -inf }
 0x395   : > { %v600_v4 = vpop.f32.mrb[1].mxu0  ;;  %v793_v5 = vsel %vm783_vm4, %v8572_v2, -inf  ;;  %v796_v6 = vsel %vm783_vm4, %v687_v3, -inf }
 0x396   : > { %794 = vmax.xlane.f32.xlu0 %v793_v5  ;;  %797 = vmax.xlane.f32.xlu1 %v796_v6  ;;  %v790_v7 = vsel %vm783_vm4, %v600_v4, -inf }
 0x39a   : > { %791 = vmax.xlane.f32.xlu0 %v790_v7 }
 0x39c   : > { %v8586_v8 = vpop.f32.mrb[2].mxu0 }
 0x39d   : > { %v10450_v9 = vpop.f32.mrb[3].mxu0  ;;  %v805_v12 = vsel %vm783_vm4, %v8586_v8, -inf }
 0x39e   : > { %800 = vmax.xlane.f32.xlu0 %v799_v10  ;;  %v802_v11 = vsel %vm783_vm4, %v10450_v9, -inf }
 0x39f   : > { %803 = vmax.xlane.f32.xlu1 %v802_v11 }
 0x3a2   : > { %806 = vmax.xlane.f32.xlu0 %v805_v12 }
 0x3b0   : > { %9806 = vrot.lane.b32.xlu1 %v10400_v34, %s10285_s14 }
 0x3b6   : > { %v789_v13 = vpop.xlane.xlu1 %788 }
 0x3b7   : > { %v809_v14 = vsub.f32 %v8565_v61, %v789_v13  ;;  %v786_v16 = vpop.xlane.xlu0 %785 }
 0x3b8   : > { %v808_v17 = vsub.f32 %v513_v62, %v786_v16 }
 0x3b9   : > { %v818_v15 = vmul.f32 1.442695, %v809_v14 }
 0x3ba   : > { %v816_v18 = vmul.f32 1.442695, %v808_v17 }
 0x3bb   : > { %10035 = vpow2.f32 %v818_v15 }
 0x3bc   : > { %10037 = vpow2.f32 %v816_v18 }
 0x3c5   : > { %v10036_v19 = vpop.eup %10035 }
 0x3c6   : > { %v835_v20 = vsel %vm783_vm4, %v10036_v19, 0.0  ;;  %v10038_v21 = vpop.eup %10037 }
 0x3c7   : > { %836 = vadd.xlane.f32.xlu0 %v835_v20  ;;  %v832_v22 = vsel %vm783_vm4, %v10038_v21, 0.0 }
 0x3d4   : > { %833 = vadd.xlane.f32.xlu1 %v832_v22 }
 0x423   : > { %v795_v23 = vpop.xlane.xlu0 %794  ;;  %v798_v24 = vpop.xlane.xlu1 %797 }
 0x424   : > { %v811_v25 = vsub.f32 %v8572_v2, %v795_v23  ;;  %v812_v29 = vsub.f32 %v687_v3, %v798_v24 }
 0x426   : > { %v822_v26 = vmul.f32 1.442695, %v811_v25  ;;  %v824_v32 = vmul.f32 1.442695, %v812_v29 }
 0x427   : > { %v792_v30 = vpop.xlane.xlu0 %791 }
 0x428   : > { %10039 = vpow2.f32 %v822_v26  ;;  %v810_v31 = vsub.f32 %v600_v4, %v792_v30 }
 0x42a   : > { %v820_v33 = vmul.f32 1.442695, %v810_v31 }
 0x42b   : > { %v801_v34 = vpop.xlane.xlu0 %800 }
 0x42c   : > { %10041 = vpow2.f32 %v820_v33  ;;  %v813_v35 = vsub.f32 %v8579_v1, %v801_v34  ;;  %v804_v36 = vpop.xlane.xlu1 %803 }
 0x42d   : > { %10043 = vpow2.f32 %v824_v32  ;;  %v814_v59 = vsub.f32 %v10450_v9, %v804_v36  ;;  %v1251_v36 = vld [vmem:[%s11752_s2 + $0x8] sm:$0xff] }
 0x42e   : > { %v826_v37 = vmul.f32 1.442695, %v813_v35 }
 0x42f   : > { %v807_v38 = vpop.xlane.xlu0 %806  ;;  %v828_v61 = vmul.f32 1.442695, %v814_v59 }
 0x430   : > { %10045 = vpow2.f32 %v826_v37  ;;  %v815_v41 = vsub.f32 %v8586_v8, %v807_v38  ;;  %v9807_v42 = vpop.permute.xlu1 %9806  ;;  %v1252_v37 = vld [vmem:[%s11752_s2 + $0x90] sm:$0xff]  ;;  %v1253_v38 = vld [vmem:[%s11752_s2 + $0x118] sm:$0xff] }
 0x431   : > { %v9809_v44 = vunpack.i.h.bf16 %v9807_v42  ;;  %v9808_v45 = vunpack.i.l.bf16 %v9807_v42  ;;  %v1254_v42 = vld [vmem:[%s11752_s2 + $0x1a0] sm:$0xff] }
 0x432   : > { %v10460_v46 = vpop.eup %10039  ;;  %v830_v48 = vmul.f32 1.442695, %v815_v41  ;;  %v9297_v41 = vpack.c.bf16 %v1252_v37, %v1251_v36  ;;  %v1486_v37 = vld [vmem:[%s11753_s3 + $0x90] sm:$0xff] }
 0x433   : > { %v841_v49 = vsel %vm783_vm4, %v10460_v46, 0.0  ;;  %v9281_v50 = vpack.c.bf16 %v9809_v44, %v9808_v45  ;;  %v9301_v44 = vpack.c.bf16 %v1254_v42, %v1253_v38  ;;  %v1487_v38 = vld [vmem:[%s11753_s3 + $0x98] sm:$0xff]  ;;  %v1488_v42 = vld [vmem:[%s11753_s3 + $0xa0] sm:$0xff] }
 0x434   : > { %10047 = vpow2.f32 %v830_v48  ;;  %842 = vadd.xlane.f32.xlu0 %v841_v49 }
 0x435   : > { %9282 = vmatprep.subr.bf16.mxu0 %v9281_v50 }
 0x436   : > { %v10042_v51 = vpop.eup %10041  ;;  %9284 = vmatpush3.bf16.msra.mxu0 %v9281_v50 }
 0x437   : > { %v838_v52 = vsel %vm783_vm4, %v10042_v51, 0.0  ;;  %v10044_v53 = vpop.eup %10043 }
 0x438   : > { %839 = vadd.xlane.f32.xlu1 %v838_v52  ;;  %v844_v56 = vsel %vm783_vm4, %v10044_v53, 0.0 }
 0x43a   : > { %v10046_v54 = vpop.eup %10045 }
 0x43b   : > { %v847_v55 = vsel %vm783_vm4, %v10046_v54, 0.0 }
 0x43c   : > { %848 = vadd.xlane.f32.xlu0 %v847_v55  ;;  %845 = vadd.xlane.f32.xlu1 %v844_v56 }
 0x43e   : > { %v10467_v57 = vpop.eup %10047 }
 0x43f   : > { %v853_v58 = vsel %vm783_vm4, %v10467_v57, 0.0 }
 0x440   : > { %854 = vadd.xlane.f32.xlu0 %v853_v58 }
 0x44d   : > { %9816 = vrot.lane.b32.xlu1 %v10405_v39, %s10285_s14 }
 0x454   : > { %v837_v60 = vpop.xlane.xlu0 %836 }
 0x455   : > { %10049 = vrcp.f32 %v837_v60 }
 0x456   : > { %9811 = vrot.lane.b32.xlu0 %v10407_v40, %s10285_s14 }
 0x45f   : > { %v10050_v63 = vpop.eup %10049 }
 0x460   : > { %v859_v3 = vmul.f32 %v10050_v63, %v10036_v19 }
 0x461   : > { %v834_v62 = vpop.xlane.xlu1 %833 }
 0x462   : > { %10051 = vrcp.f32 %v834_v62 }
 0x463   : > { %10053 = vpow2.f32 %v828_v61 }
 0x46c   : > { %v10052_v0 = vpop.eup %10051 }
 0x46d   : > { %v10054_v1 = vpop.eup %10053  ;;  %v857_v2 = vmul.f32 %v10052_v0, %v10038_v21  ;;  %v7943_v0 = vld [vmem:[%s11754_s4 + $0x2] ss:$0 sm:$0xff] }
 0x46e   : > { %v850_v39 = vsel %vm783_vm4, %v10054_v1, 0.0 }
 0x46f   : > { %8591 = vmatprep.mubr.msk.f32.mxu0 %vm783_vm4, %v857_v2 }
 0x470   : > { %8592 = vmatmul.mubr.msk.f32.vlgmr.msra.gmra.mrb[4].mxu0 %vm783_vm4, %v859_v3 }
 0x471   : > { %851 = vadd.xlane.f32.xlu1 %v850_v39 }
 0x482   : > { %9821 = vrot.lane.b32.xlu1 %v10413_v43, %s10285_s14 }
 0x4c1   : > { %v843_v40 = vpop.xlane.xlu0 %842 }
 0x4c5   : > { %v840_v4 = vpop.xlane.xlu1 %839 }
 0x4c6   : > { %10055 = vrcp.f32 %v840_v4 }
 0x4c7   : > { %10057 = vrcp.f32 %v843_v40 }
 0x4c9   : > { %v849_v5 = vpop.xlane.xlu0 %848  ;;  %v846_v6 = vpop.xlane.xlu1 %845 }
 0x4ca   : > { %10059 = vrcp.f32 %v849_v5 }
 0x4cb   : > { %10061 = vrcp.f32 %v846_v6 }
 0x4cd   : > { %v855_v7 = vpop.xlane.xlu0 %854  ;;  %v9817_v8 = vpop.permute.xlu1 %9816 }
 0x4ce   : > { %v9819_v9 = vunpack.i.h.bf16 %v9817_v8  ;;  %v9818_v10 = vunpack.i.l.bf16 %v9817_v8  ;;  %10063 = vrcp.f32 %v855_v7 }
 0x4d0   : > { %v10056_v11 = vpop.eup %10055  ;;  %v9289_v12 = vpack.c.bf16 %v9819_v9, %v9818_v10 }
 0x4d1   : > { %v9812_v13 = vpop.permute.xlu0 %9811  ;;  %v861_v14 = vmul.f32 %v10056_v11, %v10042_v51  ;;  %v10058_v43 = vpop.eup %10057 }
 0x4d2   : > { %v9814_v15 = vunpack.i.h.bf16 %v9812_v13  ;;  %v9813_v16 = vunpack.i.l.bf16 %v9812_v13  ;;  %9290 = vmatprep.subr.bf16.mxu0 %v9289_v12  ;;  %v863_v22 = vmul.f32 %v10058_v43, %v10460_v46  ;;  %v1386_v43 = vld [vmem:[%s11752_s2 + $0x120] sm:$0xff] }
 0x4d3   : > { %8598 = vmatprep.mubr.msk.f32.mxu1 %vm783_vm4, %v861_v14  ;;  %9292 = vmatpush3.bf16.msra.mxu0 %v9289_v12 }
 0x4d4   : > { %v10060_v17 = vpop.eup %10059  ;;  %v9285_v18 = vpack.c.bf16 %v9814_v15, %v9813_v16  ;;  %9298 = vmatprep.subr.bf16.mxu0 %v9297_v41  ;;  %v1384_v15 = vld [vmem:[%s11752_s2 + $0x10] sm:$0xff]  ;;  %v1385_v16 = vld [vmem:[%s11752_s2 + $0x98] sm:$0xff] }
 0x4d5   : > { %v10062_v19 = vpop.eup %10061  ;;  %v867_v20 = vmul.f32 %v10060_v17, %v10046_v54  ;;  %v9305_v17 = vpack.c.bf16 %v1385_v16, %v1384_v15 }
 0x4d6   : > { %9286 = vmatprep.subr.bf16.mxu1 %v9285_v18  ;;  %v865_v21 = vmul.f32 %v10062_v19, %v10044_v53 }
 0x4d7   : > { %9288 = vmatpush3.bf16.msra.mxu1 %v9285_v18  ;;  %v1387_v18 = vld [vmem:[%s11752_s2 + $0x1a8] sm:$0xff] }
 0x4d8   : > { %8605 = vmatprep.mubr.msk.f32.mxu0 %vm783_vm4, %v865_v21  ;;  %v10064_v30 = vpop.eup %10063  ;;  %v9309_v19 = vpack.c.bf16 %v1387_v18, %v1386_v43  ;;  %v1477_v21 = vld [vmem:[%s11753_s3 + $0x48] sm:$0xff] }
 0x4d9   : > { %8606 = vmatmul.mubr.msk.f32.vlgmr.msra.gmra.mrb[6].mxu0 %vm783_vm4, %v867_v20  ;;  %v871_v33 = vmul.f32 %v10064_v30, %v10467_v57  ;;  %v1476_v20 = vld [vmem:[%s11753_s3 + $0x40] sm:$0xff] }
 0x4da   : > { %8599 = vmatmul.mubr.msk.f32.vlgmr.msra.gmra.mrb[8].mxu1 %vm783_vm4, %v863_v22  ;;  %9300 = vmatpush3.bf16.msra.mxu0 %v9297_v41  ;;  %v1478_v22 = vld [vmem:[%s11753_s3 + $0x50] sm:$0xff]  ;;  %v9333_v41 = vpack.c.bf16 %v1487_v38, %v1486_v37  ;;  %v7952_v38 = vld [vmem:[%s11754_s4 + $0x7] ss:$0 sm:$0xff] }
 0x4db   : > { %9302 = vmatprep.subr.bf16.mxu0 %v9301_v44 }
 0x4de   : > { %9304 = vmatpush3.bf16.msra.mxu0 %v9301_v44  ;;  %v1489_v44 = vld [vmem:[%s11753_s3 + $0xa8] sm:$0xff] }
 0x4fe   : > { %v852_v23 = vpop.xlane.xlu1 %851 }
 0x4ff   : > { %10065 = vrcp.f32 %v852_v23  ;;  %v9313_v23 = vpack.c.bf16 %v1477_v21, %v1476_v20 }
 0x501   : > { %9314 = vmatprep.subr.bf16.mxu0 %v9313_v23 }
 0x502   : > { %v9822_v24 = vpop.permute.xlu1 %9821 }
 0x503   : > { %v9824_v25 = vunpack.i.h.bf16 %v9822_v24  ;;  %v9823_v26 = vunpack.i.l.bf16 %v9822_v24  ;;  %v1479_v24 = vld [vmem:[%s11753_s3 + $0x58] sm:$0xff] }
 0x505   : > { %v9293_v29 = vpack.c.bf16 %v9824_v25, %v9823_v26  ;;  %v9317_v25 = vpack.c.bf16 %v1479_v24, %v1478_v22  ;;  %v1480_v26 = vld [vmem:[%s11753_s3 + $0x60] sm:$0xff] }
 0x506   : > { %v1615_v24 = vld [vmem:[%s11752_s2 + $0xa0] sm:$0xff] }
 0x507   : > { %9294 = vmatprep.subr.bf16.mxu1 %v9293_v29 }
 0x508   : > { %9296 = vmatpush3.bf16.msra.mxu1 %v9293_v29  ;;  %v1481_v29 = vld [vmem:[%s11753_s3 + $0x68] sm:$0xff] }
 0x509   : > { %v10066_v31 = vpop.eup %10065  ;;  %9306 = vmatprep.subr.bf16.mxu1 %v9305_v17  ;;  %v9321_v30 = vpack.c.bf16 %v1481_v29, %v1480_v26  ;;  %v1617_v29 = vld [vmem:[%s11752_s2 + $0x1b0] sm:$0xff] }
 0x50a   : > { %v869_v32 = vmul.f32 %v10066_v31, %v10054_v1  ;;  %v1482_v31 = vld [vmem:[%s11753_s3 + $0x70] sm:$0xff] }
 0x50c   : > { %8612 = vmatprep.mubr.msk.f32.mxu1 %vm783_vm4, %v869_v32  ;;  %v1483_v32 = vld [vmem:[%s11753_s3 + $0x78] sm:$0xff] }
 0x50d   : > { %8613 = vmatmul.mubr.msk.f32.vlgmr.msra.gmra.mrb[10].mxu1 %vm783_vm4, %v871_v33  ;;  %v9325_v33 = vpack.c.bf16 %v1483_v32, %v1482_v31 }
 0x50e   : > { %9308 = vmatpush3.bf16.msra.mxu1 %v9305_v17 }
 0x50f   : > { %9310 = vmatprep.subr.bf16.mxu1 %v9309_v19 }
 0x512   : > { %9312 = vmatpush3.bf16.msra.mxu1 %v9309_v19 }
 0x543   : > { %v8593_v34 = vpop.f32.mrb[4].mxu0 }
 0x544   : > { %v950_v35 = vpop.f32.mrb[5].mxu0 }
 0x5ac   : > { %v8607_v45 = vpop.f32.mrb[6].mxu0 }
 0x5ad   : > { %v1124_v46 = vpop.f32.mrb[7].mxu0  ;;  %v8600_v48 = vpop.f32.mrb[8].mxu1 }
 0x5ae   : > { %1224 = vrot.lane.b32.xlu1 %v8600_v48, %s10286_s24  ;;  %v1037_v49 = vpop.f32.mrb[9].mxu1 }
 0x5af   : > { %1222 = vrot.lane.b32.xlu0 %v1037_v49, %s10286_s24 }
 0x5b2   : > { %1232 = vrot.lane.b32.xlu1 %v8607_v45, %s10287_s25  ;;  %v9337_v45 = vpack.c.bf16 %v1489_v44, %v1488_v42 }
 0x5b3   : > { %1230 = vrot.lane.b32.xlu0 %v1124_v46, %s10287_s25 }
 0x5e0   : > { %v8614_v50 = vpop.f32.mrb[10].mxu1 }
 0x5e1   : > { %v1211_v51 = vpop.f32.mrb[11].mxu1  ;;  %1240 = vrot.lane.b32.xlu1 %v8614_v50, %s10288_s27 }
 0x5e2   : > { %1238 = vrot.lane.b32.xlu0 %v1211_v51, %s10288_s27 }
 0x620   : > { %v1225_v52 = vpop.permute.xlu1 %1224 }
 0x621   : > { %v1223_v53 = vpop.permute.xlu0 %1222  ;;  %v1245_v58 = vsel %vm438_vm2, %v8593_v34, %v1225_v52  ;;  %v1484_v34 = vld [vmem:[%s11753_s3 + $0x80] sm:$0xff] }
 0x622   : > { %v1244_v56 = vsel %vm438_vm2, %v950_v35, %v1223_v53  ;;  %v1485_v35 = vld [vmem:[%s11753_s3 + $0x88] sm:$0xff] }
 0x623   : > { %v9329_v36 = vpack.c.bf16 %v1485_v35, %v1484_v34 }
 0x624   : > { %v1233_v54 = vpop.permute.xlu1 %1232 }
 0x625   : > { %v1231_v55 = vpop.permute.xlu0 %1230  ;;  %v1247_v61 = vsel %vm783_vm4, %v1245_v58, %v1233_v54  ;;  %v7946_v54 = vld [vmem:[%s11754_s4 + $0x3] ss:$0 sm:$0xff] }
 0x626   : > { %v1246_v59 = vsel %vm783_vm4, %v1244_v56, %v1231_v55  ;;  %v7947_v56 = vld [vmem:[%s11754_s4 + $0x4] ss:$0 sm:$0xff] }
 0x653   : > { %v1241_v57 = vpop.permute.xlu1 %1240 }
 0x654   : > { %v1239_v60 = vpop.permute.xlu0 %1238  ;;  %v1250_v63 = vsel %vm1248_vm5, %v1247_v61, %v1241_v57 }
 0x655   : > { %v1249_v62 = vsel %vm1248_vm5, %v1246_v59, %v1239_v60 }
 0x656   : > { %8623 = vmatprep.mubr.msk.f32.mxu0 %vm338_vm1, %v1249_v62 }
 0x657   : > { %8624 = vmatmul.mubr.msk.f32.vlgmr.msra.gmra.mrb[8].mxu0 %vm338_vm1, %v1250_v63  ;;  %v1490_v63 = vld [vmem:[%s11753_s3 + $0xb0] sm:$0xff] }
 0x658   : > { %9316 = vmatpush3.bf16.msra.mxu0 %v9313_v23  ;;  %v1614_v23 = vld [vmem:[%s11752_s2 + $0x18] sm:$0xff] }
 0x659   : > { %9318 = vmatprep.subr.bf16.mxu0 %v9317_v25  ;;  %v9345_v26 = vpack.c.bf16 %v1615_v24, %v1614_v23 }
 0x65b   : > { %9346 = vmatprep.subr.bf16.mxu1 %v9345_v26 }
 0x65c   : > { %9320 = vmatpush3.bf16.msra.mxu0 %v9317_v25  ;;  %v1616_v25 = vld [vmem:[%s11752_s2 + $0x128] sm:$0xff] }
 0x65d   : > { %9322 = vmatprep.subr.bf16.mxu0 %v9321_v30 }
 0x660   : > { %9324 = vmatpush3.bf16.msra.mxu0 %v9321_v30  ;;  %v9349_v30 = vpack.c.bf16 %v1617_v29, %v1616_v25 }
 0x661   : > { %9326 = vmatprep.subr.bf16.mxu0 %v9325_v33 }
 0x664   : > { %9328 = vmatpush3.bf16.msra.mxu0 %v9325_v33 }
 0x665   : > { %9330 = vmatprep.subr.bf16.mxu0 %v9329_v36 }
 0x668   : > { %9332 = vmatpush3.bf16.msra.mxu0 %v9329_v36 }
 0x669   : > { %9334 = vmatprep.subr.bf16.mxu0 %v9333_v41 }
 0x66c   : > { %9336 = vmatpush3.bf16.msra.mxu0 %v9333_v41 }
 0x66d   : > { %9338 = vmatprep.subr.bf16.mxu0 %v9337_v45 }
 0x670   : > { %9340 = vmatpush3.bf16.msra.mxu0 %v9337_v45 }
 0x72a   : > { %v8625_v1 = vpop.f32.mrb[8].mxu0 }
 0x72b   : > { %v1338_v2 = vadd.f32 %v8625_v1, %v7943_v0  ;;  %v1332_v3 = vpop.f32.mrb[9].mxu0 }
 0x72c   : > { %v1333_v39 = vadd.f32 %v7943_v0, %v1332_v3  ;;  %v1491_v0 = vld [vmem:[%s11753_s3 + $0xb8] sm:$0xff] }
 0x72d   : > { %v1342_v40 = vadd.f32 %v1338_v2, %v10384_v28  ;;  %v9341_v1 = vpack.c.bf16 %v1491_v0, %v1490_v63  ;;  %v7948_v2 = vld [vmem:[%s11754_s4 + $0x5] ss:$0 sm:$0xff] }
 0x72e   : > { %v1341_v4 = vadd.f32 %v1333_v39, %v10382_v27 }
 0x72f   : > { %v1346_v5 = vsel %vm338_vm1, %v1342_v40, 0.0  ;;  %9342 = vmatprep.subr.bf16.mxu0 %v9341_v1 }
 0x730   : > { %1347 = vadd.xlane.f32.xlu1 %v1346_v5  ;;  %v1343_v6 = vsel %vm338_vm1, %v1341_v4, 0.0  ;;  %9344 = vmatpush3.bf16.msra.mxu0 %v9341_v1 }
 0x731   : > { %1344 = vadd.xlane.f32.xlu0 %v1343_v6 }
 0x7bd   : > { %v1348_v7 = vpop.xlane.xlu1 %1347 }
 0x7be   : > { %v1351_v8 = vmul.f32 0.03125, %v1348_v7  ;;  %v1345_v9 = vpop.xlane.xlu0 %1344  ;;  %v7951_v7 = vld [vmem:[%s11754_s4 + $0x6] ss:$0 sm:$0xff] }
 0x7bf   : > { %v1350_v10 = vmul.f32 0.03125, %v1345_v9 }
 0x7c0   : > { %v10522_v11 = vsub.f32 %v1342_v40, %v1351_v8 }
 0x7c1   : > { %v1352_v12 = vsub.f32 %v1341_v4, %v1350_v10 }
 0x7c2   : > { %v1355_v28 = vmul.f32 %v10522_v11, %v10522_v11 }
 0x7c3   : > { %v1354_v13 = vmul.f32 %v1352_v12, %v1352_v12 }
 0x7c4   : > { %v1359_v27 = vsel %vm338_vm1, %v1355_v28, 0.0 }
 0x7c5   : > { %v1356_v14 = vsel %vm338_vm1, %v1354_v13, 0.0 }
 0x7c6   : > { %1357 = vadd.xlane.f32.xlu0 %v1356_v14 }
 0x7ca   : > { %1360 = vadd.xlane.f32.xlu0 %v1359_v27 }
 0x853   : > { %v1358_v46 = vpop.xlane.xlu0 %1357 }
 0x854   : > { %v1362_v48 = vmul.f32 0.03125, %v1358_v46  ;;  %v7953_v46 = vld [vmem:[%s11754_s4 + $0x8] ss:$0 sm:$0xff] }
 0x856   : > { %v1364_v49 = vadd.f32 1e-05, %v1362_v48 }
 0x857   : > { %v1361_v50 = vpop.xlane.xlu0 %1360 }
 0x858   : > { %10067 = vrsqrt.f32 %v1364_v49  ;;  %v1363_v51 = vmul.f32 0.03125, %v1361_v50 }
 0x85a   : > { %v1365_v52 = vadd.f32 1e-05, %v1363_v51  ;;  %v7954_v51 = vld [vmem:[%s11754_s4 + $0x9] ss:$0 sm:$0xff] }
 0x85c   : > { %10069 = vrsqrt.f32 %v1365_v52 }
 0x862   : > { %v10068_v53 = vpop.eup %10067 }
 0x863   : > { %v1368_v55 = vmul.f32 %v10068_v53, %v1352_v12 }
 0x865   : > { %v1375_v57 = vmul.f32 %v7946_v54, %v1368_v55 }
 0x866   : > { %v10070_v58 = vpop.eup %10069 }
 0x867   : > { %v1369_v59 = vmul.f32 %v10070_v58, %v10522_v11  ;;  %v1382_v60 = vadd.f32 %v7947_v56, %v1375_v57 }
 0x869   : > { %v1376_v61 = vmul.f32 %v7946_v54, %v1369_v59  ;;  %8634 = vmatprep.mubr.msk.f32.mxu1 %vm338_vm1, %v1382_v60 }
 0x86b   : > { %v1383_v62 = vadd.f32 %v7947_v56, %v1376_v61 }
 0x86d   : > { %8635 = vmatmul.mubr.msk.f32.vlgmr.msra.gmra.mrb[12].mxu1 %vm338_vm1, %v1383_v62 }
 0x86e   : > { %9348 = vmatpush3.bf16.msra.mxu1 %v9345_v26 }
 0x86f   : > { %9350 = vmatprep.subr.bf16.mxu1 %v9349_v30 }
 0x872   : > { %9352 = vmatpush3.bf16.msra.mxu1 %v9349_v30 }
 0x940   : > { %v8636_v3 = vpop.f32.mrb[12].mxu1 }
 0x941   : > { %v1471_v39 = vadd.f32 %v8636_v3, %v7948_v2  ;;  %v1465_v40 = vpop.f32.mrb[13].mxu1 }
 0x942   : > { %v1466_v4 = vadd.f32 %v7948_v2, %v1465_v40 }
 0x943   : > { %v1475_v6 = vmax.f32 %v1471_v39, 0.0 }
 0x944   : > { %v1474_v5 = vmax.f32 %v1466_v4, 0.0 }
 0x946   : > { %8669 = vmatprep.mubr.f32.mxu0 %v1474_v5 }
 0x947   : > { %8670 = vmatmul.mubr.f32.vlgmr.msra.gmra.mrb[10].mxu0 %v1475_v6 }
 0xa1a   : > { %v8671_v8 = vpop.f32.mrb[10].mxu0 }
 0xa1b   : > { %v1569_v9 = vadd.f32 %v8671_v8, %v7951_v7  ;;  %v1563_v10 = vpop.f32.mrb[11].mxu0 }
 0xa1c   : > { %v1564_v11 = vadd.f32 %v7951_v7, %v1563_v10 }
 0xa1d   : > { %v1573_v12 = vadd.f32 %v1569_v9, %v1383_v62 }
 0xa1e   : > { %v1572_v13 = vadd.f32 %v1564_v11, %v1382_v60 }
 0xa1f   : > { %v1577_v14 = vsel %vm338_vm1, %v1573_v12, 0.0 }
 0xa20   : > { %1578 = vadd.xlane.f32.xlu0 %v1577_v14  ;;  %v1574_v28 = vsel %vm338_vm1, %v1572_v13, 0.0 }
 0xa21   : > { %1575 = vadd.xlane.f32.xlu1 %v1574_v28 }
 0xaad   : > { %v1579_v27 = vpop.xlane.xlu0 %1578 }
 0xaae   : > { %v1581_v15 = vmul.f32 0.03125, %v1579_v27  ;;  %v1576_v16 = vpop.xlane.xlu1 %1575 }
 0xaaf   : > { %v1580_v43 = vmul.f32 0.03125, %v1576_v16 }
 0xab0   : > { %v1583_v17 = vsub.f32 %v1573_v12, %v1581_v15 }
 0xab1   : > { %v1582_v18 = vsub.f32 %v1572_v13, %v1580_v43 }
 0xab2   : > { %v1585_v19 = vmul.f32 %v1583_v17, %v1583_v17 }
 0xab3   : > { %v1584_v20 = vmul.f32 %v1582_v18, %v1582_v18 }
 0xab4   : > { %v1589_v21 = vsel %vm338_vm1, %v1585_v19, 0.0 }
 0xab5   : > { %1590 = vadd.xlane.f32.xlu0 %v1589_v21  ;;  %v1586_v22 = vsel %vm338_vm1, %v1584_v20, 0.0 }
 0xab6   : > { %1587 = vadd.xlane.f32.xlu1 %v1586_v22 }
 0xb42   : > { %v1591_v31 = vpop.xlane.xlu0 %1590 }
 0xb43   : > { %v1593_v32 = vmul.f32 0.03125, %v1591_v31  ;;  %v1588_v33 = vpop.xlane.xlu1 %1587 }
 0xb44   : > { %v1592_v34 = vmul.f32 0.03125, %v1588_v33 }
 0xb45   : > { %v1595_v35 = vadd.f32 1e-05, %v1593_v32 }
 0xb46   : > { %v1594_v36 = vadd.f32 1e-05, %v1592_v34 }
 0xb47   : > { %10071 = vrsqrt.f32 %v1595_v35 }
 0xb48   : > { %10073 = vrsqrt.f32 %v1594_v36 }
 0xb51   : > { %v10072_v37 = vpop.eup %10071 }
 0xb52   : > { %v10074_v41 = vpop.eup %10073  ;;  %v1599_v42 = vmul.f32 %v10072_v37, %v1583_v17 }
 0xb53   : > { %v1598_v44 = vmul.f32 %v10074_v41, %v1582_v18 }
 0xb54   : > { %v1606_v45 = vmul.f32 %v7952_v38, %v1599_v42 }
 0xb55   : > { %v1605_v48 = vmul.f32 %v7952_v38, %v1598_v44 }
 0xb56   : > { %v10627_v50 = vadd.f32 %v7953_v46, %v1606_v45 }
 0xb57   : > { %v10625_v49 = vadd.f32 %v7953_v46, %v1605_v48 }
 0xb59   : > { %8680 = vmatprep.mubr.msk.f32.mxu1 %vm338_vm1, %v10625_v49 }
 0xb5a   : > { %8681 = vmatmul.mubr.msk.f32.vlgmr.msra.gmra.mrb[14].mxu1 %vm338_vm1, %v10627_v50 }
 0xc2d   : > { %v8682_v52 = vpop.f32.mrb[14].mxu1 }
 0xc2e   : > { %v1701_v53 = vadd.f32 %v8682_v52, %v7954_v51  ;;  %v1695_v54 = vpop.f32.mrb[15].mxu1 }
 0xc2f   : > { %v1696_v55 = vadd.f32 %v7954_v51, %v1695_v54 }
 0xc30   : > { %1708 = vrot.lane.b32.xlu0 %v1701_v53, %s10282_s11 }
 0xc31   : > { %1706 = vrot.lane.b32.xlu1 %v1696_v55, %s10282_s11  ;;  %8687 = vmatprep.mubr.msk.f32.mxu1 %vm438_vm2, %v1696_v55  ;;  %v10641_v56 = vpack.i.bf16 %v1701_v53, %v1696_v55 }
 0xc34   : > { %1714 = vrot.lane.b32.xlu0 %v1696_v55, %s10283_s12 }
 0xc35   : > { %1712 = vrot.lane.b32.xlu1 %v1701_v53, %s10281_s10 }
 0xc38   : > { %9826 = vrot.lane.b32.xlu0 %v10641_v56, %s10284_s13 }
 0xc39   : > { %1710 = vrot.lane.b32.xlu1 %v1696_v55, %s10281_s10 }
 0xc3d   : > { %1716 = vrot.lane.b32.xlu1 %v1701_v53, %s10283_s12 }
 0xca2   : > { %v1709_v57 = vpop.permute.xlu0 %1708 }
 0xca3   : > { %v1707_v58 = vpop.permute.xlu1 %1706 }
 0xca4   : > { %v10647_v59 = vpack.i.bf16 %v1709_v57, %v1707_v58 }
 0xca6   : > { %v1715_v60 = vpop.permute.xlu0 %1714  ;;  %9831 = vrot.lane.b32.xlu1 %v10647_v59, %s10284_s13 }
 0xca7   : > { %8708 = vmatprep.mubr.msk.f32.mxu0 %vm438_vm2, %v1715_v60  ;;  %v1713_v61 = vpop.permute.xlu1 %1712 }
 0xcaa   : > { %v9827_v62 = vpop.permute.xlu0 %9826 }
 0xcab   : > { %v9829_v63 = vunpack.i.h.bf16 %v9827_v62  ;;  %v9828_v0 = vunpack.i.l.bf16 %v9827_v62  ;;  %v1711_v1 = vpop.permute.xlu1 %1710 }
 0xcac   : > { %v10652_v2 = vpack.i.bf16 %v1713_v61, %v1711_v1 }
 0xcad   : > { %v9353_v3 = vpack.c.bf16 %v9829_v63, %v9828_v0 }
 0xcae   : > { %9836 = vrot.lane.b32.xlu0 %v10652_v2, %s10284_s13 }
 0xcaf   : > { %9355 = vmatprep.subr.msk.bf16.mxu1 %vm10419_vm3, %v9353_v3  ;;  %v1717_v39 = vpop.permute.xlu1 %1716 }
 0xcb0   : > { %9358 = vmatpush3.bf16.xpose.msk.msra.mxu1 %vm10419_vm3, %v9353_v3  ;;  %v10660_v40 = vpack.i.bf16 %v1717_v39, %v1715_v60 }
 0xcb2   : > { %9841 = vrot.lane.b32.xlu1 %v10660_v40, %s10284_s13 }
 0xcb7   : > { %8688 = vmatmul.mubr.msk.f32.vlgmr.msra.gmra.mrb[16].mxu1 %vm438_vm2, %v1701_v53 }
 0xcb8   : > { %8694 = vmatprep.mubr.msk.f32.mxu1 %vm438_vm2, %v1707_v58 }
 0xd18   : > { %v9832_v4 = vpop.permute.xlu1 %9831 }
 0xd19   : > { %v9834_v5 = vunpack.i.h.bf16 %v9832_v4  ;;  %v9833_v6 = vunpack.i.l.bf16 %v9832_v4 }
 0xd1b   : > { %v9359_v7 = vpack.c.bf16 %v9834_v5, %v9833_v6 }
 0xd1d   : > { %9361 = vmatprep.subr.msk.bf16.mxu1 %vm10419_vm3, %v9359_v7 }
 0xd1e   : > { %9364 = vmatpush3.bf16.xpose.msk.msra.mxu1 %vm10419_vm3, %v9359_v7 }
 0xd20   : > { %v9837_v8 = vpop.permute.xlu0 %9836 }
 0xd21   : > { %v9839_v9 = vunpack.i.h.bf16 %v9837_v8  ;;  %v9838_v10 = vunpack.i.l.bf16 %v9837_v8 }
 0xd23   : > { %v9365_v11 = vpack.c.bf16 %v9839_v9, %v9838_v10 }
 0xd24   : > { %v9842_v12 = vpop.permute.xlu1 %9841 }
 0xd25   : > { %v9844_v13 = vunpack.i.h.bf16 %v9842_v12  ;;  %v9843_v14 = vunpack.i.l.bf16 %v9842_v12  ;;  %8695 = vmatmul.mubr.msk.f32.vlgmr.msra.gmra.mrb[18].mxu1 %vm438_vm2, %v1709_v57  ;;  %9367 = vmatprep.subr.msk.bf16.mxu1 %vm10419_vm3, %v9365_v11 }
 0xd26   : > { %9370 = vmatpush3.bf16.xpose.msk.msra.mxu1 %vm10419_vm3, %v9365_v11  ;;  %8701 = vmatprep.mubr.msk.f32.mxu1 %vm438_vm2, %v1711_v1 }
 0xd27   : > { %v9371_v28 = vpack.c.bf16 %v9844_v13, %v9843_v14 }
 0xd29   : > { %9373 = vmatprep.subr.msk.bf16.mxu0 %vm10419_vm3, %v9371_v28 }
 0xd2a   : > { %9376 = vmatpush3.bf16.xpose.msk.msra.mxu0 %vm10419_vm3, %v9371_v28 }
 0xd2d   : > { %8702 = vmatmul.mubr.msk.f32.vlgmr.msra.gmra.mrb[20].mxu1 %vm438_vm2, %v1713_v61 }
 0xd31   : > { %8709 = vmatmul.mubr.msk.f32.vlgmr.msra.gmra.mrb[12].mxu0 %vm438_vm2, %v1717_v39 }
 0xd8a   : > { %v8689_v27 = vpop.f32.mrb[16].mxu1 }
 0xd8b   : > { %v1796_v15 = vpop.f32.mrb[17].mxu1  ;;  %v2069_v16 = vsel %vm783_vm4, %v8689_v27, -inf }
 0xd8c   : > { %2070 = vmax.xlane.f32.xlu1 %v2069_v16  ;;  %v2066_v43 = vsel %vm783_vm4, %v1796_v15, -inf }
 0xd8d   : > { %2067 = vmax.xlane.f32.xlu0 %v2066_v43 }
 0xdf8   : > { %v8696_v17 = vpop.f32.mrb[18].mxu1 }
 0xdf9   : > { %v1883_v18 = vpop.f32.mrb[19].mxu1  ;;  %v2075_v19 = vsel %vm783_vm4, %v8696_v17, -inf }
 0xdfa   : > { %2076 = vmax.xlane.f32.xlu0 %v2075_v19  ;;  %v2072_v20 = vsel %vm783_vm4, %v1883_v18, -inf }
 0xdfe   : > { %2073 = vmax.xlane.f32.xlu0 %v2072_v20 }
 0xe00   : > { %v8703_v21 = vpop.f32.mrb[20].mxu1 }
 0xe01   : > { %v10686_v22 = vpop.f32.mrb[21].mxu1  ;;  %v2081_v23 = vsel %vm783_vm4, %v8703_v21, -inf }
 0xe02   : > { %2082 = vmax.xlane.f32.xlu0 %v2081_v23  ;;  %v2078_v30 = vsel %vm783_vm4, %v10686_v22, -inf }
 0xe04   : > { %v8710_v24 = vpop.f32.mrb[12].mxu0 }
 0xe05   : > { %v2057_v25 = vpop.f32.mrb[13].mxu0  ;;  %v2087_v26 = vsel %vm783_vm4, %v8710_v24, -inf }
 0xe06   : > { %2088 = vmax.xlane.f32.xlu0 %v2087_v26  ;;  %v2084_v29 = vsel %vm783_vm4, %v2057_v25, -inf }
 0xe07   : > { %2085 = vmax.xlane.f32.xlu1 %v2084_v29 }
 0xe0b   : > { %2079 = vmax.xlane.f32.xlu1 %v2078_v30 }
 0xe19   : > { %v2071_v31 = vpop.xlane.xlu1 %2070 }
 0xe1a   : > { %v2091_v32 = vsub.f32 %v8689_v27, %v2071_v31  ;;  %v2068_v34 = vpop.xlane.xlu0 %2067 }
 0xe1b   : > { %v2090_v37 = vsub.f32 %v1796_v15, %v2068_v34 }
 0xe1c   : > { %v2100_v33 = vmul.f32 1.442695, %v2091_v32  ;;  %9846 = vrot.lane.b32.xlu1 %v10641_v56, %s10285_s14 }
 0xe1d   : > { %v2098_v38 = vmul.f32 1.442695, %v2090_v37 }
 0xe1e   : > { %10075 = vpow2.f32 %v2100_v33 }
 0xe1f   : > { %10077 = vpow2.f32 %v2098_v38 }
 0xe28   : > { %v10695_v35 = vpop.eup %10075 }
 0xe29   : > { %v2117_v36 = vsel %vm783_vm4, %v10695_v35, 0.0  ;;  %v10078_v41 = vpop.eup %10077 }
 0xe2a   : > { %2118 = vadd.xlane.f32.xlu0 %v2117_v36  ;;  %v2114_v42 = vsel %vm783_vm4, %v10078_v41, 0.0 }
 0xe40   : > { %2115 = vadd.xlane.f32.xlu1 %v2114_v42 }
 0xe87   : > { %v2077_v44 = vpop.xlane.xlu0 %2076 }
 0xe88   : > { %v2093_v45 = vsub.f32 %v8696_v17, %v2077_v44 }
 0xe8a   : > { %v2104_v46 = vmul.f32 1.442695, %v2093_v45 }
 0xe8b   : > { %v2074_v48 = vpop.xlane.xlu0 %2073 }
 0xe8c   : > { %10079 = vpow2.f32 %v2104_v46  ;;  %v2092_v51 = vsub.f32 %v1883_v18, %v2074_v48 }
 0xe8e   : > { %v2102_v52 = vmul.f32 1.442695, %v2092_v51 }
 0xe8f   : > { %v2083_v53 = vpop.xlane.xlu0 %2082 }
 0xe90   : > { %10081 = vpow2.f32 %v2102_v52  ;;  %v2095_v54 = vsub.f32 %v8703_v21, %v2083_v53 }
 0xe92   : > { %v2108_v61 = vmul.f32 1.442695, %v2095_v54 }
 0xe93   : > { %v2089_v55 = vpop.xlane.xlu0 %2088 }
 0xe94   : > { %v2097_v56 = vsub.f32 %v8710_v24, %v2089_v55  ;;  %v2086_v57 = vpop.xlane.xlu1 %2085 }
 0xe95   : > { %v2096_v58 = vsub.f32 %v2057_v25, %v2086_v57 }
 0xe96   : > { %v10700_v60 = vpop.eup %10079  ;;  %v2112_v62 = vmul.f32 1.442695, %v2097_v56 }
 0xe97   : > { %v2110_v63 = vmul.f32 1.442695, %v2096_v58  ;;  %v2123_v0 = vsel %vm783_vm4, %v10700_v60, 0.0  ;;  %v2532_v58 = vld [vmem:[%s11752_s2 + $0x20] sm:$0xff] }
 0xe98   : > { %10083 = vpow2.f32 %v2112_v62  ;;  %2124 = vadd.xlane.f32.xlu0 %v2123_v0  ;;  %v2080_v1 = vpop.xlane.xlu1 %2079  ;;  %v2534_v0 = vld [vmem:[%s11752_s2 + $0x130] sm:$0xff] }
 0xe99   : > { %10085 = vpow2.f32 %v2110_v63  ;;  %v2094_v14 = vsub.f32 %v10686_v22, %v2080_v1  ;;  %v2535_v1 = vld [vmem:[%s11752_s2 + $0x1b8] sm:$0xff] }
 0xe9a   : > { %v10082_v3 = vpop.eup %10081  ;;  %10087 = vpow2.f32 %v2108_v61 }
 0xe9b   : > { %v2120_v39 = vsel %vm783_vm4, %v10082_v3, 0.0  ;;  %v2106_v28 = vmul.f32 1.442695, %v2094_v14 }
 0xe9c   : > { %2121 = vadd.xlane.f32.xlu1 %v2120_v39  ;;  %v9847_v4 = vpop.permute.xlu1 %9846 }
 0xe9d   : > { %v9849_v5 = vunpack.i.h.bf16 %v9847_v4  ;;  %v9848_v6 = vunpack.i.l.bf16 %v9847_v4  ;;  %10089 = vpow2.f32 %v2106_v28 }
 0xe9f   : > { %v9377_v7 = vpack.c.bf16 %v9849_v5, %v9848_v6 }
 0xea1   : > { %9378 = vmatprep.subr.bf16.mxu1 %v9377_v7 }
 0xea2   : > { %v10705_v8 = vpop.eup %10083  ;;  %9380 = vmatpush3.bf16.msra.mxu1 %v9377_v7 }
 0xea3   : > { %v10086_v9 = vpop.eup %10085  ;;  %v2135_v10 = vsel %vm783_vm4, %v10705_v8, 0.0 }
 0xea4   : > { %v10709_v11 = vpop.eup %10087  ;;  %2136 = vadd.xlane.f32.xlu0 %v2135_v10  ;;  %v2132_v12 = vsel %vm783_vm4, %v10086_v9, 0.0 }
 0xea5   : > { %2133 = vadd.xlane.f32.xlu1 %v2132_v12  ;;  %v2129_v13 = vsel %vm783_vm4, %v10709_v11, 0.0 }
 0xea7   : > { %v10090_v16 = vpop.eup %10089 }
 0xea8   : > { %2130 = vadd.xlane.f32.xlu0 %v2129_v13  ;;  %v2126_v18 = vsel %vm783_vm4, %v10090_v16, 0.0 }
 0xeb6   : > { %9856 = vrot.lane.b32.xlu1 %v10652_v2, %s10285_s14 }
 0xeb7   : > { %v2119_v27 = vpop.xlane.xlu0 %2118 }
 0xeb8   : > { %10091 = vrcp.f32 %v2119_v27 }
 0xebe   : > { %9851 = vrot.lane.b32.xlu0 %v10647_v59, %s10285_s14 }
 0xec2   : > { %v10092_v43 = vpop.eup %10091 }
 0xec3   : > { %v2141_v2 = vmul.f32 %v10092_v43, %v10695_v35  ;;  %v7981_v43 = vld [vmem:[%s11754_s4 + $0xa] ss:$0 sm:$0xff] }
 0xecd   : > { %v2116_v15 = vpop.xlane.xlu1 %2115 }
 0xece   : > { %10093 = vrcp.f32 %v2116_v15 }
 0xed8   : > { %v10094_v17 = vpop.eup %10093 }
 0xed9   : > { %v2139_v19 = vmul.f32 %v10094_v17, %v10078_v41 }
 0xeda   : > { %2127 = vadd.xlane.f32.xlu1 %v2126_v18 }
 0xedb   : > { %8715 = vmatprep.mubr.msk.f32.mxu1 %vm783_vm4, %v2139_v19 }
 0xedc   : > { %8716 = vmatmul.mubr.msk.f32.vlgmr.msra.gmra.mrb[22].mxu1 %vm783_vm4, %v2141_v2 }
 0xeeb   : > { %9861 = vrot.lane.b32.xlu1 %v10660_v40, %s10285_s14 }
 0xf25   : > { %v2125_v20 = vpop.xlane.xlu0 %2124 }
 0xf29   : > { %v2122_v59 = vpop.xlane.xlu1 %2121 }
 0xf2a   : > { %10095 = vrcp.f32 %v2122_v59 }
 0xf2b   : > { %10097 = vrcp.f32 %v2125_v20 }
 0xf31   : > { %v2137_v21 = vpop.xlane.xlu0 %2136 }
 0xf32   : > { %v2134_v22 = vpop.xlane.xlu1 %2133 }
 0xf33   : > { %10099 = vrcp.f32 %v2134_v22 }
 0xf34   : > { %v10096_v23 = vpop.eup %10095  ;;  %10101 = vrcp.f32 %v2137_v21 }
 0xf35   : > { %v2131_v24 = vpop.xlane.xlu0 %2130  ;;  %v2143_v25 = vmul.f32 %v10096_v23, %v10082_v3  ;;  %v10098_v35 = vpop.eup %10097  ;;  %v9397_v3 = vpack.c.bf16 %v2535_v1, %v2534_v0  ;;  %v2767_v0 = vld [vmem:[%s11753_s3 + $0x118] sm:$0xff] }
 0xf36   : > { %v9857_v26 = vpop.permute.xlu1 %9856  ;;  %v2145_v37 = vmul.f32 %v10098_v35, %v10700_v60  ;;  %10103 = vrcp.f32 %v2131_v24  ;;  %v2533_v60 = vld [vmem:[%s11752_s2 + $0xa8] sm:$0xff] }
 0xf37   : > { %v9859_v29 = vunpack.i.h.bf16 %v9857_v26  ;;  %v9858_v30 = vunpack.i.l.bf16 %v9857_v26  ;;  %8722 = vmatprep.mubr.msk.f32.mxu1 %vm783_vm4, %v2143_v25  ;;  %v9393_v61 = vpack.c.bf16 %v2533_v60, %v2532_v58  ;;  %v2764_v60 = vld [vmem:[%s11753_s3 + $0x100] sm:$0xff] }
 0xf39   : > { %v9852_v31 = vpop.permute.xlu0 %9851  ;;  %v9385_v32 = vpack.c.bf16 %v9859_v29, %v9858_v30 }
 0xf3a   : > { %v9854_v33 = vunpack.i.h.bf16 %v9852_v31  ;;  %v9853_v34 = vunpack.i.l.bf16 %v9852_v31 }
 0xf3b   : > { %9386 = vmatprep.subr.bf16.mxu0 %v9385_v32 }
 0xf3c   : > { %9388 = vmatpush3.bf16.msra.mxu0 %v9385_v32  ;;  %v9381_v40 = vpack.c.bf16 %v9854_v33, %v9853_v34  ;;  %v2664_v33 = vld [vmem:[%s11752_s2 + $0x28] sm:$0xff]  ;;  %v2665_v34 = vld [vmem:[%s11752_s2 + $0xb0] sm:$0xff] }
 0xf3d   : > { %v10100_v36 = vpop.eup %10099  ;;  %9394 = vmatprep.subr.bf16.mxu0 %v9393_v61  ;;  %v9401_v35 = vpack.c.bf16 %v2665_v34, %v2664_v33 }
 0xf3e   : > { %9382 = vmatprep.subr.bf16.mxu1 %v9381_v40  ;;  %v2151_v38 = vmul.f32 %v10100_v36, %v10086_v9  ;;  %v10102_v48 = vpop.eup %10101  ;;  %v2667_v36 = vld [vmem:[%s11752_s2 + $0x1c0] sm:$0xff] }
 0xf3f   : > { %9384 = vmatpush3.bf16.msra.mxu1 %v9381_v40  ;;  %v2153_v53 = vmul.f32 %v10102_v48, %v10705_v8  ;;  %v2666_v40 = vld [vmem:[%s11752_s2 + $0x138] sm:$0xff] }
 0xf40   : > { %v10104_v51 = vpop.eup %10103 }
 0xf41   : > { %v2149_v55 = vmul.f32 %v10104_v51, %v10709_v11  ;;  %v2759_v51 = vld [vmem:[%s11753_s3 + $0xd8] sm:$0xff] }
 0xf42   : > { %8723 = vmatmul.mubr.msk.f32.vlgmr.msra.gmra.mrb[24].mxu1 %vm783_vm4, %v2145_v37  ;;  %v9405_v37 = vpack.c.bf16 %v2667_v36, %v2666_v40 }
 0xf43   : > { %8736 = vmatprep.mubr.msk.f32.mxu1 %vm783_vm4, %v2151_v38  ;;  %v2894_v38 = vld [vmem:[%s11752_s2 + $0x30] sm:$0xff] }
 0xf67   : > { %v2128_v41 = vpop.xlane.xlu1 %2127 }
 0xf68   : > { %10105 = vrcp.f32 %v2128_v41  ;;  %v2895_v41 = vld [vmem:[%s11752_s2 + $0xb8] sm:$0xff] }
 0xf6b   : > { %v9862_v42 = vpop.permute.xlu1 %9861 }
 0xf6c   : > { %v9864_v44 = vunpack.i.h.bf16 %v9862_v42  ;;  %v9863_v45 = vunpack.i.l.bf16 %v9862_v42  ;;  %v9441_v42 = vpack.c.bf16 %v2895_v41, %v2894_v38 }
 0xf6e   : > { %v9389_v46 = vpack.c.bf16 %v9864_v44, %v9863_v45  ;;  %v2756_v44 = vld [vmem:[%s11753_s3 + $0xc0] sm:$0xff]  ;;  %v2757_v45 = vld [vmem:[%s11753_s3 + $0xc8] sm:$0xff] }
 0xf6f   : > { %v9409_v48 = vpack.c.bf16 %v2757_v45, %v2756_v44 }
 0xf70   : > { %9390 = vmatprep.subr.bf16.mxu1 %v9389_v46 }
 0xf71   : > { %9392 = vmatpush3.bf16.msra.mxu1 %v9389_v46  ;;  %v2758_v46 = vld [vmem:[%s11753_s3 + $0xd0] sm:$0xff] }
 0xf72   : > { %v10106_v52 = vpop.eup %10105  ;;  %9402 = vmatprep.subr.bf16.mxu1 %v9401_v35 }
 0xf73   : > { %v2147_v54 = vmul.f32 %v10106_v52, %v10090_v16  ;;  %v9413_v52 = vpack.c.bf16 %v2759_v51, %v2758_v46 }
 0xf74   : > { %8737 = vmatmul.mubr.msk.f32.vlgmr.msra.gmra.mrb[26].mxu1 %vm783_vm4, %v2153_v53  ;;  %v2760_v53 = vld [vmem:[%s11753_s3 + $0xe0] sm:$0xff] }
 0xf75   : > { %8729 = vmatprep.mubr.msk.f32.mxu0 %vm783_vm4, %v2147_v54  ;;  %9404 = vmatpush3.bf16.msra.mxu1 %v9401_v35  ;;  %v2761_v54 = vld [vmem:[%s11753_s3 + $0xe8] sm:$0xff] }
 0xf76   : > { %8730 = vmatmul.mubr.msk.f32.vlgmr.msra.gmra.mrb[14].mxu0 %vm783_vm4, %v2149_v55  ;;  %9406 = vmatprep.subr.bf16.mxu1 %v9405_v37  ;;  %v9417_v55 = vpack.c.bf16 %v2761_v54, %v2760_v53 }
 0xf77   : > { %9396 = vmatpush3.bf16.msra.mxu0 %v9393_v61  ;;  %v2765_v61 = vld [vmem:[%s11753_s3 + $0x108] sm:$0xff] }
 0xf78   : > { %9398 = vmatprep.subr.bf16.mxu0 %v9397_v3 }
 0xf79   : > { %9408 = vmatpush3.bf16.msra.mxu1 %v9405_v37 }
 0xf7a   : > { %9442 = vmatprep.subr.bf16.mxu1 %v9441_v42 }
 0xf7b   : > { %9400 = vmatpush3.bf16.msra.mxu0 %v9397_v3  ;;  %v2768_v3 = vld [vmem:[%s11753_s3 + $0x120] sm:$0xff] }
 0xf7c   : > { %9410 = vmatprep.subr.bf16.mxu0 %v9409_v48 }
 0xfaf   : > { %v8717_v56 = vpop.f32.mrb[22].mxu1 }
 0xfb0   : > { %v2232_v57 = vpop.f32.mrb[23].mxu1 }
0x1015   : > { %v8724_v62 = vpop.f32.mrb[24].mxu1 }
0x1016   : > { %2506 = vrot.lane.b32.xlu1 %v8724_v62, %s10286_s24  ;;  %v2319_v63 = vpop.f32.mrb[25].mxu1  ;;  %v9425_v62 = vpack.c.bf16 %v2765_v61, %v2764_v60 }
0x1017   : > { %2504 = vrot.lane.b32.xlu0 %v2319_v63, %s10286_s24  ;;  %v2766_v63 = vld [vmem:[%s11753_s3 + $0x110] sm:$0xff] }
0x1018   : > { %v9429_v1 = vpack.c.bf16 %v2767_v0, %v2766_v63 }
0x1047   : > { %v8738_v39 = vpop.f32.mrb[26].mxu1 }
0x1048   : > { %v2493_v4 = vpop.f32.mrb[27].mxu1 }
0x1049   : > { %v8731_v5 = vpop.f32.mrb[14].mxu0 }
0x104a   : > { %v2406_v6 = vpop.f32.mrb[15].mxu0  ;;  %2514 = vrot.lane.b32.xlu1 %v8731_v5, %s10287_s25 }
0x104b   : > { %2512 = vrot.lane.b32.xlu0 %v2406_v6, %s10287_s25 }
0x104e   : > { %2522 = vrot.lane.b32.xlu1 %v8738_v39, %s10288_s27  ;;  %v2769_v39 = vld [vmem:[%s11753_s3 + $0x128] sm:$0xff] }
0x104f   : > { %2520 = vrot.lane.b32.xlu0 %v2493_v4, %s10288_s27  ;;  %v9433_v4 = vpack.c.bf16 %v2769_v39, %v2768_v3 }
0x1088   : > { %v2507_v7 = vpop.permute.xlu1 %2506 }
0x1089   : > { %v2505_v8 = vpop.permute.xlu0 %2504  ;;  %v2527_v13 = vsel %vm438_vm2, %v8717_v56, %v2507_v7  ;;  %v2762_v56 = vld [vmem:[%s11753_s3 + $0xf0] sm:$0xff] }
0x108a   : > { %v2526_v11 = vsel %vm438_vm2, %v2232_v57, %v2505_v8  ;;  %v2763_v57 = vld [vmem:[%s11753_s3 + $0xf8] sm:$0xff] }
0x108b   : > { %v9421_v58 = vpack.c.bf16 %v2763_v57, %v2762_v56 }
0x10bc   : > { %v2515_v9 = vpop.permute.xlu1 %2514 }
0x10bd   : > { %v2513_v10 = vpop.permute.xlu0 %2512  ;;  %v2529_v27 = vsel %vm783_vm4, %v2527_v13, %v2515_v9 }
0x10be   : > { %v2528_v14 = vsel %vm783_vm4, %v2526_v11, %v2513_v10 }
0x10c0   : > { %v2523_v12 = vpop.permute.xlu1 %2522 }
0x10c1   : > { %v2521_v28 = vpop.permute.xlu0 %2520  ;;  %v2531_v16 = vsel %vm1248_vm5, %v2529_v27, %v2523_v12  ;;  %v7984_v12 = vld [vmem:[%s11754_s4 + $0xb] ss:$0 sm:$0xff] }
0x10c2   : > { %v2530_v15 = vsel %vm1248_vm5, %v2528_v14, %v2521_v28  ;;  %v7985_v14 = vld [vmem:[%s11754_s4 + $0xc] ss:$0 sm:$0xff] }
0x10c3   : > { %8747 = vmatprep.mubr.msk.f32.mxu0 %vm338_vm1, %v2530_v15 }
0x10c4   : > { %8748 = vmatmul.mubr.msk.f32.vlgmr.msra.gmra.mrb[16].mxu0 %vm338_vm1, %v2531_v16 }
0x10c5   : > { %9412 = vmatpush3.bf16.msra.mxu0 %v9409_v48 }
0x10c6   : > { %9414 = vmatprep.subr.bf16.mxu0 %v9413_v52 }
0x10c9   : > { %9416 = vmatpush3.bf16.msra.mxu0 %v9413_v52 }
0x10ca   : > { %9418 = vmatprep.subr.bf16.mxu0 %v9417_v55 }
0x10cd   : > { %9420 = vmatpush3.bf16.msra.mxu0 %v9417_v55 }
0x10ce   : > { %9422 = vmatprep.subr.bf16.mxu0 %v9421_v58 }
0x10d1   : > { %9424 = vmatpush3.bf16.msra.mxu0 %v9421_v58 }
0x10d2   : > { %9426 = vmatprep.subr.bf16.mxu0 %v9425_v62 }
0x10d5   : > { %9428 = vmatpush3.bf16.msra.mxu0 %v9425_v62 }
0x10d6   : > { %9430 = vmatprep.subr.bf16.mxu0 %v9429_v1 }
0x10d9   : > { %9432 = vmatpush3.bf16.msra.mxu0 %v9429_v1 }
0x10da   : > { %9434 = vmatprep.subr.bf16.mxu0 %v9433_v4 }
0x10dd   : > { %9436 = vmatpush3.bf16.msra.mxu0 %v9433_v4 }
0x1197   : > { %v8749_v17 = vpop.f32.mrb[16].mxu0 }
0x1198   : > { %v2619_v18 = vadd.f32 %v8749_v17, %v7981_v43  ;;  %v2613_v19 = vpop.f32.mrb[17].mxu0  ;;  %v2897_v17 = vld [vmem:[%s11752_s2 + $0x1c8] sm:$0xff] }
0x1199   : > { %v2614_v2 = vadd.f32 %v7981_v43, %v2613_v19  ;;  %v2896_v43 = vld [vmem:[%s11752_s2 + $0x140] sm:$0xff] }
0x119a   : > { %v2623_v59 = vadd.f32 %v2619_v18, %v10627_v50 }
0x119b   : > { %v2622_v20 = vadd.f32 %v2614_v2, %v10625_v49  ;;  %v9445_v2 = vpack.c.bf16 %v2897_v17, %v2896_v43 }
0x119c   : > { %v2627_v21 = vsel %vm338_vm1, %v2623_v59, 0.0 }
0x119d   : > { %2628 = vadd.xlane.f32.xlu1 %v2627_v21  ;;  %v2624_v22 = vsel %vm338_vm1, %v2622_v20, 0.0  ;;  %v2770_v21 = vld [vmem:[%s11753_s3 + $0x130] sm:$0xff] }
0x119e   : > { %2625 = vadd.xlane.f32.xlu0 %v2624_v22  ;;  %v2771_v22 = vld [vmem:[%s11753_s3 + $0x138] sm:$0xff] }
0x122a   : > { %v2629_v23 = vpop.xlane.xlu1 %2628 }
0x122b   : > { %v2631_v24 = vmul.f32 0.03125, %v2629_v23  ;;  %v2626_v25 = vpop.xlane.xlu0 %2625  ;;  %v9437_v23 = vpack.c.bf16 %v2771_v22, %v2770_v21 }
0x122c   : > { %v2630_v26 = vmul.f32 0.03125, %v2626_v25 }
0x122d   : > { %v10767_v29 = vsub.f32 %v2623_v59, %v2631_v24  ;;  %v10862_v59 = vld [vmem:[%s11751_s1] sm:$0xff]  ;;  %9438 = vmatprep.subr.bf16.mxu0 %v9437_v23  ;;  %v7986_v24 = vld [vmem:[%s11754_s4 + $0xd] ss:$0 sm:$0xff] }
0x122e   : > { %v10769_v30 = vsub.f32 %v2622_v20, %v2630_v26  ;;  %v10869_v20 = vld [vmem:[%s11751_s1 + $0x8] sm:$0xff]  ;;  %9440 = vmatpush3.bf16.msra.mxu0 %v9437_v23 }
0x122f   : > { %v2635_v49 = vmul.f32 %v10767_v29, %v10767_v29 }
0x1230   : > { %v2634_v31 = vmul.f32 %v10769_v30, %v10769_v30 }
0x1231   : > { %v2639_v32 = vsel %vm338_vm1, %v2635_v49, 0.0  ;;  %v7992_v49 = vld [vmem:[%s11754_s4 + $0x11] ss:$0 sm:$0xff] }
0x1232   : > { %v2636_v50 = vsel %vm338_vm1, %v2634_v31, 0.0 }
0x1233   : > { %2637 = vadd.xlane.f32.xlu0 %v2636_v50 }
0x1237   : > { %2640 = vadd.xlane.f32.xlu0 %v2639_v32 }
0x12c0   : > { %v2638_v5 = vpop.xlane.xlu0 %2637 }
0x12c1   : > { %v2642_v6 = vmul.f32 0.03125, %v2638_v5 }
0x12c3   : > { %v2644_v7 = vadd.f32 1e-05, %v2642_v6 }
0x12c4   : > { %v2641_v8 = vpop.xlane.xlu0 %2640 }
0x12c5   : > { %10107 = vrsqrt.f32 %v2644_v7  ;;  %v2643_v9 = vmul.f32 0.03125, %v2641_v8 }
0x12c7   : > { %v2645_v10 = vadd.f32 1e-05, %v2643_v9 }
0x12c9   : > { %10109 = vrsqrt.f32 %v2645_v10 }
0x12cf   : > { %v10108_v11 = vpop.eup %10107 }
0x12d0   : > { %v2648_v13 = vmul.f32 %v10108_v11, %v10769_v30 }
0x12d2   : > { %v2655_v28 = vmul.f32 %v7984_v12, %v2648_v13 }
0x12d3   : > { %v10110_v27 = vpop.eup %10109 }
0x12d4   : > { %v2649_v15 = vmul.f32 %v10110_v27, %v10767_v29  ;;  %v10845_v16 = vadd.f32 %v7985_v14, %v2655_v28 }
0x12d6   : > { %v2656_v18 = vmul.f32 %v7984_v12, %v2649_v15  ;;  %8758 = vmatprep.mubr.msk.f32.mxu1 %vm338_vm1, %v10845_v16 }
0x12d8   : > { %v10855_v19 = vadd.f32 %v7985_v14, %v2656_v18 }
0x12da   : > { %8759 = vmatmul.mubr.msk.f32.vlgmr.msra.gmra.mrb[28].mxu1 %vm338_vm1, %v10855_v19 }
0x12db   : > { %9444 = vmatpush3.bf16.msra.mxu1 %v9441_v42  ;;  %8804 = vmatprep.mubr.msk.f32.mxu1 %vm338_vm1, %v10862_v59 }
0x12dc   : > { %9446 = vmatprep.subr.bf16.mxu1 %v9445_v2 }
0x12df   : > { %9448 = vmatpush3.bf16.msra.mxu1 %v9445_v2 }
0x12e2   : > { %8805 = vmatmul.mubr.msk.f32.vlgmr.msra.gmra.mrb[30].mxu1 %vm338_vm1, %v10869_v20 }
0x13ad   : > { %v8760_v25 = vpop.f32.mrb[28].mxu1 }
0x13ae   : > { %v2751_v26 = vadd.f32 %v8760_v25, %v7986_v24  ;;  %v2745_v29 = vpop.f32.mrb[29].mxu1 }
0x13af   : > { %v2746_v30 = vadd.f32 %v7986_v24, %v2745_v29 }
0x13b0   : > { %v2755_v50 = vmax.f32 %v2751_v26, 0.0 }
0x13b1   : > { %v2754_v31 = vmax.f32 %v2746_v30, 0.0 }
0x13b3   : > { %8793 = vmatprep.mubr.f32.mxu0 %v2754_v31 }
0x13b4   : > { %8794 = vmatmul.mubr.f32.vlgmr.msra.gmra.mrb[18].mxu0 %v2755_v50 }
0x13b5   : > { %v8806_v32 = vpop.f32.mrb[30].mxu1 }
0x13b6   : > { %v2981_v33 = vadd.f32 %v8806_v32, %v7992_v49  ;;  %v2975_v34 = vpop.f32.mrb[31].mxu1 }
0x13b7   : > { %v2976_v40 = vadd.f32 %v7992_v49, %v2975_v34 }
0x13b8   : > { %2988 = vrot.lane.b32.xlu0 %v2981_v33, %s10282_s11 }
0x13b9   : > { %2986 = vrot.lane.b32.xlu1 %v2976_v40, %s10282_s11  ;;  %8811 = vmatprep.mubr.msk.f32.mxu1 %vm438_vm2, %v2976_v40  ;;  %v10890_v35 = vpack.i.bf16 %v2981_v33, %v2976_v40 }
0x13bc   : > { %2994 = vrot.lane.b32.xlu0 %v2976_v40, %s10283_s12 }
0x13bd   : > { %2992 = vrot.lane.b32.xlu1 %v2981_v33, %s10281_s10 }
0x13c0   : > { %9866 = vrot.lane.b32.xlu0 %v10890_v35, %s10284_s13 }
0x13c1   : > { %2990 = vrot.lane.b32.xlu1 %v2976_v40, %s10281_s10 }
0x13c5   : > { %2996 = vrot.lane.b32.xlu1 %v2981_v33, %s10283_s12 }
0x142a   : > { %v2989_v36 = vpop.permute.xlu0 %2988 }
0x142b   : > { %v2987_v37 = vpop.permute.xlu1 %2986 }
0x142c   : > { %v10896_v38 = vpack.i.bf16 %v2989_v36, %v2987_v37 }
0x142e   : > { %v2995_v41 = vpop.permute.xlu0 %2994  ;;  %9871 = vrot.lane.b32.xlu1 %v10896_v38, %s10284_s13 }
0x142f   : > { %v2993_v42 = vpop.permute.xlu1 %2992  ;;  %8832 = vmatprep.mubr.msk.f32.mxu0 %vm438_vm2, %v2995_v41 }
0x1432   : > { %v9867_v44 = vpop.permute.xlu0 %9866 }
0x1433   : > { %v9869_v45 = vunpack.i.h.bf16 %v9867_v44  ;;  %v9868_v46 = vunpack.i.l.bf16 %v9867_v44  ;;  %v2991_v48 = vpop.permute.xlu1 %2990 }
0x1434   : > { %v10901_v51 = vpack.i.bf16 %v2993_v42, %v2991_v48 }
0x1435   : > { %v9449_v52 = vpack.c.bf16 %v9869_v45, %v9868_v46 }
0x1436   : > { %9876 = vrot.lane.b32.xlu0 %v10901_v51, %s10284_s13 }
0x1437   : > { %9451 = vmatprep.subr.msk.bf16.mxu1 %vm10419_vm3, %v9449_v52  ;;  %v2997_v53 = vpop.permute.xlu1 %2996 }
0x1438   : > { %9454 = vmatpush3.bf16.xpose.msk.msra.mxu1 %vm10419_vm3, %v9449_v52  ;;  %v10909_v54 = vpack.i.bf16 %v2997_v53, %v2995_v41 }
0x143a   : > { %9881 = vrot.lane.b32.xlu1 %v10909_v54, %s10284_s13 }
0x143f   : > { %8812 = vmatmul.mubr.msk.f32.vlgmr.msra.gmra.mrb[32].mxu1 %vm438_vm2, %v2981_v33 }
0x1440   : > { %8818 = vmatprep.mubr.msk.f32.mxu1 %vm438_vm2, %v2987_v37 }
0x1487   : > { %v10915_v55 = vpop.f32.mrb[18].mxu0 }
0x1488   : > { %v10917_v56 = vpop.f32.mrb[19].mxu0 }
0x14a0   : > { %v9872_v57 = vpop.permute.xlu1 %9871 }
0x14a1   : > { %v9874_v58 = vunpack.i.h.bf16 %v9872_v57  ;;  %v9873_v60 = vunpack.i.l.bf16 %v9872_v57 }
0x14a3   : > { %v9455_v61 = vpack.c.bf16 %v9874_v58, %v9873_v60 }
0x14a5   : > { %9457 = vmatprep.subr.msk.bf16.mxu1 %vm10419_vm3, %v9455_v61 }
0x14a6   : > { %9460 = vmatpush3.bf16.xpose.msk.msra.mxu1 %vm10419_vm3, %v9455_v61 }
0x14a8   : > { %v9877_v62 = vpop.permute.xlu0 %9876 }
0x14a9   : > { %v9879_v63 = vunpack.i.h.bf16 %v9877_v62  ;;  %v9878_v0 = vunpack.i.l.bf16 %v9877_v62 }
0x14ab   : > { %v9461_v1 = vpack.c.bf16 %v9879_v63, %v9878_v0 }
0x14ac   : > { %v9882_v3 = vpop.permute.xlu1 %9881 }
0x14ad   : > { %v9884_v39 = vunpack.i.h.bf16 %v9882_v3  ;;  %v9883_v4 = vunpack.i.l.bf16 %v9882_v3  ;;  %8819 = vmatmul.mubr.msk.f32.vlgmr.msra.gmra.mrb[34].mxu1 %vm438_vm2, %v2989_v36  ;;  %9463 = vmatprep.subr.msk.bf16.mxu1 %vm10419_vm3, %v9461_v1 }
0x14ae   : > { %9466 = vmatpush3.bf16.xpose.msk.msra.mxu1 %vm10419_vm3, %v9461_v1  ;;  %8825 = vmatprep.mubr.msk.f32.mxu1 %vm438_vm2, %v2991_v48 }
0x14af   : > { %v9467_v5 = vpack.c.bf16 %v9884_v39, %v9883_v4 }
0x14b1   : > { %9469 = vmatprep.subr.msk.bf16.mxu0 %vm10419_vm3, %v9467_v5 }
0x14b2   : > { %9472 = vmatpush3.bf16.xpose.msk.msra.mxu0 %vm10419_vm3, %v9467_v5 }
0x14b5   : > { %8826 = vmatmul.mubr.msk.f32.vlgmr.msra.gmra.mrb[36].mxu1 %vm438_vm2, %v2993_v42 }
0x14b9   : > { %8833 = vmatmul.mubr.msk.f32.vlgmr.msra.gmra.mrb[20].mxu0 %vm438_vm2, %v2997_v53 }
0x1512   : > { %v8813_v6 = vpop.f32.mrb[32].mxu1 }
0x1513   : > { %v3076_v7 = vpop.f32.mrb[33].mxu1  ;;  %v3349_v8 = vsel %vm783_vm4, %v8813_v6, -inf }
0x1514   : > { %3350 = vmax.xlane.f32.xlu1 %v3349_v8  ;;  %v3346_v9 = vsel %vm783_vm4, %v3076_v7, -inf }
0x1515   : > { %3347 = vmax.xlane.f32.xlu0 %v3346_v9 }
0x1580   : > { %v8820_v10 = vpop.f32.mrb[34].mxu1 }
0x1581   : > { %v3163_v11 = vpop.f32.mrb[35].mxu1  ;;  %v3355_v12 = vsel %vm783_vm4, %v8820_v10, -inf }
0x1582   : > { %3356 = vmax.xlane.f32.xlu0 %v3355_v12  ;;  %v3352_v13 = vsel %vm783_vm4, %v3163_v11, -inf }
0x1586   : > { %3353 = vmax.xlane.f32.xlu0 %v3352_v13 }
0x1588   : > { %v8827_v14 = vpop.f32.mrb[36].mxu1 }
0x1589   : > { %v10939_v28 = vpop.f32.mrb[37].mxu1  ;;  %v3361_v27 = vsel %vm783_vm4, %v8827_v14, -inf }
0x158a   : > { %3362 = vmax.xlane.f32.xlu0 %v3361_v27  ;;  %v3358_v2 = vsel %vm783_vm4, %v10939_v28, -inf }
0x158c   : > { %v8834_v15 = vpop.f32.mrb[20].mxu0 }
0x158d   : > { %v3337_v43 = vpop.f32.mrb[21].mxu0  ;;  %v3367_v17 = vsel %vm783_vm4, %v8834_v15, -inf }
0x158e   : > { %3368 = vmax.xlane.f32.xlu0 %v3367_v17  ;;  %v3364_v18 = vsel %vm783_vm4, %v3337_v43, -inf }
0x158f   : > { %3365 = vmax.xlane.f32.xlu1 %v3364_v18 }
0x1593   : > { %3359 = vmax.xlane.f32.xlu1 %v3358_v2 }
0x15a1   : > { %v3351_v21 = vpop.xlane.xlu1 %3350 }
0x15a2   : > { %v3371_v22 = vsub.f32 %v8813_v6, %v3351_v21  ;;  %v3348_v24 = vpop.xlane.xlu0 %3347 }
0x15a3   : > { %v3370_v29 = vsub.f32 %v3076_v7, %v3348_v24 }
0x15a4   : > { %v3380_v23 = vmul.f32 1.442695, %v3371_v22  ;;  %9886 = vrot.lane.b32.xlu1 %v10890_v35, %s10285_s14 }
0x15a5   : > { %v3378_v30 = vmul.f32 1.442695, %v3370_v29 }
0x15a6   : > { %10111 = vpow2.f32 %v3380_v23 }
0x15a7   : > { %10113 = vpow2.f32 %v3378_v30 }
0x15b0   : > { %v10948_v25 = vpop.eup %10111 }
0x15b1   : > { %v3397_v26 = vsel %vm783_vm4, %v10948_v25, 0.0  ;;  %v10114_v31 = vpop.eup %10113 }
0x15b2   : > { %3398 = vadd.xlane.f32.xlu0 %v3397_v26  ;;  %v3394_v50 = vsel %vm783_vm4, %v10114_v31, 0.0 }
0x15c8   : > { %3395 = vadd.xlane.f32.xlu1 %v3394_v50 }
0x160f   : > { %v3357_v49 = vpop.xlane.xlu0 %3356 }
0x1610   : > { %v3373_v32 = vsub.f32 %v8820_v10, %v3357_v49 }
0x1612   : > { %v3384_v33 = vmul.f32 1.442695, %v3373_v32 }
0x1613   : > { %v3354_v34 = vpop.xlane.xlu0 %3353 }
0x1614   : > { %10115 = vpow2.f32 %v3384_v33  ;;  %v3372_v40 = vsub.f32 %v3163_v11, %v3354_v34 }
0x1616   : > { %v3382_v35 = vmul.f32 1.442695, %v3372_v40 }
0x1617   : > { %v3363_v36 = vpop.xlane.xlu0 %3362 }
0x1618   : > { %10117 = vpow2.f32 %v3382_v35  ;;  %v3375_v37 = vsub.f32 %v8827_v14, %v3363_v36 }
0x161a   : > { %v3388_v48 = vmul.f32 1.442695, %v3375_v37 }
0x161b   : > { %v3369_v41 = vpop.xlane.xlu0 %3368 }
0x161c   : > { %v3377_v42 = vsub.f32 %v8834_v15, %v3369_v41  ;;  %v3366_v44 = vpop.xlane.xlu1 %3365 }
0x161d   : > { %v3376_v45 = vsub.f32 %v3337_v43, %v3366_v44 }
0x161e   : > { %v10953_v46 = vpop.eup %10115  ;;  %v3392_v52 = vmul.f32 1.442695, %v3377_v42 }
0x161f   : > { %v3390_v53 = vmul.f32 1.442695, %v3376_v45  ;;  %v3403_v57 = vsel %vm783_vm4, %v10953_v46, 0.0 }
0x1620   : > { %10119 = vpow2.f32 %v3392_v52  ;;  %3404 = vadd.xlane.f32.xlu0 %v3403_v57  ;;  %v3360_v58 = vpop.xlane.xlu1 %3359  ;;  %v3813_v57 = vld [vmem:[%s11752_s2 + $0xc0] sm:$0xff] }
0x1621   : > { %10121 = vpow2.f32 %v3390_v53  ;;  %v3374_v8 = vsub.f32 %v10939_v28, %v3360_v58  ;;  %v3812_v53 = vld [vmem:[%s11752_s2 + $0x38] sm:$0xff] }
0x1622   : > { %v10118_v60 = vpop.eup %10117  ;;  %10123 = vpow2.f32 %v3388_v48  ;;  %v9489_v58 = vpack.c.bf16 %v3813_v57, %v3812_v53 }
0x1623   : > { %v3400_v61 = vsel %vm783_vm4, %v10118_v60, 0.0  ;;  %v3386_v9 = vmul.f32 1.442695, %v3374_v8 }
0x1624   : > { %3401 = vadd.xlane.f32.xlu1 %v3400_v61  ;;  %v9887_v62 = vpop.permute.xlu1 %9886 }
0x1625   : > { %v9889_v63 = vunpack.i.h.bf16 %v9887_v62  ;;  %v9888_v0 = vunpack.i.l.bf16 %v9887_v62  ;;  %10125 = vpow2.f32 %v3386_v9  ;;  %v3814_v62 = vld [vmem:[%s11752_s2 + $0x148] sm:$0xff] }
0x1627   : > { %v9473_v1 = vpack.c.bf16 %v9889_v63, %v9888_v0  ;;  %v3815_v63 = vld [vmem:[%s11752_s2 + $0x1d0] sm:$0xff] }
0x1628   : > { %v9493_v0 = vpack.c.bf16 %v3815_v63, %v3814_v62  ;;  %v3944_v63 = vld [vmem:[%s11752_s2 + $0x40] sm:$0xff] }
0x1629   : > { %9474 = vmatprep.subr.bf16.mxu1 %v9473_v1 }
0x162a   : > { %v10958_v3 = vpop.eup %10119  ;;  %9476 = vmatpush3.bf16.msra.mxu1 %v9473_v1 }
0x162b   : > { %v10122_v39 = vpop.eup %10121  ;;  %v3415_v4 = vsel %vm783_vm4, %v10958_v3, 0.0 }
0x162c   : > { %v10962_v5 = vpop.eup %10123  ;;  %3416 = vadd.xlane.f32.xlu0 %v3415_v4  ;;  %v3412_v6 = vsel %vm783_vm4, %v10122_v39, 0.0 }
0x162d   : > { %3413 = vadd.xlane.f32.xlu1 %v3412_v6  ;;  %v3409_v7 = vsel %vm783_vm4, %v10962_v5, 0.0 }
0x162f   : > { %v10126_v12 = vpop.eup %10125 }
0x1630   : > { %3410 = vadd.xlane.f32.xlu0 %v3409_v7  ;;  %v3406_v27 = vsel %vm783_vm4, %v10126_v12, 0.0 }
0x163e   : > { %9896 = vrot.lane.b32.xlu1 %v10901_v51, %s10285_s14 }
0x163f   : > { %v3399_v10 = vpop.xlane.xlu0 %3398 }
0x1640   : > { %10127 = vrcp.f32 %v3399_v10 }
0x1646   : > { %9891 = vrot.lane.b32.xlu0 %v10896_v38, %s10285_s14 }
0x164a   : > { %v10128_v13 = vpop.eup %10127 }
0x164b   : > { %v3421_v51 = vmul.f32 %v10128_v13, %v10948_v25 }
0x1655   : > { %v3396_v11 = vpop.xlane.xlu1 %3395 }
0x1656   : > { %10129 = vrcp.f32 %v3396_v11 }
0x1660   : > { %v10130_v14 = vpop.eup %10129 }
0x1661   : > { %v3419_v15 = vmul.f32 %v10130_v14, %v10114_v31 }
0x1662   : > { %3407 = vadd.xlane.f32.xlu1 %v3406_v27 }
0x1663   : > { %8839 = vmatprep.mubr.msk.f32.mxu1 %vm783_vm4, %v3419_v15 }
0x1664   : > { %8840 = vmatmul.mubr.msk.f32.vlgmr.msra.gmra.mrb[38].mxu1 %vm783_vm4, %v3421_v51 }
0x1673   : > { %9901 = vrot.lane.b32.xlu1 %v10909_v54, %s10285_s14 }
0x16ad   : > { %v3405_v28 = vpop.xlane.xlu0 %3404 }
0x16b1   : > { %v3402_v38 = vpop.xlane.xlu1 %3401 }
0x16b2   : > { %10131 = vrcp.f32 %v3402_v38 }
0x16b3   : > { %10133 = vrcp.f32 %v3405_v28 }
0x16b9   : > { %v3417_v43 = vpop.xlane.xlu0 %3416 }
0x16ba   : > { %v3414_v17 = vpop.xlane.xlu1 %3413 }
0x16bb   : > { %10135 = vrcp.f32 %v3414_v17 }
0x16bc   : > { %v10132_v18 = vpop.eup %10131  ;;  %10137 = vrcp.f32 %v3417_v43 }
0x16bd   : > { %v3411_v2 = vpop.xlane.xlu0 %3410  ;;  %v3423_v21 = vmul.f32 %v10132_v18, %v10118_v60  ;;  %v10134_v31 = vpop.eup %10133 }
0x16be   : > { %v9897_v22 = vpop.permute.xlu1 %9896  ;;  %v3425_v49 = vmul.f32 %v10134_v31, %v10953_v46  ;;  %10139 = vrcp.f32 %v3411_v2 }
0x16bf   : > { %v9899_v23 = vunpack.i.h.bf16 %v9897_v22  ;;  %v9898_v24 = vunpack.i.l.bf16 %v9897_v22  ;;  %8846 = vmatprep.mubr.msk.f32.mxu1 %vm783_vm4, %v3423_v21 }
0x16c1   : > { %v9892_v25 = vpop.permute.xlu0 %9891  ;;  %v9481_v26 = vpack.c.bf16 %v9899_v23, %v9898_v24 }
0x16c2   : > { %v9894_v29 = vunpack.i.h.bf16 %v9892_v25  ;;  %v9893_v30 = vunpack.i.l.bf16 %v9892_v25 }
0x16c3   : > { %9482 = vmatprep.subr.bf16.mxu0 %v9481_v26 }
0x16c4   : > { %9484 = vmatpush3.bf16.msra.mxu0 %v9481_v26  ;;  %v9477_v54 = vpack.c.bf16 %v9894_v29, %v9893_v30  ;;  %v8019_v26 = vld [vmem:[%s11754_s4 + $0x12] ss:$0 sm:$0xff] }
0x16c5   : > { %v10136_v50 = vpop.eup %10135  ;;  %9490 = vmatprep.subr.bf16.mxu0 %v9489_v58 }
0x16c6   : > { %9478 = vmatprep.subr.bf16.mxu1 %v9477_v54  ;;  %v3431_v32 = vmul.f32 %v10136_v50, %v10122_v39  ;;  %v10138_v37 = vpop.eup %10137 }
0x16c7   : > { %9480 = vmatpush3.bf16.msra.mxu1 %v9477_v54  ;;  %v3433_v44 = vmul.f32 %v10138_v37, %v10958_v3 }
0x16c8   : > { %v10140_v41 = vpop.eup %10139 }
0x16c9   : > { %v3429_v46 = vmul.f32 %v10140_v41, %v10962_v5  ;;  %v7989_v5 = vld [vmem:[%s11754_s4 + $0xe] ss:$0 sm:$0xff] }
0x16ca   : > { %8847 = vmatmul.mubr.msk.f32.vlgmr.msra.gmra.mrb[40].mxu1 %vm783_vm4, %v3425_v49  ;;  %v2844_v6 = vadd.f32 %v7989_v5, %v10917_v56  ;;  %v2849_v7 = vadd.f32 %v10915_v55, %v7989_v5 }
0x16cb   : > { %8860 = vmatprep.mubr.msk.f32.mxu1 %vm783_vm4, %v3431_v32 }
0x16cc   : > { %v2852_v8 = vadd.f32 %v2844_v6, %v10845_v16  ;;  %v2853_v9 = vadd.f32 %v2849_v7, %v10855_v19  ;;  %v8024_v7 = vld [vmem:[%s11754_s4 + $0x15] ss:$0 sm:$0xff] }
0x16ce   : > { %v2854_v10 = vsel %vm338_vm1, %v2852_v8, 0.0  ;;  %v2857_v11 = vsel %vm338_vm1, %v2853_v9, 0.0 }
0x16ef   : > { %v3408_v33 = vpop.xlane.xlu1 %3407 }
0x16f0   : > { %10141 = vrcp.f32 %v3408_v33 }
0x16f3   : > { %v9902_v34 = vpop.permute.xlu1 %9901 }
0x16f4   : > { %v9904_v40 = vunpack.i.h.bf16 %v9902_v34  ;;  %v9903_v35 = vunpack.i.l.bf16 %v9902_v34 }
0x16f6   : > { %v9485_v36 = vpack.c.bf16 %v9904_v40, %v9903_v35  ;;  %v11032_v35 = vld [vmem:[%s11754_s4 + $0xf] ss:$0 sm:$0xff] }
0x16f8   : > { %9486 = vmatprep.subr.bf16.mxu1 %v9485_v36 }
0x16f9   : > { %9488 = vmatpush3.bf16.msra.mxu1 %v9485_v36 }
0x16fa   : > { %v10142_v42 = vpop.eup %10141 }
0x16fb   : > { %v3427_v45 = vmul.f32 %v10142_v42, %v10126_v12 }
0x16fc   : > { %8861 = vmatmul.mubr.msk.f32.vlgmr.msra.gmra.mrb[42].mxu1 %vm783_vm4, %v3433_v44 }
0x16fd   : > { %8853 = vmatprep.mubr.msk.f32.mxu0 %vm783_vm4, %v3427_v45 }
0x16fe   : > { %8854 = vmatmul.mubr.msk.f32.vlgmr.msra.gmra.mrb[22].mxu0 %vm783_vm4, %v3429_v46 }
0x16ff   : > { %9492 = vmatpush3.bf16.msra.mxu0 %v9489_v58 }
0x1700   : > { %9494 = vmatprep.subr.bf16.mxu0 %v9493_v0 }
0x1703   : > { %9496 = vmatpush3.bf16.msra.mxu0 %v9493_v0  ;;  %v3945_v0 = vld [vmem:[%s11752_s2 + $0xc8] sm:$0xff] }
0x1704   : > { %v9497_v5 = vpack.c.bf16 %v3945_v0, %v3944_v63 }
0x1706   : > { %9498 = vmatprep.subr.bf16.mxu1 %v9497_v5 }
0x1707   : > { %9500 = vmatpush3.bf16.msra.mxu1 %v9497_v5 }
0x1737   : > { %v8841_v48 = vpop.f32.mrb[38].mxu1 }
0x1738   : > { %v3512_v52 = vpop.f32.mrb[39].mxu1 }
0x179d   : > { %v8848_v60 = vpop.f32.mrb[40].mxu1 }
0x179e   : > { %3786 = vrot.lane.b32.xlu1 %v8848_v60, %s10286_s24  ;;  %v3599_v61 = vpop.f32.mrb[41].mxu1 }
0x179f   : > { %3784 = vrot.lane.b32.xlu0 %v3599_v61, %s10286_s24 }
0x17cf   : > { %v8862_v1 = vpop.f32.mrb[42].mxu1 }
0x17d0   : > { %v3773_v3 = vpop.f32.mrb[43].mxu1 }
0x17d1   : > { %v8855_v39 = vpop.f32.mrb[22].mxu0 }
0x17d2   : > { %v3686_v4 = vpop.f32.mrb[23].mxu0  ;;  %3794 = vrot.lane.b32.xlu1 %v8855_v39, %s10287_s25  ;;  %v3947_v39 = vld [vmem:[%s11752_s2 + $0x1d8] sm:$0xff] }
0x17d3   : > { %3792 = vrot.lane.b32.xlu0 %v3686_v4, %s10287_s25 }
0x17d6   : > { %3802 = vrot.lane.b32.xlu1 %v8862_v1, %s10288_s27  ;;  %v9905_v1 = vpack.i.bf16 %v3945_v0, %v3944_v63 }
0x17d7   : > { %3800 = vrot.lane.b32.xlu0 %v3773_v3, %s10288_s27  ;;  %v3946_v3 = vld [vmem:[%s11752_s2 + $0x150] sm:$0xff] }
0x17d8   : > { %v9910_v4 = vpack.i.bf16 %v3947_v39, %v3946_v3  ;;  %v9501_v6 = vpack.c.bf16 %v3947_v39, %v3946_v3 }
0x17da   : > { %9502 = vmatprep.subr.bf16.mxu1 %v9501_v6 }
0x17db   : > { %9504 = vmatpush3.bf16.msra.mxu1 %v9501_v6 }
0x17f6   : > { %2855 = vadd.xlane.f32.xlu0 %v2854_v10 }
0x17fa   : > { %2858 = vadd.xlane.f32.xlu1 %v2857_v11 }
0x1810   : > { %v3787_v12 = vpop.permute.xlu1 %3786 }
0x1811   : > { %v3785_v13 = vpop.permute.xlu0 %3784  ;;  %v3807_v56 = vsel %vm438_vm2, %v8841_v48, %v3787_v12 }
0x1812   : > { %v3806_v15 = vsel %vm438_vm2, %v3512_v52, %v3785_v13 }
0x1844   : > { %v3795_v14 = vpop.permute.xlu1 %3794 }
0x1845   : > { %v3793_v27 = vpop.permute.xlu0 %3792  ;;  %v3809_v19 = vsel %vm783_vm4, %v3807_v56, %v3795_v14 }
0x1846   : > { %v3808_v55 = vsel %vm783_vm4, %v3806_v15, %v3793_v27 }
0x1848   : > { %v3803_v51 = vpop.permute.xlu1 %3802 }
0x1849   : > { %v3801_v16 = vpop.permute.xlu0 %3800  ;;  %v3811_v28 = vsel %vm1248_vm5, %v3809_v19, %v3803_v51 }
0x184a   : > { %v3810_v38 = vsel %vm1248_vm5, %v3808_v55, %v3801_v16 }
0x184b   : > { %8871 = vmatprep.mubr.msk.f32.mxu0 %vm338_vm1, %v3810_v38 }
0x184c   : > { %8872 = vmatmul.mubr.msk.f32.vlgmr.msra.gmra.mrb[24].mxu0 %vm338_vm1, %v3811_v28 }
0x1883   : > { %v2856_v43 = vpop.xlane.xlu0 %2855 }
0x1884   : > { %v2860_v17 = vmul.f32 0.03125, %v2856_v43 }
0x1886   : > { %v2862_v18 = vsub.f32 %v2852_v8, %v2860_v17 }
0x1887   : > { %v2859_v22 = vpop.xlane.xlu1 %2858 }
0x1888   : > { %v2864_v2 = vmul.f32 %v2862_v18, %v2862_v18  ;;  %v2861_v54 = vmul.f32 0.03125, %v2859_v22 }
0x188a   : > { %v2866_v21 = vsel %vm338_vm1, %v2864_v2, 0.0  ;;  %v2863_v32 = vsub.f32 %v2853_v9, %v2861_v54 }
0x188b   : > { %2867 = vadd.xlane.f32.xlu1 %v2866_v21 }
0x188c   : > { %v2865_v41 = vmul.f32 %v2863_v32, %v2863_v32 }
0x188e   : > { %v2869_v44 = vsel %vm338_vm1, %v2865_v41, 0.0 }
0x1918   : > { %v2868_v23 = vpop.xlane.xlu1 %2867 }
0x1919   : > { %v2872_v24 = vmul.f32 0.03125, %v2868_v23  ;;  %v8022_v23 = vld [vmem:[%s11754_s4 + $0x13] ss:$0 sm:$0xff] }
0x191b   : > { %v2874_v25 = vadd.f32 1e-05, %v2872_v24 }
0x191d   : > { %10143 = vrsqrt.f32 %v2874_v25  ;;  %v8023_v25 = vld [vmem:[%s11754_s4 + $0x14] ss:$0 sm:$0xff] }
0x191f   : > { %v8873_v29 = vpop.f32.mrb[24].mxu0 }
0x1920   : > { %v3893_v30 = vpop.f32.mrb[25].mxu0  ;;  %v3899_v31 = vadd.f32 %v8873_v29, %v8019_v26 }
0x1921   : > { %v3894_v50 = vadd.f32 %v8019_v26, %v3893_v30 }
0x1922   : > { %v3903_v33 = vadd.f32 %v10869_v20, %v3899_v31 }
0x1923   : > { %v3902_v49 = vadd.f32 %v10862_v59, %v3894_v50  ;;  %v11038_v59 = vld [vmem:[%s11754_s4 + $0x10] ss:$0 sm:$0xff] }
0x1924   : > { %v3907_v37 = vsel %vm338_vm1, %v3903_v33, 0.0 }
0x1925   : > { %v3904_v34 = vsel %vm338_vm1, %v3902_v49, 0.0 }
0x1926   : > { %3905 = vadd.xlane.f32.xlu0 %v3904_v34 }
0x1927   : > { %v10144_v40 = vpop.eup %10143 }
0x1928   : > { %v2878_v36 = vmul.f32 %v10144_v40, %v2862_v18 }
0x192a   : > { %3908 = vadd.xlane.f32.xlu0 %v3907_v37  ;;  %v2885_v20 = vmul.f32 %v11032_v35, %v2878_v36 }
0x192c   : > { %v11042_v42 = vadd.f32 %v11038_v59, %v2885_v20 }
0x192e   : > { %2870 = vadd.xlane.f32.xlu0 %v2869_v44  ;;  %8893 = vmatprep.mubr.msk.f32.mxu0 %vm338_vm1, %v11042_v42 }
0x19b3   : > { %v3906_v45 = vpop.xlane.xlu0 %3905 }
0x19b4   : > { %v3910_v46 = vmul.f32 0.03125, %v3906_v45 }
0x19b6   : > { %v3912_v48 = vsub.f32 %v3902_v49, %v3910_v46 }
0x19b7   : > { %v3909_v52 = vpop.xlane.xlu0 %3908 }
0x19b8   : > { %v3911_v53 = vmul.f32 0.03125, %v3909_v52  ;;  %v3914_v57 = vmul.f32 %v3912_v48, %v3912_v48 }
0x19ba   : > { %v3913_v58 = vsub.f32 %v3903_v33, %v3911_v53  ;;  %v3916_v60 = vsel %vm338_vm1, %v3914_v57, 0.0 }
0x19bb   : > { %3917 = vadd.xlane.f32.xlu1 %v3916_v60  ;;  %v2871_v8 = vpop.xlane.xlu0 %2870 }
0x19bc   : > { %v3915_v61 = vmul.f32 %v3913_v58, %v3913_v58  ;;  %v2873_v9 = vmul.f32 0.03125, %v2871_v8 }
0x19be   : > { %v3919_v62 = vsel %vm338_vm1, %v3915_v61, 0.0  ;;  %v2875_v10 = vadd.f32 1e-05, %v2873_v9 }
0x19bf   : > { %3920 = vadd.xlane.f32.xlu0 %v3919_v62 }
0x19c0   : > { %10145 = vrsqrt.f32 %v2875_v10 }
0x19ca   : > { %v10146_v14 = vpop.eup %10145 }
0x19cb   : > { %v2879_v16 = vmul.f32 %v10146_v14, %v2863_v32 }
0x19cc   : > { %9906 = vrot.lane.b32.xlu1 %v9905_v1, %s10284_s13 }
0x19cd   : > { %v2886_v2 = vmul.f32 %v11032_v35, %v2879_v16 }
0x19cf   : > { %v11069_v22 = vadd.f32 %v11038_v59, %v2886_v2 }
0x19d0   : > { %4051 = vrot.lane.b32.xlu1 %v8024_v7, %s10284_s13 }
0x19d5   : > { %9911 = vrot.lane.b32.xlu0 %v9910_v4, %s10284_s13 }
0x1a48   : > { %v3918_v11 = vpop.xlane.xlu1 %3917 }
0x1a49   : > { %v3922_v12 = vmul.f32 0.03125, %v3918_v11 }
0x1a4b   : > { %v3924_v13 = vadd.f32 1e-05, %v3922_v12 }
0x1a4c   : > { %v9907_v27 = vpop.permute.xlu1 %9906  ;;  %v3921_v15 = vpop.xlane.xlu0 %3920 }
0x1a4d   : > { %10147 = vrsqrt.f32 %v3924_v13  ;;  %v9909_v51 = vunpack.i.h.bf16 %v9907_v27  ;;  %v9908_v56 = vunpack.i.l.bf16 %v9907_v27  ;;  %v3923_v55 = vmul.f32 0.03125, %v3921_v15 }
0x1a4f   : > { %v3925_v19 = vadd.f32 1e-05, %v3923_v55  ;;  %v9505_v38 = vpack.c.bf16 %v9909_v51, %v9908_v56 }
0x1a50   : > { %v9912_v28 = vpop.permute.xlu0 %9911  ;;  %v4052_v49 = vpop.permute.xlu1 %4051 }
0x1a51   : > { %10149 = vrsqrt.f32 %v3925_v19  ;;  %v9914_v43 = vunpack.i.h.bf16 %v9912_v28  ;;  %v9913_v17 = vunpack.i.l.bf16 %v9912_v28  ;;  %9506 = vmatprep.subr.bf16.mxu0 %v9505_v38 }
0x1a52   : > { %9508 = vmatpush3.bf16.msra.mxu0 %v9505_v38 }
0x1a53   : > { %v9509_v18 = vpack.c.bf16 %v9914_v43, %v9913_v17 }
0x1a55   : > { %9510 = vmatprep.subr.bf16.mxu0 %v9509_v18 }
0x1a56   : > { %9512 = vmatpush3.bf16.msra.mxu0 %v9509_v18 }
0x1a57   : > { %v10148_v21 = vpop.eup %10147 }
0x1a58   : > { %v3928_v24 = vmul.f32 %v10148_v21, %v3912_v48 }
0x1a59   : > { %8894 = vmatmul.mubr.msk.f32.vlgmr.msra.gmra.mrb[26].mxu0 %vm338_vm1, %v11069_v22 }
0x1a5a   : > { %v3935_v26 = vmul.f32 %v8022_v23, %v3928_v24 }
0x1a5b   : > { %v10150_v29 = vpop.eup %10149 }
0x1a5c   : > { %v3929_v30 = vmul.f32 %v10150_v29, %v3913_v58  ;;  %v11079_v54 = vadd.f32 %v8023_v25, %v3935_v26 }
0x1a5e   : > { %v3936_v31 = vmul.f32 %v8022_v23, %v3929_v30  ;;  %8882 = vmatprep.mubr.msk.f32.mxu1 %vm338_vm1, %v11079_v54 }
0x1a60   : > { %v11083_v50 = vadd.f32 %v8023_v25, %v3936_v31 }
0x1a62   : > { %8883 = vmatmul.mubr.msk.f32.vlgmr.msra.gmra.mrb[44].mxu1 %vm338_vm1, %v11083_v50 }
0x1b2c   : > { %v8895_v32 = vpop.f32.mrb[26].mxu0 }
0x1b2d   : > { %v4132_v33 = vadd.f32 %v8895_v32, %v4052_v49  ;;  %v4126_v34 = vpop.f32.mrb[27].mxu0 }
0x1b2e   : > { %v4127_v40 = vadd.f32 %v4126_v34, %v4052_v49 }
0x1b30   : > { %v11087_v35 = vpack.i.bf16 %v4132_v33, %v4127_v40  ;;  %v9513_v36 = vpack.c.bf16 %v4132_v33, %v4127_v40 }
0x1b32   : > { %9921 = vrot.lane.b32.xlu0 %v11087_v35, %s10281_s10  ;;  %9916 = vrot.lane.b32.xlu1 %v11087_v35, %s10282_s11 }
0x1b33   : > { %9515 = vmatprep.subr.msk.bf16.mxu1 %vm10419_vm3, %v9513_v36 }
0x1b34   : > { %9518 = vmatpush3.bf16.xpose.msk.msra.mxu1 %vm10419_vm3, %v9513_v36 }
0x1b35   : > { %v8884_v37 = vpop.f32.mrb[44].mxu1 }
0x1b36   : > { %v4025_v41 = vpop.f32.mrb[45].mxu1  ;;  %9926 = vrot.lane.b32.xlu1 %v11087_v35, %s10283_s12  ;;  %v4031_v20 = vadd.f32 %v8884_v37, %v8024_v7 }
0x1b37   : > { %v4026_v59 = vadd.f32 %v8024_v7, %v4025_v41 }
0x1b39   : > { %8900 = vmatprep.mubr.msk.f32.mxu1 %vm438_vm2, %v4026_v59  ;;  %4137 = vrot.lane.b32.xlu0 %v4026_v59, %s10282_s11 }
0x1b3a   : > { %4139 = vrot.lane.b32.xlu1 %v4031_v20, %s10282_s11 }
0x1b3b   : > { %8901 = vmatmul.mubr.msk.f32.vlgmr.msra.gmra.mrb[46].mxu1 %vm438_vm2, %v4031_v20 }
0x1b3d   : > { %4141 = vrot.lane.b32.xlu0 %v4026_v59, %s10281_s10 }
0x1b3e   : > { %4143 = vrot.lane.b32.xlu1 %v4031_v20, %s10281_s10 }
0x1b41   : > { %4145 = vrot.lane.b32.xlu0 %v4026_v59, %s10283_s12 }
0x1b42   : > { %4147 = vrot.lane.b32.xlu1 %v4031_v20, %s10283_s12 }
0x1ba4   : > { %v11107_v44 = vpop.permute.xlu0 %9921  ;;  %v11109_v45 = vpop.permute.xlu1 %9916 }
0x1ba5   : > { %v9924_v46 = vunpack.i.h.bf16 %v11107_v44  ;;  %v9923_v48 = vunpack.i.l.bf16 %v11107_v44  ;;  %v9919_v52 = vunpack.i.h.bf16 %v11109_v45  ;;  %v9918_v53 = vunpack.i.l.bf16 %v11109_v45 }
0x1ba7   : > { %v9525_v57 = vpack.c.bf16 %v9924_v46, %v9923_v48  ;;  %v9519_v58 = vpack.c.bf16 %v9919_v52, %v9918_v53 }
0x1ba8   : > { %v11115_v60 = vpop.permute.xlu1 %9926 }
0x1ba9   : > { %v9929_v61 = vunpack.i.h.bf16 %v11115_v60  ;;  %v9928_v62 = vunpack.i.l.bf16 %v11115_v60  ;;  %9521 = vmatprep.subr.msk.bf16.mxu0 %vm10419_vm3, %v9519_v58  ;;  %9527 = vmatprep.subr.msk.bf16.mxu1 %vm10419_vm3, %v9525_v57 }
0x1baa   : > { %9524 = vmatpush3.bf16.xpose.msk.msra.mxu0 %vm10419_vm3, %v9519_v58  ;;  %9530 = vmatpush3.bf16.xpose.msk.msra.mxu1 %vm10419_vm3, %v9525_v57 }
0x1bab   : > { %v9531_v63 = vpack.c.bf16 %v9929_v61, %v9928_v62  ;;  %v4138_v0 = vpop.permute.xlu0 %4137 }
0x1bac   : > { %8907 = vmatprep.mubr.msk.f32.mxu0 %vm438_vm2, %v4138_v0  ;;  %v4140_v1 = vpop.permute.xlu1 %4139 }
0x1bad   : > { %9533 = vmatprep.subr.msk.bf16.mxu0 %vm10419_vm3, %v9531_v63 }
0x1baf   : > { %v4142_v3 = vpop.permute.xlu0 %4141 }
0x1bb0   : > { %v4144_v39 = vpop.permute.xlu1 %4143  ;;  %8914 = vmatprep.mubr.msk.f32.mxu1 %vm438_vm2, %v4142_v3 }
0x1bb1   : > { %8908 = vmatmul.mubr.msk.f32.vlgmr.msra.gmra.mrb[28].mxu0 %vm438_vm2, %v4140_v1  ;;  %8915 = vmatmul.mubr.msk.f32.vlgmr.msra.gmra.mrb[48].mxu1 %vm438_vm2, %v4144_v39 }
0x1bb2   : > { %9536 = vmatpush3.bf16.xpose.msk.msra.mxu0 %vm10419_vm3, %v9531_v63 }
0x1bb3   : > { %v4146_v4 = vpop.permute.xlu0 %4145 }
0x1bb4   : > { %8921 = vmatprep.mubr.msk.f32.mxu0 %vm438_vm2, %v4146_v4  ;;  %v4148_v5 = vpop.permute.xlu1 %4147 }
0x1bb9   : > { %8922 = vmatmul.mubr.msk.f32.vlgmr.msra.gmra.mrb[30].mxu0 %vm438_vm2, %v4148_v5 }
0x1c0e   : > { %v8902_v6 = vpop.f32.mrb[46].mxu1 }
0x1c0f   : > { %v4237_v7 = vpop.f32.mrb[47].mxu1  ;;  %v4498_v8 = vsel %vm783_vm4, %v8902_v6, -inf }
0x1c10   : > { %4499 = vmax.xlane.f32.xlu1 %v4498_v8  ;;  %v4495_v9 = vsel %vm783_vm4, %v4237_v7, -inf }
0x1c11   : > { %4496 = vmax.xlane.f32.xlu0 %v4495_v9 }
0x1c84   : > { %v8909_v10 = vpop.f32.mrb[28].mxu0  ;;  %v8916_v11 = vpop.f32.mrb[48].mxu1 }
0x1c85   : > { %v4320_v12 = vpop.f32.mrb[29].mxu0  ;;  %v4403_v13 = vpop.f32.mrb[49].mxu1  ;;  %v4504_v14 = vsel %vm783_vm4, %v8909_v10, -inf  ;;  %v4510_v55 = vsel %vm783_vm4, %v8916_v11, -inf }
0x1c86   : > { %4505 = vmax.xlane.f32.xlu0 %v4504_v14  ;;  %v4507_v27 = vsel %vm783_vm4, %v4403_v13, -inf  ;;  %v4501_v15 = vsel %vm783_vm4, %v4320_v12, -inf }
0x1c87   : > { %4508 = vmax.xlane.f32.xlu1 %v4507_v27 }
0x1c8a   : > { %4502 = vmax.xlane.f32.xlu0 %v4501_v15 }
0x1c8c   : > { %v8923_v51 = vpop.f32.mrb[30].mxu0 }
0x1c8d   : > { %v11142_v56 = vpop.f32.mrb[31].mxu0  ;;  %v4516_v19 = vsel %vm783_vm4, %v8923_v51, -inf }
0x1c8e   : > { %4511 = vmax.xlane.f32.xlu0 %v4510_v55  ;;  %v4513_v16 = vsel %vm783_vm4, %v11142_v56, -inf }
0x1c8f   : > { %4514 = vmax.xlane.f32.xlu1 %v4513_v16 }
0x1c92   : > { %4517 = vmax.xlane.f32.xlu0 %v4516_v19 }
0x1c9d   : > { %v4500_v38 = vpop.xlane.xlu1 %4499 }
0x1c9e   : > { %v4520_v28 = vsub.f32 %v8902_v6, %v4500_v38  ;;  %v4497_v17 = vpop.xlane.xlu0 %4496 }
0x1c9f   : > { %v4519_v21 = vsub.f32 %v4237_v7, %v4497_v17 }
0x1ca0   : > { %v4529_v43 = vmul.f32 1.442695, %v4520_v28  ;;  %9931 = vrot.lane.b32.xlu1 %v11087_v35, %s10284_s13 }
0x1ca1   : > { %v4527_v23 = vmul.f32 1.442695, %v4519_v21 }
0x1ca2   : > { %10151 = vpow2.f32 %v4529_v43 }
0x1ca3   : > { %10153 = vpow2.f32 %v4527_v23 }
0x1cac   : > { %v11150_v18 = vpop.eup %10151 }
0x1cad   : > { %v4546_v2 = vsel %vm783_vm4, %v11150_v18, 0.0  ;;  %v10154_v24 = vpop.eup %10153 }
0x1cae   : > { %4547 = vadd.xlane.f32.xlu0 %v4546_v2  ;;  %v4543_v25 = vsel %vm783_vm4, %v10154_v24, 0.0 }
0x1cc4   : > { %4544 = vadd.xlane.f32.xlu1 %v4543_v25 }
0x1d13   : > { %v4506_v26 = vpop.xlane.xlu0 %4505 }
0x1d14   : > { %v4522_v29 = vsub.f32 %v8909_v10, %v4506_v26  ;;  %v4509_v30 = vpop.xlane.xlu1 %4508 }
0x1d15   : > { %v4523_v49 = vsub.f32 %v4403_v13, %v4509_v30 }
0x1d16   : > { %v4533_v31 = vmul.f32 1.442695, %v4522_v29 }
0x1d17   : > { %v4503_v32 = vpop.xlane.xlu0 %4502  ;;  %v4535_v34 = vmul.f32 1.442695, %v4523_v49 }
0x1d18   : > { %10155 = vpow2.f32 %v4533_v31  ;;  %v4521_v33 = vsub.f32 %v4320_v12, %v4503_v32 }
0x1d1a   : > { %v4531_v40 = vmul.f32 1.442695, %v4521_v33 }
0x1d1b   : > { %v4512_v35 = vpop.xlane.xlu0 %4511 }
0x1d1c   : > { %10157 = vpow2.f32 %v4531_v40  ;;  %v4524_v36 = vsub.f32 %v8916_v11, %v4512_v35  ;;  %v4515_v37 = vpop.xlane.xlu1 %4514 }
0x1d1d   : > { %10159 = vpow2.f32 %v4535_v34  ;;  %v4525_v6 = vsub.f32 %v11142_v56, %v4515_v37 }
0x1d1e   : > { %v4537_v41 = vmul.f32 1.442695, %v4524_v36 }
0x1d1f   : > { %v4518_v59 = vpop.xlane.xlu0 %4517  ;;  %v4539_v8 = vmul.f32 1.442695, %v4525_v6 }
0x1d20   : > { %10161 = vpow2.f32 %v4537_v41  ;;  %v4526_v20 = vsub.f32 %v8923_v51, %v4518_v59  ;;  %v9932_v46 = vpop.permute.xlu1 %9931  ;;  %v4961_v59 = vld [vmem:[%s11752_s2 + $0x48] sm:$0xff] }
0x1d21   : > { %v9934_v48 = vunpack.i.h.bf16 %v9932_v46  ;;  %v9933_v52 = vunpack.i.l.bf16 %v9932_v46  ;;  %v4963_v46 = vld [vmem:[%s11752_s2 + $0x158] sm:$0xff] }
0x1d22   : > { %v11155_v53 = vpop.eup %10155  ;;  %v4541_v57 = vmul.f32 1.442695, %v4526_v20  ;;  %v4962_v20 = vld [vmem:[%s11752_s2 + $0xd0] sm:$0xff] }
0x1d23   : > { %v4552_v58 = vsel %vm783_vm4, %v11155_v53, 0.0  ;;  %v9537_v61 = vpack.c.bf16 %v9934_v48, %v9933_v52  ;;  %v9553_v48 = vpack.c.bf16 %v4962_v20, %v4961_v59  ;;  %v4964_v52 = vld [vmem:[%s11752_s2 + $0x1e0] sm:$0xff]  ;;  %v5194_v20 = vld [vmem:[%s11753_s3 + $0x188] sm:$0xff] }
0x1d24   : > { %10163 = vpow2.f32 %v4541_v57  ;;  %4553 = vadd.xlane.f32.xlu0 %v4552_v58  ;;  %v5193_v59 = vld [vmem:[%s11753_s3 + $0x180] sm:$0xff] }
0x1d25   : > { %9538 = vmatprep.subr.bf16.mxu1 %v9537_v61 }
0x1d26   : > { %v10158_v62 = vpop.eup %10157  ;;  %9540 = vmatpush3.bf16.msra.mxu1 %v9537_v61 }
0x1d27   : > { %v4549_v63 = vsel %vm783_vm4, %v10158_v62, 0.0  ;;  %v10160_v0 = vpop.eup %10159 }
0x1d28   : > { %4550 = vadd.xlane.f32.xlu1 %v4549_v63  ;;  %v4555_v39 = vsel %vm783_vm4, %v10160_v0, 0.0 }
0x1d2a   : > { %v10162_v1 = vpop.eup %10161 }
0x1d2b   : > { %v4558_v3 = vsel %vm783_vm4, %v10162_v1, 0.0 }
0x1d2c   : > { %4559 = vadd.xlane.f32.xlu0 %v4558_v3  ;;  %4556 = vadd.xlane.f32.xlu1 %v4555_v39 }
0x1d2e   : > { %v11162_v4 = vpop.eup %10163 }
0x1d2f   : > { %v4564_v5 = vsel %vm783_vm4, %v11162_v4, 0.0 }
0x1d30   : > { %4565 = vadd.xlane.f32.xlu0 %v4564_v5 }
0x1d3b   : > { %v4548_v7 = vpop.xlane.xlu0 %4547 }
0x1d3c   : > { %10165 = vrcp.f32 %v4548_v7 }
0x1d3d   : > { %9941 = vrot.lane.b32.xlu1 %v11107_v44, %s10284_s13 }
0x1d46   : > { %9936 = vrot.lane.b32.xlu0 %v11109_v45, %s10284_s13  ;;  %v10166_v10 = vpop.eup %10165 }
0x1d47   : > { %v4570_v14 = vmul.f32 %v10166_v10, %v11150_v18 }
0x1d51   : > { %v4545_v9 = vpop.xlane.xlu1 %4544 }
0x1d52   : > { %10167 = vrcp.f32 %v4545_v9 }
0x1d53   : > { %10169 = vpow2.f32 %v4539_v8 }
0x1d5c   : > { %v10168_v11 = vpop.eup %10167 }
0x1d5d   : > { %v10170_v12 = vpop.eup %10169  ;;  %v4568_v13 = vmul.f32 %v10168_v11, %v10154_v24 }
0x1d5e   : > { %v4561_v44 = vsel %vm783_vm4, %v10170_v12, 0.0 }
0x1d5f   : > { %8928 = vmatprep.mubr.msk.f32.mxu1 %vm783_vm4, %v4568_v13  ;;  %v8053_v13 = vld [vmem:[%s11754_s4 + $0x16] ss:$0 sm:$0xff] }
0x1d60   : > { %8929 = vmatmul.mubr.msk.f32.vlgmr.msra.gmra.mrb[50].mxu1 %vm783_vm4, %v4570_v14 }
0x1d61   : > { %4562 = vadd.xlane.f32.xlu1 %v4561_v44 }
0x1d72   : > { %9946 = vrot.lane.b32.xlu1 %v11115_v60, %s10284_s13 }
0x1db1   : > { %v4554_v45 = vpop.xlane.xlu0 %4553 }
0x1db5   : > { %v4551_v27 = vpop.xlane.xlu1 %4550 }
0x1db6   : > { %10171 = vrcp.f32 %v4551_v27 }
0x1db7   : > { %10173 = vrcp.f32 %v4554_v45 }
0x1db9   : > { %v4560_v15 = vpop.xlane.xlu0 %4559  ;;  %v4557_v51 = vpop.xlane.xlu1 %4556 }
0x1dba   : > { %10175 = vrcp.f32 %v4560_v15 }
0x1dbb   : > { %10177 = vrcp.f32 %v4557_v51 }
0x1dbd   : > { %v4566_v56 = vpop.xlane.xlu0 %4565  ;;  %v9942_v55 = vpop.permute.xlu1 %9941 }
0x1dbe   : > { %v9944_v16 = vunpack.i.h.bf16 %v9942_v55  ;;  %v9943_v19 = vunpack.i.l.bf16 %v9942_v55  ;;  %10179 = vrcp.f32 %v4566_v56 }
0x1dc0   : > { %v10172_v38 = vpop.eup %10171  ;;  %v9545_v28 = vpack.c.bf16 %v9944_v16, %v9943_v19 }
0x1dc1   : > { %v9937_v43 = vpop.permute.xlu0 %9936  ;;  %v4572_v17 = vmul.f32 %v10172_v38, %v10158_v62  ;;  %v10174_v60 = vpop.eup %10173 }
0x1dc2   : > { %v9939_v18 = vunpack.i.h.bf16 %v9937_v43  ;;  %v9938_v2 = vunpack.i.l.bf16 %v9937_v43  ;;  %9546 = vmatprep.subr.bf16.mxu0 %v9545_v28  ;;  %v4574_v29 = vmul.f32 %v10174_v60, %v11155_v53  ;;  %v9557_v53 = vpack.c.bf16 %v4964_v52, %v4963_v46  ;;  %v5093_v60 = vld [vmem:[%s11752_s2 + $0x50] sm:$0xff]  ;;  %v5196_v52 = vld [vmem:[%s11753_s3 + $0x198] sm:$0xff] }
0x1dc3   : > { %8935 = vmatprep.mubr.msk.f32.mxu1 %vm783_vm4, %v4572_v17  ;;  %9548 = vmatpush3.bf16.msra.mxu0 %v9545_v28  ;;  %v9585_v46 = vpack.c.bf16 %v5194_v20, %v5193_v59 }
0x1dc4   : > { %v10176_v21 = vpop.eup %10175  ;;  %v9541_v23 = vpack.c.bf16 %v9939_v18, %v9938_v2  ;;  %9554 = vmatprep.subr.bf16.mxu0 %v9553_v48 }
0x1dc5   : > { %v10178_v24 = vpop.eup %10177  ;;  %v4578_v25 = vmul.f32 %v10176_v21, %v10162_v1  ;;  %v5094_v21 = vld [vmem:[%s11752_s2 + $0xd8] sm:$0xff] }
0x1dc6   : > { %9542 = vmatprep.subr.bf16.mxu1 %v9541_v23  ;;  %v4576_v26 = vmul.f32 %v10178_v24, %v10160_v0  ;;  %v5095_v24 = vld [vmem:[%s11752_s2 + $0x160] sm:$0xff] }
0x1dc7   : > { %9544 = vmatpush3.bf16.msra.mxu1 %v9541_v23  ;;  %v9561_v23 = vpack.c.bf16 %v5094_v21, %v5093_v60 }
0x1dc8   : > { %8942 = vmatprep.mubr.msk.f32.mxu0 %vm783_vm4, %v4576_v26  ;;  %v10180_v34 = vpop.eup %10179 }
0x1dc9   : > { %8943 = vmatmul.mubr.msk.f32.vlgmr.msra.gmra.mrb[32].mxu0 %vm783_vm4, %v4578_v25  ;;  %v4582_v36 = vmul.f32 %v10180_v34, %v11162_v4  ;;  %v5096_v25 = vld [vmem:[%s11752_s2 + $0x1e8] sm:$0xff]  ;;  %v5189_v34 = vld [vmem:[%s11753_s3 + $0x160] sm:$0xff] }
0x1dca   : > { %8936 = vmatmul.mubr.msk.f32.vlgmr.msra.gmra.mrb[52].mxu1 %vm783_vm4, %v4574_v29  ;;  %9556 = vmatpush3.bf16.msra.mxu0 %v9553_v48  ;;  %v9565_v26 = vpack.c.bf16 %v5096_v25, %v5095_v24  ;;  %v5185_v29 = vld [vmem:[%s11753_s3 + $0x140] sm:$0xff]  ;;  %v5195_v48 = vld [vmem:[%s11753_s3 + $0x190] sm:$0xff] }
0x1dcb   : > { %9558 = vmatprep.subr.bf16.mxu0 %v9557_v53 }
0x1dce   : > { %9560 = vmatpush3.bf16.msra.mxu0 %v9557_v53  ;;  %v9589_v53 = vpack.c.bf16 %v5196_v52, %v5195_v48 }
0x1dee   : > { %v4563_v30 = vpop.xlane.xlu1 %4562 }
0x1def   : > { %10181 = vrcp.f32 %v4563_v30  ;;  %v5186_v30 = vld [vmem:[%s11753_s3 + $0x148] sm:$0xff] }
0x1df2   : > { %v9947_v31 = vpop.permute.xlu1 %9946 }
0x1df3   : > { %v9949_v49 = vunpack.i.h.bf16 %v9947_v31  ;;  %v9948_v32 = vunpack.i.l.bf16 %v9947_v31  ;;  %v5187_v31 = vld [vmem:[%s11753_s3 + $0x150] sm:$0xff] }
0x1df5   : > { %v9549_v33 = vpack.c.bf16 %v9949_v49, %v9948_v32  ;;  %v9569_v49 = vpack.c.bf16 %v5186_v30, %v5185_v29  ;;  %v5188_v32 = vld [vmem:[%s11753_s3 + $0x158] sm:$0xff] }
0x1df7   : > { %9550 = vmatprep.subr.bf16.mxu1 %v9549_v33  ;;  %9570 = vmatprep.subr.bf16.mxu0 %v9569_v49 }
0x1df8   : > { %9552 = vmatpush3.bf16.msra.mxu1 %v9549_v33  ;;  %v9573_v33 = vpack.c.bf16 %v5188_v32, %v5187_v31 }
0x1df9   : > { %v10182_v40 = vpop.eup %10181  ;;  %9562 = vmatprep.subr.bf16.mxu1 %v9561_v23 }
0x1dfa   : > { %v4580_v35 = vmul.f32 %v10182_v40, %v10170_v12  ;;  %v5190_v40 = vld [vmem:[%s11753_s3 + $0x168] sm:$0xff] }
0x1dfc   : > { %8949 = vmatprep.mubr.msk.f32.mxu1 %vm783_vm4, %v4580_v35  ;;  %v9577_v35 = vpack.c.bf16 %v5190_v40, %v5189_v34  ;;  %v5324_v34 = vld [vmem:[%s11752_s2 + $0xe0] sm:$0xff] }
0x1dfd   : > { %8950 = vmatmul.mubr.msk.f32.vlgmr.msra.gmra.mrb[54].mxu1 %vm783_vm4, %v4582_v36  ;;  %v5191_v36 = vld [vmem:[%s11753_s3 + $0x170] sm:$0xff] }
0x1dfe   : > { %9564 = vmatpush3.bf16.msra.mxu1 %v9561_v23 }
0x1dff   : > { %9566 = vmatprep.subr.bf16.mxu1 %v9565_v26 }
0x1e02   : > { %9568 = vmatpush3.bf16.msra.mxu1 %v9565_v26 }
0x1e33   : > { %v8930_v37 = vpop.f32.mrb[50].mxu1 }
0x1e34   : > { %v4661_v41 = vpop.f32.mrb[51].mxu1 }
0x1e9c   : > { %v8944_v57 = vpop.f32.mrb[32].mxu0 }
0x1e9d   : > { %v4835_v58 = vpop.f32.mrb[33].mxu0  ;;  %v8937_v61 = vpop.f32.mrb[52].mxu1 }
0x1e9e   : > { %4935 = vrot.lane.b32.xlu1 %v8937_v61, %s10286_s24  ;;  %v4748_v62 = vpop.f32.mrb[53].mxu1 }
0x1e9f   : > { %4933 = vrot.lane.b32.xlu0 %v4748_v62, %s10286_s24 }
0x1ea2   : > { %4943 = vrot.lane.b32.xlu1 %v8944_v57, %s10287_s25  ;;  %v5197_v57 = vld [vmem:[%s11753_s3 + $0x1a0] sm:$0xff] }
0x1ea3   : > { %4941 = vrot.lane.b32.xlu0 %v4835_v58, %s10287_s25  ;;  %v5198_v58 = vld [vmem:[%s11753_s3 + $0x1a8] sm:$0xff] }
0x1ea4   : > { %v9593_v61 = vpack.c.bf16 %v5198_v58, %v5197_v57  ;;  %v8062_v57 = vld [vmem:[%s11754_s4 + $0x1b] ss:$0 sm:$0xff] }
0x1ed0   : > { %v8951_v63 = vpop.f32.mrb[54].mxu1 }
0x1ed1   : > { %4951 = vrot.lane.b32.xlu1 %v8951_v63, %s10288_s27  ;;  %v4922_v0 = vpop.f32.mrb[55].mxu1 }
0x1ed2   : > { %4949 = vrot.lane.b32.xlu0 %v4922_v0, %s10288_s27 }
0x1f10   : > { %v4936_v1 = vpop.permute.xlu1 %4935 }
0x1f11   : > { %v4934_v3 = vpop.permute.xlu0 %4933  ;;  %v4956_v7 = vsel %vm438_vm2, %v8930_v37, %v4936_v1  ;;  %v5192_v37 = vld [vmem:[%s11753_s3 + $0x178] sm:$0xff] }
0x1f12   : > { %v4955_v5 = vsel %vm438_vm2, %v4661_v41, %v4934_v3  ;;  %v9581_v41 = vpack.c.bf16 %v5192_v37, %v5191_v36  ;;  %v5326_v36 = vld [vmem:[%s11752_s2 + $0x1f0] sm:$0xff] }
0x1f14   : > { %v4944_v39 = vpop.permute.xlu1 %4943 }
0x1f15   : > { %v4942_v4 = vpop.permute.xlu0 %4941  ;;  %v4958_v10 = vsel %vm783_vm4, %v4956_v7, %v4944_v39  ;;  %v8057_v7 = vld [vmem:[%s11754_s4 + $0x18] ss:$0 sm:$0xff] }
0x1f16   : > { %v4957_v8 = vsel %vm783_vm4, %v4955_v5, %v4942_v4  ;;  %v8056_v5 = vld [vmem:[%s11754_s4 + $0x17] ss:$0 sm:$0xff] }
0x1f43   : > { %v4952_v6 = vpop.permute.xlu1 %4951 }
0x1f44   : > { %v4950_v9 = vpop.permute.xlu0 %4949  ;;  %v4960_v12 = vsel %vm1248_vm5, %v4958_v10, %v4952_v6 }
0x1f45   : > { %v4959_v11 = vsel %vm1248_vm5, %v4957_v8, %v4950_v9 }
0x1f46   : > { %8960 = vmatprep.mubr.msk.f32.mxu0 %vm338_vm1, %v4959_v11 }
0x1f47   : > { %8961 = vmatmul.mubr.msk.f32.vlgmr.msra.gmra.mrb[34].mxu0 %vm338_vm1, %v4960_v12 }
0x1f48   : > { %9572 = vmatpush3.bf16.msra.mxu0 %v9569_v49 }
0x1f49   : > { %9574 = vmatprep.subr.bf16.mxu0 %v9573_v33 }
0x1f4c   : > { %9576 = vmatpush3.bf16.msra.mxu0 %v9573_v33  ;;  %v5323_v33 = vld [vmem:[%s11752_s2 + $0x58] sm:$0xff] }
0x1f4d   : > { %9578 = vmatprep.subr.bf16.mxu0 %v9577_v35  ;;  %v9601_v40 = vpack.c.bf16 %v5324_v34, %v5323_v33 }
0x1f4f   : > { %9602 = vmatprep.subr.bf16.mxu1 %v9601_v40 }
0x1f50   : > { %9580 = vmatpush3.bf16.msra.mxu0 %v9577_v35  ;;  %v5325_v35 = vld [vmem:[%s11752_s2 + $0x168] sm:$0xff] }
0x1f51   : > { %9582 = vmatprep.subr.bf16.mxu0 %v9581_v41  ;;  %v9605_v37 = vpack.c.bf16 %v5326_v36, %v5325_v35 }
0x1f54   : > { %9584 = vmatpush3.bf16.msra.mxu0 %v9581_v41 }
0x1f55   : > { %9586 = vmatprep.subr.bf16.mxu0 %v9585_v46 }
0x1f58   : > { %9588 = vmatpush3.bf16.msra.mxu0 %v9585_v46 }
0x1f59   : > { %9590 = vmatprep.subr.bf16.mxu0 %v9589_v53 }
0x1f5c   : > { %9592 = vmatpush3.bf16.msra.mxu0 %v9589_v53 }
0x1f5d   : > { %9594 = vmatprep.subr.bf16.mxu0 %v9593_v61 }
0x1f60   : > { %9596 = vmatpush3.bf16.msra.mxu0 %v9593_v61 }
0x201a   : > { %v8962_v14 = vpop.f32.mrb[34].mxu0 }
0x201b   : > { %v5048_v44 = vadd.f32 %v8962_v14, %v8053_v13  ;;  %v5042_v45 = vpop.f32.mrb[35].mxu0  ;;  %v5199_v14 = vld [vmem:[%s11753_s3 + $0x1b0] sm:$0xff] }
0x201c   : > { %v5043_v27 = vadd.f32 %v8053_v13, %v5042_v45 }
0x201d   : > { %v5052_v15 = vadd.f32 %v5048_v44, %v11083_v50  ;;  %v5200_v44 = vld [vmem:[%s11753_s3 + $0x1b8] sm:$0xff] }
0x201e   : > { %v5051_v51 = vadd.f32 %v5043_v27, %v11079_v54  ;;  %v9597_v45 = vpack.c.bf16 %v5200_v44, %v5199_v14  ;;  %v8058_v27 = vld [vmem:[%s11754_s4 + $0x19] ss:$0 sm:$0xff] }
0x201f   : > { %v5056_v56 = vsel %vm338_vm1, %v5052_v15, 0.0 }
0x2020   : > { %5057 = vadd.xlane.f32.xlu1 %v5056_v56  ;;  %v5053_v55 = vsel %vm338_vm1, %v5051_v51, 0.0  ;;  %9598 = vmatprep.subr.bf16.mxu0 %v9597_v45 }
0x2021   : > { %5054 = vadd.xlane.f32.xlu0 %v5053_v55  ;;  %9600 = vmatpush3.bf16.msra.mxu0 %v9597_v45 }
0x20ad   : > { %v5058_v16 = vpop.xlane.xlu1 %5057 }
0x20ae   : > { %v5060_v19 = vmul.f32 0.03125, %v5058_v16  ;;  %v5055_v38 = vpop.xlane.xlu0 %5054 }
0x20af   : > { %v5059_v28 = vmul.f32 0.03125, %v5055_v38  ;;  %v8061_v38 = vld [vmem:[%s11754_s4 + $0x1a] ss:$0 sm:$0xff] }
0x20b0   : > { %v11218_v43 = vsub.f32 %v5052_v15, %v5060_v19 }
0x20b1   : > { %v5061_v17 = vsub.f32 %v5051_v51, %v5059_v28 }
0x20b2   : > { %v5064_v50 = vmul.f32 %v11218_v43, %v11218_v43 }
0x20b3   : > { %v5063_v18 = vmul.f32 %v5061_v17, %v5061_v17 }
0x20b4   : > { %v5068_v54 = vsel %vm338_vm1, %v5064_v50, 0.0 }
0x20b5   : > { %v5065_v2 = vsel %vm338_vm1, %v5063_v18, 0.0 }
0x20b6   : > { %5066 = vadd.xlane.f32.xlu0 %v5065_v2 }
0x20ba   : > { %5069 = vadd.xlane.f32.xlu0 %v5068_v54 }
0x2143   : > { %v5067_v62 = vpop.xlane.xlu0 %5066 }
0x2144   : > { %v5071_v63 = vmul.f32 0.03125, %v5067_v62 }
0x2146   : > { %v5073_v0 = vadd.f32 1e-05, %v5071_v63 }
0x2147   : > { %v5070_v1 = vpop.xlane.xlu0 %5069 }
0x2148   : > { %10183 = vrsqrt.f32 %v5073_v0  ;;  %v5072_v3 = vmul.f32 0.03125, %v5070_v1  ;;  %v8063_v0 = vld [vmem:[%s11754_s4 + $0x1c] ss:$0 sm:$0xff] }
0x214a   : > { %v5074_v39 = vadd.f32 1e-05, %v5072_v3 }
0x214c   : > { %10185 = vrsqrt.f32 %v5074_v39 }
0x2152   : > { %v10184_v4 = vpop.eup %10183 }
0x2153   : > { %v5077_v6 = vmul.f32 %v10184_v4, %v5061_v17  ;;  %v8064_v4 = vld [vmem:[%s11754_s4 + $0x1d] ss:$0 sm:$0xff] }
0x2155   : > { %v5084_v8 = vmul.f32 %v8056_v5, %v5077_v6 }
0x2156   : > { %v10186_v9 = vpop.eup %10185 }
0x2157   : > { %v5078_v10 = vmul.f32 %v10186_v9, %v11218_v43  ;;  %v5091_v11 = vadd.f32 %v8057_v7, %v5084_v8 }
0x2159   : > { %v5085_v12 = vmul.f32 %v8056_v5, %v5078_v10  ;;  %8971 = vmatprep.mubr.msk.f32.mxu1 %vm338_vm1, %v5091_v11 }
0x215b   : > { %v5092_v13 = vadd.f32 %v8057_v7, %v5085_v12 }
0x215d   : > { %8972 = vmatmul.mubr.msk.f32.vlgmr.msra.gmra.mrb[56].mxu1 %vm338_vm1, %v5092_v13 }
0x215e   : > { %9604 = vmatpush3.bf16.msra.mxu1 %v9601_v40 }
0x215f   : > { %9606 = vmatprep.subr.bf16.mxu1 %v9605_v37 }
0x2162   : > { %9608 = vmatpush3.bf16.msra.mxu1 %v9605_v37 }
0x2230   : > { %v8973_v15 = vpop.f32.mrb[56].mxu1 }
0x2231   : > { %v5180_v51 = vadd.f32 %v8973_v15, %v8058_v27  ;;  %v5174_v56 = vpop.f32.mrb[57].mxu1 }
0x2232   : > { %v5175_v55 = vadd.f32 %v8058_v27, %v5174_v56 }
0x2233   : > { %v5184_v19 = vmax.f32 %v5180_v51, 0.0 }
0x2234   : > { %v5183_v16 = vmax.f32 %v5175_v55, 0.0 }
0x2236   : > { %9006 = vmatprep.mubr.f32.mxu0 %v5183_v16 }
0x2237   : > { %9007 = vmatmul.mubr.f32.vlgmr.msra.gmra.mrb[36].mxu0 %v5184_v19 }
0x230a   : > { %v9008_v28 = vpop.f32.mrb[36].mxu0 }
0x230b   : > { %v5278_v43 = vadd.f32 %v9008_v28, %v8061_v38  ;;  %v5272_v17 = vpop.f32.mrb[37].mxu0 }
0x230c   : > { %v5273_v18 = vadd.f32 %v8061_v38, %v5272_v17 }
0x230d   : > { %v5282_v2 = vadd.f32 %v5278_v43, %v5092_v13 }
0x230e   : > { %v5281_v50 = vadd.f32 %v5273_v18, %v5091_v11 }
0x230f   : > { %v5286_v54 = vsel %vm338_vm1, %v5282_v2, 0.0 }
0x2310   : > { %5287 = vadd.xlane.f32.xlu0 %v5286_v54  ;;  %v5283_v60 = vsel %vm338_vm1, %v5281_v50, 0.0 }
0x2311   : > { %5284 = vadd.xlane.f32.xlu1 %v5283_v60 }
0x239d   : > { %v5288_v21 = vpop.xlane.xlu0 %5287 }
0x239e   : > { %v5290_v23 = vmul.f32 0.03125, %v5288_v21  ;;  %v5285_v24 = vpop.xlane.xlu1 %5284 }
0x239f   : > { %v5289_v25 = vmul.f32 0.03125, %v5285_v24 }
0x23a0   : > { %v5292_v26 = vsub.f32 %v5282_v2, %v5290_v23 }
0x23a1   : > { %v5291_v29 = vsub.f32 %v5281_v50, %v5289_v25 }
0x23a2   : > { %v5294_v30 = vmul.f32 %v5292_v26, %v5292_v26 }
0x23a3   : > { %v5293_v31 = vmul.f32 %v5291_v29, %v5291_v29 }
0x23a4   : > { %v5298_v49 = vsel %vm338_vm1, %v5294_v30, 0.0 }
0x23a5   : > { %5299 = vadd.xlane.f32.xlu0 %v5298_v49  ;;  %v5295_v32 = vsel %vm338_vm1, %v5293_v31, 0.0 }
0x23a6   : > { %5296 = vadd.xlane.f32.xlu1 %v5295_v32 }
0x2432   : > { %v5300_v41 = vpop.xlane.xlu0 %5299 }
0x2433   : > { %v5302_v59 = vmul.f32 0.03125, %v5300_v41  ;;  %v5297_v20 = vpop.xlane.xlu1 %5296 }
0x2434   : > { %v5301_v46 = vmul.f32 0.03125, %v5297_v20 }
0x2435   : > { %v5304_v48 = vadd.f32 1e-05, %v5302_v59 }
0x2436   : > { %v5303_v52 = vadd.f32 1e-05, %v5301_v46 }
0x2437   : > { %10187 = vrsqrt.f32 %v5304_v48 }
0x2438   : > { %10189 = vrsqrt.f32 %v5303_v52 }
0x2441   : > { %v10188_v53 = vpop.eup %10187 }
0x2442   : > { %v10190_v58 = vpop.eup %10189  ;;  %v5308_v61 = vmul.f32 %v10188_v53, %v5292_v26 }
0x2443   : > { %v5307_v62 = vmul.f32 %v10190_v58, %v5291_v29 }
0x2444   : > { %v5315_v63 = vmul.f32 %v8062_v57, %v5308_v61 }
0x2445   : > { %v5314_v1 = vmul.f32 %v8062_v57, %v5307_v62 }
0x2446   : > { %v11323_v39 = vadd.f32 %v8063_v0, %v5315_v63 }
0x2447   : > { %v11321_v3 = vadd.f32 %v8063_v0, %v5314_v1 }
0x2449   : > { %9017 = vmatprep.mubr.msk.f32.mxu1 %vm338_vm1, %v11321_v3 }
0x244a   : > { %9018 = vmatmul.mubr.msk.f32.vlgmr.msra.gmra.mrb[58].mxu1 %vm338_vm1, %v11323_v39 }
0x251d   : > { %v9019_v5 = vpop.f32.mrb[58].mxu1 }
0x251e   : > { %v5410_v6 = vadd.f32 %v9019_v5, %v8064_v4  ;;  %v5404_v7 = vpop.f32.mrb[59].mxu1 }
0x251f   : > { %v5405_v8 = vadd.f32 %v8064_v4, %v5404_v7 }
0x2520   : > { %5417 = vrot.lane.b32.xlu0 %v5410_v6, %s10282_s11 }
0x2521   : > { %5415 = vrot.lane.b32.xlu1 %v5405_v8, %s10282_s11  ;;  %9024 = vmatprep.mubr.msk.f32.mxu1 %vm438_vm2, %v5405_v8  ;;  %v11337_v9 = vpack.i.bf16 %v5410_v6, %v5405_v8 }
0x2524   : > { %5423 = vrot.lane.b32.xlu0 %v5405_v8, %s10283_s12 }
0x2525   : > { %5421 = vrot.lane.b32.xlu1 %v5410_v6, %s10281_s10 }
0x2528   : > { %9951 = vrot.lane.b32.xlu0 %v11337_v9, %s10284_s13 }
0x2529   : > { %5419 = vrot.lane.b32.xlu1 %v5405_v8, %s10281_s10 }
0x252d   : > { %5425 = vrot.lane.b32.xlu1 %v5410_v6, %s10283_s12 }
0x2592   : > { %v5418_v10 = vpop.permute.xlu0 %5417 }
0x2593   : > { %v5416_v11 = vpop.permute.xlu1 %5415 }
0x2594   : > { %v11343_v12 = vpack.i.bf16 %v5418_v10, %v5416_v11 }
0x2596   : > { %v5424_v13 = vpop.permute.xlu0 %5423  ;;  %9956 = vrot.lane.b32.xlu1 %v11343_v12, %s10284_s13 }
0x2597   : > { %9045 = vmatprep.mubr.msk.f32.mxu0 %vm438_vm2, %v5424_v13  ;;  %v5422_v14 = vpop.permute.xlu1 %5421 }
0x259a   : > { %v9952_v44 = vpop.permute.xlu0 %9951 }
0x259b   : > { %v9954_v45 = vunpack.i.h.bf16 %v9952_v44  ;;  %v9953_v27 = vunpack.i.l.bf16 %v9952_v44  ;;  %v5420_v15 = vpop.permute.xlu1 %5419 }
0x259c   : > { %v11348_v51 = vpack.i.bf16 %v5422_v14, %v5420_v15 }
0x259d   : > { %v9609_v56 = vpack.c.bf16 %v9954_v45, %v9953_v27 }
0x259e   : > { %9961 = vrot.lane.b32.xlu0 %v11348_v51, %s10284_s13 }
0x259f   : > { %9611 = vmatprep.subr.msk.bf16.mxu1 %vm10419_vm3, %v9609_v56  ;;  %v5426_v55 = vpop.permute.xlu1 %5425 }
0x25a0   : > { %v11354_v16 = vpack.i.bf16 %v5426_v55, %v5424_v13  ;;  %9614 = vmatpush3.bf16.xpose.msk.msra.mxu1 %vm10419_vm3, %v9609_v56 }
0x25a2   : > { %9966 = vrot.lane.b32.xlu1 %v11354_v16, %s10284_s13 }
0x25a7   : > { %9025 = vmatmul.mubr.msk.f32.vlgmr.msra.gmra.mrb[60].mxu1 %vm438_vm2, %v5410_v6 }
0x25a8   : > { %9031 = vmatprep.mubr.msk.f32.mxu1 %vm438_vm2, %v5416_v11 }
0x2608   : > { %v9957_v19 = vpop.permute.xlu1 %9956 }
0x2609   : > { %v9959_v38 = vunpack.i.h.bf16 %v9957_v19  ;;  %v9958_v28 = vunpack.i.l.bf16 %v9957_v19 }
0x260b   : > { %v9615_v43 = vpack.c.bf16 %v9959_v38, %v9958_v28 }
0x260d   : > { %9617 = vmatprep.subr.msk.bf16.mxu1 %vm10419_vm3, %v9615_v43 }
0x260e   : > { %9620 = vmatpush3.bf16.xpose.msk.msra.mxu1 %vm10419_vm3, %v9615_v43 }
0x2610   : > { %v9962_v17 = vpop.permute.xlu0 %9961 }
0x2611   : > { %v9964_v18 = vunpack.i.h.bf16 %v9962_v17  ;;  %v9963_v2 = vunpack.i.l.bf16 %v9962_v17 }
0x2613   : > { %v9621_v50 = vpack.c.bf16 %v9964_v18, %v9963_v2 }
0x2614   : > { %v9967_v54 = vpop.permute.xlu1 %9966 }
0x2615   : > { %v9969_v60 = vunpack.i.h.bf16 %v9967_v54  ;;  %v9968_v21 = vunpack.i.l.bf16 %v9967_v54  ;;  %9032 = vmatmul.mubr.msk.f32.vlgmr.msra.gmra.mrb[62].mxu1 %vm438_vm2, %v5418_v10  ;;  %9623 = vmatprep.subr.msk.bf16.mxu1 %vm10419_vm3, %v9621_v50 }
0x2616   : > { %9626 = vmatpush3.bf16.xpose.msk.msra.mxu1 %vm10419_vm3, %v9621_v50  ;;  %9038 = vmatprep.mubr.msk.f32.mxu1 %vm438_vm2, %v5420_v15 }
0x2617   : > { %v9627_v23 = vpack.c.bf16 %v9969_v60, %v9968_v21 }
0x2619   : > { %9629 = vmatprep.subr.msk.bf16.mxu0 %vm10419_vm3, %v9627_v23 }
0x261a   : > { %9632 = vmatpush3.bf16.xpose.msk.msra.mxu0 %vm10419_vm3, %v9627_v23 }
0x261d   : > { %9039 = vmatmul.mubr.msk.f32.vlgmr.msra.gmra.mrb[64].mxu1 %vm438_vm2, %v5422_v14 }
0x2621   : > { %9046 = vmatmul.mubr.msk.f32.vlgmr.msra.gmra.mrb[38].mxu0 %vm438_vm2, %v5426_v55 }
0x267a   : > { %v9026_v24 = vpop.f32.mrb[60].mxu1 }
0x267b   : > { %v5505_v25 = vpop.f32.mrb[61].mxu1  ;;  %v5778_v26 = vsel %vm783_vm4, %v9026_v24, -inf }
0x267c   : > { %5779 = vmax.xlane.f32.xlu1 %v5778_v26  ;;  %v5775_v29 = vsel %vm783_vm4, %v5505_v25, -inf }
0x267d   : > { %5776 = vmax.xlane.f32.xlu0 %v5775_v29 }
0x26e8   : > { %v9033_v30 = vpop.f32.mrb[62].mxu1 }
0x26e9   : > { %v5592_v31 = vpop.f32.mrb[63].mxu1  ;;  %v5784_v49 = vsel %vm783_vm4, %v9033_v30, -inf }
0x26ea   : > { %5785 = vmax.xlane.f32.xlu0 %v5784_v49  ;;  %v5781_v32 = vsel %vm783_vm4, %v5592_v31, -inf }
0x26ee   : > { %5782 = vmax.xlane.f32.xlu0 %v5781_v32 }
0x26f0   : > { %v9040_v33 = vpop.f32.mrb[64].mxu1 }
0x26f1   : > { %v11382_v34 = vpop.f32.mrb[65].mxu1  ;;  %v5790_v40 = vsel %vm783_vm4, %v9040_v33, -inf }
0x26f2   : > { %5791 = vmax.xlane.f32.xlu0 %v5790_v40  ;;  %v5787_v59 = vsel %vm783_vm4, %v11382_v34, -inf }
0x26f4   : > { %v9047_v35 = vpop.f32.mrb[38].mxu0 }
0x26f5   : > { %v5766_v36 = vpop.f32.mrb[39].mxu0  ;;  %v5796_v37 = vsel %vm783_vm4, %v9047_v35, -inf }
0x26f6   : > { %5797 = vmax.xlane.f32.xlu0 %v5796_v37  ;;  %v5793_v41 = vsel %vm783_vm4, %v5766_v36, -inf }
0x26f7   : > { %5794 = vmax.xlane.f32.xlu1 %v5793_v41 }
0x26fb   : > { %5788 = vmax.xlane.f32.xlu1 %v5787_v59 }
0x2709   : > { %v5780_v20 = vpop.xlane.xlu1 %5779 }
0x270a   : > { %v5800_v46 = vsub.f32 %v9026_v24, %v5780_v20  ;;  %v5777_v52 = vpop.xlane.xlu0 %5776 }
0x270b   : > { %v5799_v58 = vsub.f32 %v5505_v25, %v5777_v52 }
0x270c   : > { %v5809_v48 = vmul.f32 1.442695, %v5800_v46  ;;  %9971 = vrot.lane.b32.xlu1 %v11337_v9, %s10285_s14 }
0x270d   : > { %v5807_v61 = vmul.f32 1.442695, %v5799_v58 }
0x270e   : > { %10191 = vpow2.f32 %v5809_v48 }
0x270f   : > { %10193 = vpow2.f32 %v5807_v61 }
0x2718   : > { %v11391_v53 = vpop.eup %10191 }
0x2719   : > { %v5826_v57 = vsel %vm783_vm4, %v11391_v53, 0.0  ;;  %v10194_v62 = vpop.eup %10193 }
0x271a   : > { %5827 = vadd.xlane.f32.xlu0 %v5826_v57  ;;  %v5823_v63 = vsel %vm783_vm4, %v10194_v62, 0.0 }
0x2730   : > { %5824 = vadd.xlane.f32.xlu1 %v5823_v63 }
0x2777   : > { %v5786_v0 = vpop.xlane.xlu0 %5785 }
0x2778   : > { %v5802_v1 = vsub.f32 %v9033_v30, %v5786_v0 }
0x277a   : > { %v5813_v4 = vmul.f32 1.442695, %v5802_v1 }
0x277b   : > { %v5783_v5 = vpop.xlane.xlu0 %5782 }
0x277c   : > { %10195 = vpow2.f32 %v5813_v4  ;;  %v5801_v6 = vsub.f32 %v5592_v31, %v5783_v5 }
0x277e   : > { %v5811_v7 = vmul.f32 1.442695, %v5801_v6 }
0x277f   : > { %v5792_v8 = vpop.xlane.xlu0 %5791 }
0x2780   : > { %10197 = vpow2.f32 %v5811_v7  ;;  %v5804_v9 = vsub.f32 %v9040_v33, %v5792_v8 }
0x2782   : > { %v5817_v45 = vmul.f32 1.442695, %v5804_v9 }
0x2783   : > { %v5798_v10 = vpop.xlane.xlu0 %5797 }
0x2784   : > { %v5806_v11 = vsub.f32 %v9047_v35, %v5798_v10  ;;  %v5795_v13 = vpop.xlane.xlu1 %5794 }
0x2785   : > { %v5805_v14 = vsub.f32 %v5766_v36, %v5795_v13 }
0x2786   : > { %v11396_v44 = vpop.eup %10195  ;;  %v5821_v27 = vmul.f32 1.442695, %v5806_v11 }
0x2787   : > { %v5819_v15 = vmul.f32 1.442695, %v5805_v14  ;;  %v5832_v56 = vsel %vm783_vm4, %v11396_v44, 0.0 }
0x2788   : > { %10199 = vpow2.f32 %v5821_v27  ;;  %5833 = vadd.xlane.f32.xlu0 %v5832_v56  ;;  %v5789_v55 = vpop.xlane.xlu1 %5788  ;;  %v6242_v27 = vld [vmem:[%s11752_s2 + $0xe8] sm:$0xff] }
0x2789   : > { %10201 = vpow2.f32 %v5819_v15  ;;  %v5803_v24 = vsub.f32 %v11382_v34, %v5789_v55 }
0x278a   : > { %v10198_v19 = vpop.eup %10197  ;;  %10203 = vpow2.f32 %v5817_v45  ;;  %v6241_v45 = vld [vmem:[%s11752_s2 + $0x60] sm:$0xff] }
0x278b   : > { %v5829_v38 = vsel %vm783_vm4, %v10198_v19, 0.0  ;;  %v5815_v25 = vmul.f32 1.442695, %v5803_v24  ;;  %v9649_v15 = vpack.c.bf16 %v6242_v27, %v6241_v45 }
0x278c   : > { %5830 = vadd.xlane.f32.xlu1 %v5829_v38  ;;  %v9972_v28 = vpop.permute.xlu1 %9971  ;;  %v6244_v38 = vld [vmem:[%s11752_s2 + $0x1f8] sm:$0xff] }
0x278d   : > { %v9974_v43 = vunpack.i.h.bf16 %v9972_v28  ;;  %v9973_v17 = vunpack.i.l.bf16 %v9972_v28  ;;  %10205 = vpow2.f32 %v5815_v25 }
0x278f   : > { %v9633_v18 = vpack.c.bf16 %v9974_v43, %v9973_v17 }
0x2791   : > { %9634 = vmatprep.subr.bf16.mxu1 %v9633_v18 }
0x2792   : > { %v11401_v2 = vpop.eup %10199  ;;  %9636 = vmatpush3.bf16.msra.mxu1 %v9633_v18 }
0x2793   : > { %v10202_v50 = vpop.eup %10201  ;;  %v5844_v54 = vsel %vm783_vm4, %v11401_v2, 0.0 }
0x2794   : > { %v11405_v60 = vpop.eup %10203  ;;  %5845 = vadd.xlane.f32.xlu0 %v5844_v54  ;;  %v5841_v21 = vsel %vm783_vm4, %v10202_v50, 0.0 }
0x2795   : > { %5842 = vadd.xlane.f32.xlu1 %v5841_v21  ;;  %v5838_v23 = vsel %vm783_vm4, %v11405_v60, 0.0 }
0x2797   : > { %v10206_v30 = vpop.eup %10205 }
0x2798   : > { %5839 = vadd.xlane.f32.xlu0 %v5838_v23  ;;  %v5835_v32 = vsel %vm783_vm4, %v10206_v30, 0.0 }
0x27a6   : > { %9981 = vrot.lane.b32.xlu1 %v11348_v51, %s10285_s14 }
0x27a7   : > { %v5828_v26 = vpop.xlane.xlu0 %5827 }
0x27a8   : > { %10207 = vrcp.f32 %v5828_v26 }
0x27ae   : > { %9976 = vrot.lane.b32.xlu0 %v11343_v12, %s10285_s14 }
0x27b2   : > { %v10208_v31 = vpop.eup %10207 }
0x27b3   : > { %v5850_v40 = vmul.f32 %v10208_v31, %v11391_v53 }
0x27bd   : > { %v5825_v29 = vpop.xlane.xlu1 %5824 }
0x27be   : > { %10209 = vrcp.f32 %v5825_v29 }
0x27c8   : > { %v10210_v49 = vpop.eup %10209 }
0x27c9   : > { %v5848_v33 = vmul.f32 %v10210_v49, %v10194_v62 }
0x27ca   : > { %5836 = vadd.xlane.f32.xlu1 %v5835_v32  ;;  %v8091_v32 = vld [vmem:[%s11754_s4 + $0x1e] ss:$0 sm:$0xff] }
0x27cb   : > { %9052 = vmatprep.mubr.msk.f32.mxu1 %vm783_vm4, %v5848_v33 }
0x27cc   : > { %9053 = vmatmul.mubr.msk.f32.vlgmr.msra.gmra.mrb[66].mxu1 %vm783_vm4, %v5850_v40 }
0x27db   : > { %9986 = vrot.lane.b32.xlu1 %v11354_v16, %s10285_s14 }
0x2815   : > { %v5834_v51 = vpop.xlane.xlu0 %5833 }
0x2819   : > { %v5831_v12 = vpop.xlane.xlu1 %5830 }
0x281a   : > { %10211 = vrcp.f32 %v5831_v12 }
0x281b   : > { %10213 = vrcp.f32 %v5834_v51 }
0x2821   : > { %v5846_v34 = vpop.xlane.xlu0 %5845 }
0x2822   : > { %v5843_v35 = vpop.xlane.xlu1 %5842 }
0x2823   : > { %10215 = vrcp.f32 %v5843_v35 }
0x2824   : > { %v10212_v36 = vpop.eup %10211  ;;  %10217 = vrcp.f32 %v5846_v34 }
0x2825   : > { %v5840_v37 = vpop.xlane.xlu0 %5839  ;;  %v5852_v41 = vmul.f32 %v10212_v36, %v10198_v19  ;;  %v10214_v58 = vpop.eup %10213  ;;  %v6243_v19 = vld [vmem:[%s11752_s2 + $0x170] sm:$0xff] }
0x2826   : > { %v9982_v59 = vpop.permute.xlu1 %9981  ;;  %v5854_v62 = vmul.f32 %v10214_v58, %v11396_v44  ;;  %10219 = vrcp.f32 %v5840_v37  ;;  %v9653_v28 = vpack.c.bf16 %v6244_v38, %v6243_v19  ;;  %v8094_v38 = vld [vmem:[%s11754_s4 + $0x1f] ss:$0 sm:$0xff] }
0x2827   : > { %v9984_v20 = vunpack.i.h.bf16 %v9982_v59  ;;  %v9983_v46 = vunpack.i.l.bf16 %v9982_v59  ;;  %9059 = vmatprep.mubr.msk.f32.mxu1 %vm783_vm4, %v5852_v41  ;;  %v6374_v41 = vld [vmem:[%s11752_s2 + $0xf0] sm:$0xff] }
0x2829   : > { %v9641_v48 = vpack.c.bf16 %v9984_v20, %v9983_v46  ;;  %v9977_v52 = vpop.permute.xlu0 %9976 }
0x282a   : > { %v9979_v53 = vunpack.i.h.bf16 %v9977_v52  ;;  %v9978_v57 = vunpack.i.l.bf16 %v9977_v52 }
0x282b   : > { %9642 = vmatprep.subr.bf16.mxu0 %v9641_v48 }
0x282c   : > { %v9637_v16 = vpack.c.bf16 %v9979_v53, %v9978_v57  ;;  %9644 = vmatpush3.bf16.msra.mxu0 %v9641_v48 }
0x282d   : > { %v10216_v61 = vpop.eup %10215  ;;  %9650 = vmatprep.subr.bf16.mxu0 %v9649_v15 }
0x282e   : > { %9638 = vmatprep.subr.bf16.mxu1 %v9637_v16  ;;  %v5860_v63 = vmul.f32 %v10216_v61, %v10202_v50  ;;  %v10218_v7 = vpop.eup %10217 }
0x282f   : > { %9640 = vmatpush3.bf16.msra.mxu1 %v9637_v16  ;;  %v5862_v10 = vmul.f32 %v10218_v7, %v11401_v2 }
0x2830   : > { %v10220_v8 = vpop.eup %10219 }
0x2831   : > { %v5858_v13 = vmul.f32 %v10220_v8, %v11405_v60  ;;  %v8096_v8 = vld [vmem:[%s11754_s4 + $0x21] ss:$0 sm:$0xff] }
0x2832   : > { %9060 = vmatmul.mubr.msk.f32.vlgmr.msra.gmra.mrb[68].mxu1 %vm783_vm4, %v5854_v62 }
0x2833   : > { %9073 = vmatprep.mubr.msk.f32.mxu1 %vm783_vm4, %v5860_v63 }
0x2857   : > { %v5837_v0 = vpop.xlane.xlu1 %5836 }
0x2858   : > { %10221 = vrcp.f32 %v5837_v0  ;;  %v6375_v0 = vld [vmem:[%s11752_s2 + $0x178] sm:$0xff] }
0x285b   : > { %v9987_v1 = vpop.permute.xlu1 %9986 }
0x285c   : > { %v9989_v4 = vunpack.i.h.bf16 %v9987_v1  ;;  %v9988_v5 = vunpack.i.l.bf16 %v9987_v1  ;;  %v6376_v1 = vld [vmem:[%s11752_s2 + $0x200] sm:$0xff] }
0x285d   : > { %v9661_v7 = vpack.c.bf16 %v6376_v1, %v6375_v0 }
0x285e   : > { %v9645_v6 = vpack.c.bf16 %v9989_v4, %v9988_v5  ;;  %v9995_v5 = vpack.i.bf16 %v6376_v1, %v6375_v0 }
0x2860   : > { %9646 = vmatprep.subr.bf16.mxu1 %v9645_v6 }
0x2861   : > { %9648 = vmatpush3.bf16.msra.mxu1 %v9645_v6 }
0x2862   : > { %v10222_v9 = vpop.eup %10221 }
0x2863   : > { %v5856_v11 = vmul.f32 %v10222_v9, %v10206_v30 }
0x2864   : > { %9074 = vmatmul.mubr.msk.f32.vlgmr.msra.gmra.mrb[70].mxu1 %vm783_vm4, %v5862_v10 }
0x2865   : > { %9066 = vmatprep.mubr.msk.f32.mxu0 %vm783_vm4, %v5856_v11 }
0x2866   : > { %9067 = vmatmul.mubr.msk.f32.vlgmr.msra.gmra.mrb[40].mxu0 %vm783_vm4, %v5858_v13 }
0x2867   : > { %9652 = vmatpush3.bf16.msra.mxu0 %v9649_v15 }
0x2868   : > { %9654 = vmatprep.subr.bf16.mxu0 %v9653_v28 }
0x286b   : > { %9656 = vmatpush3.bf16.msra.mxu0 %v9653_v28 }
0x289f   : > { %v9054_v14 = vpop.f32.mrb[66].mxu1 }
0x28a0   : > { %v5941_v44 = vpop.f32.mrb[67].mxu1 }
0x2905   : > { %v9061_v56 = vpop.f32.mrb[68].mxu1 }
0x2906   : > { %6215 = vrot.lane.b32.xlu1 %v9061_v56, %s10286_s24  ;;  %v6028_v55 = vpop.f32.mrb[69].mxu1 }
0x2907   : > { %6213 = vrot.lane.b32.xlu0 %v6028_v55, %s10286_s24 }
0x2937   : > { %v9075_v43 = vpop.f32.mrb[70].mxu1 }
0x2938   : > { %v6202_v17 = vpop.f32.mrb[71].mxu1 }
0x2939   : > { %v9068_v18 = vpop.f32.mrb[40].mxu0 }
0x293a   : > { %v6115_v2 = vpop.f32.mrb[41].mxu0  ;;  %6223 = vrot.lane.b32.xlu1 %v9068_v18, %s10287_s25 }
0x293b   : > { %6221 = vrot.lane.b32.xlu0 %v6115_v2, %s10287_s25  ;;  %v8095_v2 = vld [vmem:[%s11754_s4 + $0x20] ss:$0 sm:$0xff] }
0x293e   : > { %6231 = vrot.lane.b32.xlu1 %v9075_v43, %s10288_s27 }
0x293f   : > { %6229 = vrot.lane.b32.xlu0 %v6202_v17, %s10288_s27 }
0x2978   : > { %v6216_v50 = vpop.permute.xlu1 %6215 }
0x2979   : > { %v6214_v54 = vpop.permute.xlu0 %6213  ;;  %v6236_v25 = vsel %vm438_vm2, %v9054_v14, %v6216_v50 }
0x297a   : > { %v6235_v23 = vsel %vm438_vm2, %v5941_v44, %v6214_v54 }
0x29ac   : > { %v6224_v60 = vpop.permute.xlu1 %6223 }
0x29ad   : > { %v6222_v21 = vpop.permute.xlu0 %6221  ;;  %v6238_v30 = vsel %vm783_vm4, %v6236_v25, %v6224_v60 }
0x29ae   : > { %v6237_v26 = vsel %vm783_vm4, %v6235_v23, %v6222_v21 }
0x29b0   : > { %v6232_v24 = vpop.permute.xlu1 %6231 }
0x29b1   : > { %v6230_v29 = vpop.permute.xlu0 %6229  ;;  %v6240_v49 = vsel %vm1248_vm5, %v6238_v30, %v6232_v24 }
0x29b2   : > { %v6239_v31 = vsel %vm1248_vm5, %v6237_v26, %v6230_v29 }
0x29b3   : > { %9084 = vmatprep.mubr.msk.f32.mxu0 %vm338_vm1, %v6239_v31 }
0x29b4   : > { %9085 = vmatmul.mubr.msk.f32.vlgmr.msra.gmra.mrb[42].mxu0 %vm338_vm1, %v6240_v49 }
0x29b5   : > { %9106 = vmatprep.mubr.msk.f32.mxu0 %vm338_vm1, %v11042_v42  ;;  %v6373_v42 = vld [vmem:[%s11752_s2 + $0x68] sm:$0xff] }
0x29b6   : > { %v9990_v59 = vpack.i.bf16 %v6374_v41, %v6373_v42  ;;  %v9657_v6 = vpack.c.bf16 %v6374_v41, %v6373_v42 }
0x29b8   : > { %9658 = vmatprep.subr.bf16.mxu1 %v9657_v6 }
0x29b9   : > { %9660 = vmatpush3.bf16.msra.mxu1 %v9657_v6 }
0x29ba   : > { %9662 = vmatprep.subr.bf16.mxu1 %v9661_v7 }
0x29bd   : > { %9664 = vmatpush3.bf16.msra.mxu1 %v9661_v7 }
0x2a87   : > { %v9086_v33 = vpop.f32.mrb[42].mxu0 }
0x2a88   : > { %v6328_v40 = vadd.f32 %v9086_v33, %v8091_v32  ;;  %v6322_v12 = vpop.f32.mrb[43].mxu0 }
0x2a89   : > { %v6323_v51 = vadd.f32 %v8091_v32, %v6322_v12 }
0x2a8a   : > { %v6332_v34 = vadd.f32 %v6328_v40, %v11323_v39 }
0x2a8b   : > { %v6331_v35 = vadd.f32 %v6323_v51, %v11321_v3 }
0x2a8c   : > { %v6336_v36 = vsel %vm338_vm1, %v6332_v34, 0.0 }
0x2a8d   : > { %6337 = vadd.xlane.f32.xlu1 %v6336_v36  ;;  %v6333_v37 = vsel %vm338_vm1, %v6331_v35, 0.0 }
0x2a8e   : > { %6334 = vadd.xlane.f32.xlu0 %v6333_v37 }
0x2a9e   : > { %9991 = vrot.lane.b32.xlu1 %v9990_v59, %s10284_s13 }
0x2aa2   : > { %6480 = vrot.lane.b32.xlu1 %v8096_v8, %s10284_s13 }
0x2b1a   : > { %v6338_v39 = vpop.xlane.xlu1 %6337 }
0x2b1b   : > { %v6340_v20 = vmul.f32 0.03125, %v6338_v39  ;;  %v6335_v3 = vpop.xlane.xlu0 %6334 }
0x2b1c   : > { %v6339_v46 = vmul.f32 0.03125, %v6335_v3 }
0x2b1d   : > { %v6342_v48 = vsub.f32 %v6332_v34, %v6340_v20 }
0x2b1e   : > { %v6341_v52 = vsub.f32 %v6331_v35, %v6339_v46  ;;  %v9992_v61 = vpop.permute.xlu1 %9991 }
0x2b1f   : > { %v6344_v53 = vmul.f32 %v6342_v48, %v6342_v48  ;;  %v9994_v62 = vunpack.i.h.bf16 %v9992_v61  ;;  %v9993_v63 = vunpack.i.l.bf16 %v9992_v61 }
0x2b20   : > { %v6343_v16 = vmul.f32 %v6341_v52, %v6341_v52 }
0x2b21   : > { %v6348_v57 = vsel %vm338_vm1, %v6344_v53, 0.0  ;;  %v9665_v4 = vpack.c.bf16 %v9994_v62, %v9993_v63 }
0x2b22   : > { %6349 = vadd.xlane.f32.xlu0 %v6348_v57  ;;  %v6345_v58 = vsel %vm338_vm1, %v6343_v16, 0.0 }
0x2b23   : > { %9666 = vmatprep.subr.bf16.mxu0 %v9665_v4 }
0x2b24   : > { %9668 = vmatpush3.bf16.msra.mxu0 %v9665_v4 }
0x2b26   : > { %6346 = vadd.xlane.f32.xlu0 %v6345_v58 }
0x2b3c   : > { %9996 = vrot.lane.b32.xlu0 %v9995_v5, %s10284_s13 }
0x2baf   : > { %v6350_v9 = vpop.xlane.xlu0 %6349 }
0x2bb0   : > { %v6352_v10 = vmul.f32 0.03125, %v6350_v9 }
0x2bb2   : > { %v6354_v11 = vadd.f32 1e-05, %v6352_v10 }
0x2bb3   : > { %v6347_v13 = vpop.xlane.xlu0 %6346 }
0x2bb4   : > { %10223 = vrsqrt.f32 %v6354_v11  ;;  %v6351_v14 = vmul.f32 0.03125, %v6347_v13 }
0x2bb6   : > { %v6353_v44 = vadd.f32 1e-05, %v6351_v14 }
0x2bb7   : > { %v9997_v45 = vpop.permute.xlu0 %9996 }
0x2bb8   : > { %10225 = vrsqrt.f32 %v6353_v44  ;;  %v9999_v27 = vunpack.i.h.bf16 %v9997_v45  ;;  %v9998_v15 = vunpack.i.l.bf16 %v9997_v45 }
0x2bba   : > { %v9669_v56 = vpack.c.bf16 %v9999_v27, %v9998_v15 }
0x2bbc   : > { %9670 = vmatprep.subr.bf16.mxu0 %v9669_v56 }
0x2bbd   : > { %9672 = vmatpush3.bf16.msra.mxu0 %v9669_v56 }
0x2bbe   : > { %v10224_v55 = vpop.eup %10223 }
0x2bbf   : > { %v6358_v19 = vmul.f32 %v10224_v55, %v6342_v48 }
0x2bc0   : > { %9107 = vmatmul.mubr.msk.f32.vlgmr.msra.gmra.mrb[44].mxu0 %vm338_vm1, %v11069_v22  ;;  %v6481_v22 = vpop.permute.xlu1 %6480 }
0x2bc1   : > { %v6365_v17 = vmul.f32 %v8094_v38, %v6358_v19 }
0x2bc2   : > { %v10226_v28 = vpop.eup %10225 }
0x2bc3   : > { %v6357_v43 = vmul.f32 %v10226_v28, %v6341_v52  ;;  %v11495_v54 = vadd.f32 %v8095_v2, %v6365_v17 }
0x2bc5   : > { %v6364_v18 = vmul.f32 %v8094_v38, %v6357_v43 }
0x2bc7   : > { %v11493_v50 = vadd.f32 %v8095_v2, %v6364_v18 }
0x2bc9   : > { %9095 = vmatprep.mubr.msk.f32.mxu1 %vm338_vm1, %v11493_v50 }
0x2bca   : > { %9096 = vmatmul.mubr.msk.f32.vlgmr.msra.gmra.mrb[72].mxu1 %vm338_vm1, %v11495_v54 }
0x2c93   : > { %v9108_v60 = vpop.f32.mrb[44].mxu0 }
0x2c94   : > { %v6555_v21 = vadd.f32 %v9108_v60, %v6481_v22  ;;  %v6549_v23 = vpop.f32.mrb[45].mxu0 }
0x2c95   : > { %v6550_v24 = vadd.f32 %v6549_v23, %v6481_v22 }
0x2c97   : > { %v11501_v25 = vpack.i.bf16 %v6555_v21, %v6550_v24  ;;  %v9673_v26 = vpack.c.bf16 %v6555_v21, %v6550_v24 }
0x2c99   : > { %10006 = vrot.lane.b32.xlu0 %v11501_v25, %s10281_s10  ;;  %10001 = vrot.lane.b32.xlu1 %v11501_v25, %s10282_s11 }
0x2c9a   : > { %9675 = vmatprep.subr.msk.bf16.mxu1 %vm10419_vm3, %v9673_v26 }
0x2c9b   : > { %9678 = vmatpush3.bf16.xpose.msk.msra.mxu1 %vm10419_vm3, %v9673_v26 }
0x2c9d   : > { %v9097_v29 = vpop.f32.mrb[72].mxu1  ;;  %10011 = vrot.lane.b32.xlu1 %v11501_v25, %s10283_s12 }
0x2c9e   : > { %v6460_v30 = vadd.f32 %v9097_v29, %v8096_v8  ;;  %v6454_v31 = vpop.f32.mrb[73].mxu1 }
0x2c9f   : > { %v6455_v49 = vadd.f32 %v8096_v8, %v6454_v31 }
0x2ca1   : > { %9113 = vmatprep.mubr.msk.f32.mxu1 %vm438_vm2, %v6455_v49  ;;  %6560 = vrot.lane.b32.xlu0 %v6455_v49, %s10282_s11 }
0x2ca2   : > { %6562 = vrot.lane.b32.xlu1 %v6460_v30, %s10282_s11  ;;  %9114 = vmatmul.mubr.msk.f32.vlgmr.msra.gmra.mrb[74].mxu1 %vm438_vm2, %v6460_v30 }
0x2ca5   : > { %6564 = vrot.lane.b32.xlu0 %v6455_v49, %s10281_s10 }
0x2ca6   : > { %6566 = vrot.lane.b32.xlu1 %v6460_v30, %s10281_s10 }
0x2ca9   : > { %6568 = vrot.lane.b32.xlu0 %v6455_v49, %s10283_s12 }
0x2caa   : > { %6570 = vrot.lane.b32.xlu1 %v6460_v30, %s10283_s12 }
0x2d0b   : > { %v11521_v32 = vpop.permute.xlu0 %10006  ;;  %v11523_v33 = vpop.permute.xlu1 %10001 }
0x2d0c   : > { %v10009_v40 = vunpack.i.h.bf16 %v11521_v32  ;;  %v10008_v12 = vunpack.i.l.bf16 %v11521_v32  ;;  %v10004_v51 = vunpack.i.h.bf16 %v11523_v33  ;;  %v10003_v34 = vunpack.i.l.bf16 %v11523_v33 }
0x2d0e   : > { %v9685_v35 = vpack.c.bf16 %v10009_v40, %v10008_v12  ;;  %v9679_v36 = vpack.c.bf16 %v10004_v51, %v10003_v34 }
0x2d0f   : > { %v11529_v37 = vpop.permute.xlu1 %10011 }
0x2d10   : > { %v10014_v42 = vunpack.i.h.bf16 %v11529_v37  ;;  %v10013_v41 = vunpack.i.l.bf16 %v11529_v37  ;;  %9681 = vmatprep.subr.msk.bf16.mxu0 %vm10419_vm3, %v9679_v36  ;;  %9687 = vmatprep.subr.msk.bf16.mxu1 %vm10419_vm3, %v9685_v35 }
0x2d11   : > { %9684 = vmatpush3.bf16.xpose.msk.msra.mxu0 %vm10419_vm3, %v9679_v36  ;;  %9690 = vmatpush3.bf16.xpose.msk.msra.mxu1 %vm10419_vm3, %v9685_v35 }
0x2d12   : > { %v9691_v59 = vpack.c.bf16 %v10014_v42, %v10013_v41 }
0x2d13   : > { %v6561_v39 = vpop.permute.xlu0 %6560 }
0x2d14   : > { %v6563_v20 = vpop.permute.xlu1 %6562  ;;  %9120 = vmatprep.mubr.msk.f32.mxu0 %vm438_vm2, %v6561_v39  ;;  %9693 = vmatprep.subr.msk.bf16.mxu0 %vm10419_vm3, %v9691_v59 }
0x2d17   : > { %v6565_v3 = vpop.permute.xlu0 %6564 }
0x2d18   : > { %v6567_v46 = vpop.permute.xlu1 %6566  ;;  %9121 = vmatmul.mubr.msk.f32.vlgmr.msra.gmra.mrb[46].mxu0 %vm438_vm2, %v6563_v20  ;;  %9127 = vmatprep.mubr.msk.f32.mxu1 %vm438_vm2, %v6565_v3 }
0x2d19   : > { %9128 = vmatmul.mubr.msk.f32.vlgmr.msra.gmra.mrb[76].mxu1 %vm438_vm2, %v6567_v46  ;;  %9696 = vmatpush3.bf16.xpose.msk.msra.mxu0 %vm10419_vm3, %v9691_v59 }
0x2d1b   : > { %v6569_v48 = vpop.permute.xlu0 %6568 }
0x2d1c   : > { %9134 = vmatprep.mubr.msk.f32.mxu0 %vm438_vm2, %v6569_v48  ;;  %v6571_v52 = vpop.permute.xlu1 %6570 }
0x2d20   : > { %9135 = vmatmul.mubr.msk.f32.vlgmr.msra.gmra.mrb[48].mxu0 %vm438_vm2, %v6571_v52 }
0x2d75   : > { %v9115_v53 = vpop.f32.mrb[74].mxu1 }
0x2d76   : > { %v6660_v57 = vpop.f32.mrb[75].mxu1  ;;  %v6921_v16 = vsel %vm783_vm4, %v9115_v53, -inf }
0x2d77   : > { %6922 = vmax.xlane.f32.xlu1 %v6921_v16  ;;  %v6918_v58 = vsel %vm783_vm4, %v6660_v57, -inf }
0x2d78   : > { %6919 = vmax.xlane.f32.xlu0 %v6918_v58 }
0x2deb   : > { %v9122_v61 = vpop.f32.mrb[46].mxu0 }
0x2dec   : > { %v6743_v62 = vpop.f32.mrb[47].mxu0  ;;  %v9129_v63 = vpop.f32.mrb[76].mxu1  ;;  %v6927_v47 = vsel %vm783_vm4, %v9122_v61, -inf }
0x2ded   : > { %6928 = vmax.xlane.f32.xlu0 %v6927_v47  ;;  %v6826_v0 = vpop.f32.mrb[77].mxu1  ;;  %v6924_v4 = vsel %vm783_vm4, %v6743_v62, -inf  ;;  %v6933_v7 = vsel %vm783_vm4, %v9129_v63, -inf }
0x2dee   : > { %v6930_v1 = vsel %vm783_vm4, %v6826_v0, -inf }
0x2def   : > { %6931 = vmax.xlane.f32.xlu1 %v6930_v1 }
0x2df1   : > { %6925 = vmax.xlane.f32.xlu0 %v6924_v4 }
0x2df3   : > { %v9136_v5 = vpop.f32.mrb[48].mxu0 }
0x2df4   : > { %v11556_v6 = vpop.f32.mrb[49].mxu0  ;;  %v6939_v9 = vsel %vm783_vm4, %v9136_v5, -inf }
0x2df5   : > { %6934 = vmax.xlane.f32.xlu0 %v6933_v7  ;;  %v6936_v8 = vsel %vm783_vm4, %v11556_v6, -inf }
0x2df6   : > { %6937 = vmax.xlane.f32.xlu1 %v6936_v8 }
0x2df9   : > { %6940 = vmax.xlane.f32.xlu0 %v6939_v9 }
0x2e04   : > { %v6923_v10 = vpop.xlane.xlu1 %6922 }
0x2e05   : > { %v6943_v11 = vsub.f32 %v9115_v53, %v6923_v10  ;;  %v6920_v14 = vpop.xlane.xlu0 %6919 }
0x2e06   : > { %v6942_v27 = vsub.f32 %v6660_v57, %v6920_v14 }
0x2e07   : > { %v6952_v13 = vmul.f32 1.442695, %v6943_v11  ;;  %10016 = vrot.lane.b32.xlu1 %v11501_v25, %s10284_s13 }
0x2e08   : > { %v6950_v15 = vmul.f32 1.442695, %v6942_v27 }
0x2e09   : > { %10227 = vpow2.f32 %v6952_v13 }
0x2e0a   : > { %10229 = vpow2.f32 %v6950_v15 }
0x2e13   : > { %v11564_v44 = vpop.eup %10227 }
0x2e14   : > { %v6969_v45 = vsel %vm783_vm4, %v11564_v44, 0.0  ;;  %v10230_v56 = vpop.eup %10229 }
0x2e15   : > { %6970 = vadd.xlane.f32.xlu0 %v6969_v45  ;;  %v6966_v55 = vsel %vm783_vm4, %v10230_v56, 0.0 }
0x2e2b   : > { %6967 = vadd.xlane.f32.xlu1 %v6966_v55 }
0x2e7a   : > { %v6929_v19 = vpop.xlane.xlu0 %6928 }
0x2e7b   : > { %v6945_v38 = vsub.f32 %v9122_v61, %v6929_v19 }
0x2e7c   : > { %v6932_v28 = vpop.xlane.xlu1 %6931 }
0x2e7d   : > { %v6956_v43 = vmul.f32 1.442695, %v6945_v38  ;;  %v6946_v17 = vsub.f32 %v6826_v0, %v6932_v28 }
0x2e7e   : > { %v6926_v18 = vpop.xlane.xlu0 %6925 }
0x2e7f   : > { %10231 = vpow2.f32 %v6956_v43  ;;  %v6944_v2 = vsub.f32 %v6743_v62, %v6926_v18  ;;  %v6958_v22 = vmul.f32 1.442695, %v6946_v17 }
0x2e81   : > { %v6954_v60 = vmul.f32 1.442695, %v6944_v2 }
0x2e82   : > { %v6935_v21 = vpop.xlane.xlu0 %6934 }
0x2e83   : > { %10233 = vpow2.f32 %v6954_v60  ;;  %v6947_v23 = vsub.f32 %v9129_v63, %v6935_v21  ;;  %v6938_v24 = vpop.xlane.xlu1 %6937 }
0x2e84   : > { %10235 = vpow2.f32 %v6958_v22  ;;  %v6948_v46 = vsub.f32 %v11556_v6, %v6938_v24  ;;  %v7385_v24 = vld [vmem:[%s11752_s2 + $0xf8] sm:$0xff] }
0x2e85   : > { %v6960_v25 = vmul.f32 1.442695, %v6947_v23  ;;  %v7384_v23 = vld [vmem:[%s11752_s2 + $0x70] sm:$0xff] }
0x2e86   : > { %v6941_v26 = vpop.xlane.xlu0 %6940  ;;  %v6962_v52 = vmul.f32 1.442695, %v6948_v46 }
0x2e87   : > { %10237 = vpow2.f32 %v6960_v25  ;;  %v6949_v29 = vsub.f32 %v9136_v5, %v6941_v26  ;;  %v10017_v30 = vpop.permute.xlu1 %10016  ;;  %v7386_v25 = vld [vmem:[%s11752_s2 + $0x180] sm:$0xff]  ;;  %v9713_v26 = vpack.c.bf16 %v7385_v24, %v7384_v23  ;;  %v7618_v23 = vld [vmem:[%s11753_s3 + $0x210] sm:$0xff]  ;;  %v7619_v24 = vld [vmem:[%s11753_s3 + $0x218] sm:$0xff] }
0x2e88   : > { %v10019_v31 = vunpack.i.h.bf16 %v10017_v30  ;;  %v10018_v49 = vunpack.i.l.bf16 %v10017_v30 }
0x2e89   : > { %v11569_v40 = vpop.eup %10231  ;;  %v6964_v12 = vmul.f32 1.442695, %v6949_v29  ;;  %v7387_v29 = vld [vmem:[%s11752_s2 + $0x208] sm:$0xff] }
0x2e8a   : > { %v9697_v51 = vpack.c.bf16 %v10019_v31, %v10018_v49  ;;  %v6975_v34 = vsel %vm783_vm4, %v11569_v40, 0.0  ;;  %v9717_v30 = vpack.c.bf16 %v7387_v29, %v7386_v25  ;;  %v9749_v25 = vpack.c.bf16 %v7619_v24, %v7618_v23  ;;  %v7621_v29 = vld [vmem:[%s11753_s3 + $0x228] sm:$0xff]  ;;  %v8134_v23 = vld [vmem:[%s11754_s4 + $0x27] ss:$0 sm:$0xff] }
0x2e8b   : > { %10239 = vpow2.f32 %v6964_v12  ;;  %6976 = vadd.xlane.f32.xlu0 %v6975_v34 }
0x2e8c   : > { %9698 = vmatprep.subr.bf16.mxu1 %v9697_v51 }
0x2e8d   : > { %v10234_v35 = vpop.eup %10233  ;;  %9700 = vmatpush3.bf16.msra.mxu1 %v9697_v51 }
0x2e8e   : > { %v6972_v36 = vsel %vm783_vm4, %v10234_v35, 0.0  ;;  %v10236_v42 = vpop.eup %10235 }
0x2e8f   : > { %6973 = vadd.xlane.f32.xlu1 %v6972_v36  ;;  %v6978_v39 = vsel %vm783_vm4, %v10236_v42, 0.0 }
0x2e91   : > { %v10238_v41 = vpop.eup %10237 }
0x2e92   : > { %v6981_v59 = vsel %vm783_vm4, %v10238_v41, 0.0 }
0x2e93   : > { %6982 = vadd.xlane.f32.xlu0 %v6981_v59  ;;  %6979 = vadd.xlane.f32.xlu1 %v6978_v39 }
0x2e95   : > { %v11576_v20 = vpop.eup %10239 }
0x2e96   : > { %v6987_v3 = vsel %vm783_vm4, %v11576_v20, 0.0 }
0x2e97   : > { %6988 = vadd.xlane.f32.xlu0 %v6987_v3 }
0x2ea2   : > { %v6971_v48 = vpop.xlane.xlu0 %6970 }
0x2ea3   : > { %10241 = vrcp.f32 %v6971_v48 }
0x2ea4   : > { %10026 = vrot.lane.b32.xlu1 %v11521_v32, %s10284_s13 }
0x2ead   : > { %10021 = vrot.lane.b32.xlu0 %v11523_v33, %s10284_s13  ;;  %v10242_v57 = vpop.eup %10241 }
0x2eae   : > { %v6993_v62 = vmul.f32 %v10242_v57, %v11564_v44  ;;  %v8125_v57 = vld [vmem:[%s11754_s4 + $0x22] ss:$0 sm:$0xff] }
0x2eb8   : > { %v6968_v53 = vpop.xlane.xlu1 %6967 }
0x2eb9   : > { %10243 = vrcp.f32 %v6968_v53 }
0x2eba   : > { %10245 = vpow2.f32 %v6962_v52 }
0x2ec3   : > { %v10244_v16 = vpop.eup %10243 }
0x2ec4   : > { %v10246_v58 = vpop.eup %10245  ;;  %v6991_v61 = vmul.f32 %v10244_v16, %v10230_v56 }
0x2ec5   : > { %v6984_v32 = vsel %vm783_vm4, %v10246_v58, 0.0 }
0x2ec6   : > { %9141 = vmatprep.mubr.msk.f32.mxu1 %vm783_vm4, %v6991_v61 }
0x2ec7   : > { %9142 = vmatmul.mubr.msk.f32.vlgmr.msra.gmra.mrb[78].mxu1 %vm783_vm4, %v6993_v62 }
0x2ec8   : > { %6985 = vadd.xlane.f32.xlu1 %v6984_v32 }
0x2ed9   : > { %10031 = vrot.lane.b32.xlu1 %v11529_v37, %s10284_s13 }
0x2f18   : > { %v6977_v33 = vpop.xlane.xlu0 %6976 }
0x2f1c   : > { %v6974_v63 = vpop.xlane.xlu1 %6973 }
0x2f1d   : > { %10247 = vrcp.f32 %v6974_v63 }
0x2f1e   : > { %10249 = vrcp.f32 %v6977_v33 }
0x2f20   : > { %v6983_v47 = vpop.xlane.xlu0 %6982  ;;  %v6980_v0 = vpop.xlane.xlu1 %6979 }
0x2f21   : > { %10251 = vrcp.f32 %v6983_v47 }
0x2f22   : > { %10253 = vrcp.f32 %v6980_v0 }
0x2f24   : > { %v6989_v1 = vpop.xlane.xlu0 %6988  ;;  %v10027_v4 = vpop.permute.xlu1 %10026 }
0x2f25   : > { %v10029_v5 = vunpack.i.h.bf16 %v10027_v4  ;;  %v10028_v6 = vunpack.i.l.bf16 %v10027_v4  ;;  %10255 = vrcp.f32 %v6989_v1 }
0x2f27   : > { %v10248_v7 = vpop.eup %10247  ;;  %v9705_v8 = vpack.c.bf16 %v10029_v5, %v10028_v6 }
0x2f28   : > { %v10022_v9 = vpop.permute.xlu0 %10021  ;;  %v6995_v10 = vmul.f32 %v10248_v7, %v10234_v35  ;;  %v10250_v37 = vpop.eup %10249 }
0x2f29   : > { %v10024_v11 = vunpack.i.h.bf16 %v10022_v9  ;;  %v10023_v13 = vunpack.i.l.bf16 %v10022_v9  ;;  %9706 = vmatprep.subr.bf16.mxu0 %v9705_v8  ;;  %v6997_v56 = vmul.f32 %v10250_v37, %v11569_v40  ;;  %v7518_v37 = vld [vmem:[%s11752_s2 + $0x188] sm:$0xff] }
0x2f2a   : > { %9148 = vmatprep.mubr.msk.f32.mxu1 %vm783_vm4, %v6995_v10  ;;  %9708 = vmatpush3.bf16.msra.mxu0 %v9705_v8  ;;  %v7516_v10 = vld [vmem:[%s11752_s2 + $0x78] sm:$0xff] }
0x2f2b   : > { %v10252_v14 = vpop.eup %10251  ;;  %v9701_v44 = vpack.c.bf16 %v10024_v11, %v10023_v13  ;;  %9714 = vmatprep.subr.bf16.mxu0 %v9713_v26  ;;  %v7517_v11 = vld [vmem:[%s11752_s2 + $0x100] sm:$0xff] }
0x2f2c   : > { %v10254_v45 = vpop.eup %10253  ;;  %v7001_v27 = vmul.f32 %v10252_v14, %v10238_v41  ;;  %v9721_v13 = vpack.c.bf16 %v7517_v11, %v7516_v10  ;;  %v7519_v14 = vld [vmem:[%s11752_s2 + $0x210] sm:$0xff] }
0x2f2d   : > { %9702 = vmatprep.subr.bf16.mxu1 %v9701_v44  ;;  %v6999_v15 = vmul.f32 %v10254_v45, %v10236_v42  ;;  %v7608_v45 = vld [vmem:[%s11753_s3 + $0x1c0] sm:$0xff] }
0x2f2e   : > { %9704 = vmatpush3.bf16.msra.mxu1 %v9701_v44  ;;  %v9725_v44 = vpack.c.bf16 %v7519_v14, %v7518_v37 }
0x2f2f   : > { %9155 = vmatprep.mubr.msk.f32.mxu0 %vm783_vm4, %v6999_v15  ;;  %v10256_v17 = vpop.eup %10255  ;;  %v7610_v15 = vld [vmem:[%s11753_s3 + $0x1d0] sm:$0xff] }
0x2f30   : > { %9156 = vmatmul.mubr.msk.f32.vlgmr.msra.gmra.mrb[50].mxu0 %vm783_vm4, %v7001_v27  ;;  %v7005_v22 = vmul.f32 %v10256_v17, %v11576_v20  ;;  %v7609_v27 = vld [vmem:[%s11753_s3 + $0x1c8] sm:$0xff]  ;;  %v7614_v17 = vld [vmem:[%s11753_s3 + $0x1f0] sm:$0xff] }
0x2f31   : > { %9149 = vmatmul.mubr.msk.f32.vlgmr.msra.gmra.mrb[80].mxu1 %vm783_vm4, %v6997_v56  ;;  %9716 = vmatpush3.bf16.msra.mxu0 %v9713_v26  ;;  %v9729_v56 = vpack.c.bf16 %v7609_v27, %v7608_v45  ;;  %v7620_v26 = vld [vmem:[%s11753_s3 + $0x220] sm:$0xff] }
0x2f32   : > { %9718 = vmatprep.subr.bf16.mxu0 %v9717_v30 }
0x2f35   : > { %9720 = vmatpush3.bf16.msra.mxu0 %v9717_v30  ;;  %v9753_v30 = vpack.c.bf16 %v7621_v29, %v7620_v26 }
0x2f36   : > { %9730 = vmatprep.subr.bf16.mxu0 %v9729_v56 }
0x2f55   : > { %v6986_v55 = vpop.xlane.xlu1 %6985 }
0x2f56   : > { %10257 = vrcp.f32 %v6986_v55  ;;  %v7611_v55 = vld [vmem:[%s11753_s3 + $0x1d8] sm:$0xff] }
0x2f59   : > { %v10032_v19 = vpop.permute.xlu1 %10031 }
0x2f5a   : > { %v10034_v38 = vunpack.i.h.bf16 %v10032_v19  ;;  %v10033_v28 = vunpack.i.l.bf16 %v10032_v19  ;;  %v9733_v19 = vpack.c.bf16 %v7611_v55, %v7610_v15  ;;  %v7746_v15 = vld [vmem:[%s11752_s2 + $0x80] sm:$0xff] }
0x2f5c   : > { %v9709_v43 = vpack.c.bf16 %v10034_v38, %v10033_v28  ;;  %v7612_v38 = vld [vmem:[%s11753_s3 + $0x1e0] sm:$0xff]  ;;  %v7613_v28 = vld [vmem:[%s11753_s3 + $0x1e8] sm:$0xff] }
0x2f5e   : > { %9710 = vmatprep.subr.bf16.mxu1 %v9709_v43 }
0x2f5f   : > { %9712 = vmatpush3.bf16.msra.mxu1 %v9709_v43  ;;  %v9737_v43 = vpack.c.bf16 %v7613_v28, %v7612_v38  ;;  %v7749_v38 = vld [vmem:[%s11752_s2 + $0x218] sm:$0xff] }
0x2f60   : > { %v10258_v18 = vpop.eup %10257  ;;  %9722 = vmatprep.subr.bf16.mxu1 %v9721_v13 }
0x2f61   : > { %v7003_v2 = vmul.f32 %v10258_v18, %v10246_v58  ;;  %v7615_v18 = vld [vmem:[%s11753_s3 + $0x1f8] sm:$0xff] }
0x2f63   : > { %9162 = vmatprep.mubr.msk.f32.mxu1 %vm783_vm4, %v7003_v2  ;;  %v9741_v2 = vpack.c.bf16 %v7615_v18, %v7614_v17 }
0x2f64   : > { %9163 = vmatmul.mubr.msk.f32.vlgmr.msra.gmra.mrb[82].mxu1 %vm783_vm4, %v7005_v22  ;;  %v7616_v22 = vld [vmem:[%s11753_s3 + $0x200] sm:$0xff] }
0x2f65   : > { %9724 = vmatpush3.bf16.msra.mxu1 %v9721_v13 }
0x2f66   : > { %9726 = vmatprep.subr.bf16.mxu1 %v9725_v44 }
0x2f69   : > { %9728 = vmatpush3.bf16.msra.mxu1 %v9725_v44 }
0x2f9a   : > { %v9143_v60 = vpop.f32.mrb[78].mxu1 }
0x2f9b   : > { %v7084_v21 = vpop.f32.mrb[79].mxu1 }
0x3003   : > { %v9157_v31 = vpop.f32.mrb[50].mxu0 }
0x3004   : > { %v7258_v49 = vpop.f32.mrb[51].mxu0  ;;  %v9150_v40 = vpop.f32.mrb[80].mxu1 }
0x3005   : > { %7358 = vrot.lane.b32.xlu1 %v9150_v40, %s10286_s24  ;;  %v7171_v12 = vpop.f32.mrb[81].mxu1 }
0x3006   : > { %7356 = vrot.lane.b32.xlu0 %v7171_v12, %s10286_s24  ;;  %s226_s24 = scalar_lea.vmem %s11755_s5, %s7910_s8 }
0x3009   : > { %7366 = vrot.lane.b32.xlu1 %v9157_v31, %s10287_s25 }
0x300a   : > { %7364 = vrot.lane.b32.xlu0 %v7258_v49, %s10287_s25 }
0x3037   : > { %v9164_v51 = vpop.f32.mrb[82].mxu1 }
0x3038   : > { %7374 = vrot.lane.b32.xlu1 %v9164_v51, %s10288_s27  ;;  %v7345_v34 = vpop.f32.mrb[83].mxu1 }
0x3039   : > { %7372 = vrot.lane.b32.xlu0 %v7345_v34, %s10288_s27 }
0x3077   : > { %v7359_v35 = vpop.permute.xlu1 %7358 }
0x3078   : > { %v7357_v36 = vpop.permute.xlu0 %7356  ;;  %v7379_v20 = vsel %vm438_vm2, %v9143_v60, %v7359_v35  ;;  %v7617_v60 = vld [vmem:[%s11753_s3 + $0x208] sm:$0xff] }
0x3079   : > { %v7378_v59 = vsel %vm438_vm2, %v7084_v21, %v7357_v36  ;;  %v9745_v21 = vpack.c.bf16 %v7617_v60, %v7616_v22  ;;  %v8128_v36 = vld [vmem:[%s11754_s4 + $0x23] ss:$0 sm:$0xff] }
0x307b   : > { %v7367_v42 = vpop.permute.xlu1 %7366 }
0x307c   : > { %v7365_v41 = vpop.permute.xlu0 %7364  ;;  %v7381_v48 = vsel %vm783_vm4, %v7379_v20, %v7367_v42 }
0x307d   : > { %v7380_v3 = vsel %vm783_vm4, %v7378_v59, %v7365_v41  ;;  %v8129_v41 = vld [vmem:[%s11754_s4 + $0x24] ss:$0 sm:$0xff] }
0x30aa   : > { %v7375_v39 = vpop.permute.xlu1 %7374 }
0x30ab   : > { %v7373_v46 = vpop.permute.xlu0 %7372  ;;  %v7383_v53 = vsel %vm1248_vm5, %v7381_v48, %v7375_v39 }
0x30ac   : > { %v7382_v52 = vsel %vm1248_vm5, %v7380_v3, %v7373_v46 }
0x30ad   : > { %9173 = vmatprep.mubr.msk.f32.mxu0 %vm338_vm1, %v7382_v52  ;;  %v7622_v52 = vld [vmem:[%s11753_s3 + $0x230] sm:$0xff] }
0x30ae   : > { %9174 = vmatmul.mubr.msk.f32.vlgmr.msra.gmra.mrb[52].mxu0 %vm338_vm1, %v7383_v53  ;;  %v7623_v53 = vld [vmem:[%s11753_s3 + $0x238] sm:$0xff] }
0x30af   : > { %9732 = vmatpush3.bf16.msra.mxu0 %v9729_v56  ;;  %v7747_v56 = vld [vmem:[%s11752_s2 + $0x108] sm:$0xff] }
0x30b0   : > { %9734 = vmatprep.subr.bf16.mxu0 %v9733_v19  ;;  %v9761_v55 = vpack.c.bf16 %v7747_v56, %v7746_v15 }
0x30b2   : > { %9762 = vmatprep.subr.bf16.mxu1 %v9761_v55 }
0x30b3   : > { %9736 = vmatpush3.bf16.msra.mxu0 %v9733_v19  ;;  %v7748_v19 = vld [vmem:[%s11752_s2 + $0x190] sm:$0xff] }
0x30b4   : > { %9738 = vmatprep.subr.bf16.mxu0 %v9737_v43  ;;  %v9765_v28 = vpack.c.bf16 %v7749_v38, %v7748_v19 }
0x30b7   : > { %9740 = vmatpush3.bf16.msra.mxu0 %v9737_v43 }
0x30b8   : > { %9742 = vmatprep.subr.bf16.mxu0 %v9741_v2 }
0x30bb   : > { %9744 = vmatpush3.bf16.msra.mxu0 %v9741_v2 }
0x30bc   : > { %9746 = vmatprep.subr.bf16.mxu0 %v9745_v21 }
0x30bf   : > { %9748 = vmatpush3.bf16.msra.mxu0 %v9745_v21 }
0x30c0   : > { %9750 = vmatprep.subr.bf16.mxu0 %v9749_v25 }
0x30c3   : > { %9752 = vmatpush3.bf16.msra.mxu0 %v9749_v25 }
0x30c4   : > { %9754 = vmatprep.subr.bf16.mxu0 %v9753_v30 }
0x30c7   : > { %9756 = vmatpush3.bf16.msra.mxu0 %v9753_v30  ;;  %v8135_v30 = vld [vmem:[%s11754_s4 + $0x28] ss:$0 sm:$0xff] }
0x3181   : > { %v9175_v16 = vpop.f32.mrb[52].mxu0 }
0x3182   : > { %v7471_v58 = vadd.f32 %v9175_v16, %v8125_v57  ;;  %v7465_v61 = vpop.f32.mrb[53].mxu0  ;;  %v8130_v16 = vld [vmem:[%s11754_s4 + $0x25] ss:$0 sm:$0xff] }
0x3183   : > { %v7466_v62 = vadd.f32 %v8125_v57, %v7465_v61  ;;  %v9757_v57 = vpack.c.bf16 %v7623_v53, %v7622_v52 }
0x3184   : > { %v7475_v32 = vadd.f32 %v7471_v58, %v11495_v54 }
0x3185   : > { %v7474_v33 = vadd.f32 %v7466_v62, %v11493_v50  ;;  %9758 = vmatprep.subr.bf16.mxu0 %v9757_v57 }
0x3186   : > { %v7479_v63 = vsel %vm338_vm1, %v7475_v32, 0.0  ;;  %9760 = vmatpush3.bf16.msra.mxu0 %v9757_v57 }
0x3187   : > { %7480 = vadd.xlane.f32.xlu1 %v7479_v63  ;;  %v7476_v47 = vsel %vm338_vm1, %v7474_v33, 0.0 }
0x3188   : > { %7477 = vadd.xlane.f32.xlu0 %v7476_v47  ;;  %v8133_v47 = vld [vmem:[%s11754_s4 + $0x26] ss:$0 sm:$0xff] }
0x3214   : > { %v7481_v0 = vpop.xlane.xlu1 %7480 }
0x3215   : > { %v7483_v1 = vmul.f32 0.03125, %v7481_v0  ;;  %v7478_v4 = vpop.xlane.xlu0 %7477 }
0x3216   : > { %v7482_v5 = vmul.f32 0.03125, %v7478_v4 }
0x3217   : > { %v11632_v6 = vsub.f32 %v7475_v32, %v7483_v1 }
0x3218   : > { %v7484_v7 = vsub.f32 %v7474_v33, %v7482_v5 }
0x3219   : > { %v7487_v54 = vmul.f32 %v11632_v6, %v11632_v6 }
0x321a   : > { %v7486_v8 = vmul.f32 %v7484_v7, %v7484_v7 }
0x321b   : > { %v7491_v50 = vsel %vm338_vm1, %v7487_v54, 0.0 }
0x321c   : > { %v7488_v9 = vsel %vm338_vm1, %v7486_v8, 0.0 }
0x321d   : > { %7489 = vadd.xlane.f32.xlu0 %v7488_v9 }
0x3221   : > { %7492 = vadd.xlane.f32.xlu0 %v7491_v50 }
0x32aa   : > { %v7490_v31 = vpop.xlane.xlu0 %7489 }
0x32ab   : > { %v7494_v49 = vmul.f32 0.03125, %v7490_v31 }
0x32ad   : > { %v7496_v40 = vadd.f32 1e-05, %v7494_v49 }
0x32ae   : > { %v7493_v12 = vpop.xlane.xlu0 %7492 }
0x32af   : > { %10259 = vrsqrt.f32 %v7496_v40  ;;  %v7495_v51 = vmul.f32 0.03125, %v7493_v12  ;;  %v8136_v12 = vld [vmem:[%s11754_s4 + $0x29] ss:$0 sm:$0xff] }
0x32b1   : > { %v7497_v34 = vadd.f32 1e-05, %v7495_v51 }
0x32b3   : > { %10261 = vrsqrt.f32 %v7497_v34 }
0x32b9   : > { %v10260_v35 = vpop.eup %10259 }
0x32ba   : > { %v7500_v42 = vmul.f32 %v10260_v35, %v7484_v7 }
0x32bc   : > { %v7507_v59 = vmul.f32 %v8128_v36, %v7500_v42 }
0x32bd   : > { %v10262_v39 = vpop.eup %10261 }
0x32be   : > { %v7501_v20 = vmul.f32 %v10262_v39, %v11632_v6  ;;  %v7514_v3 = vadd.f32 %v8129_v41, %v7507_v59 }
0x32c0   : > { %v7508_v46 = vmul.f32 %v8128_v36, %v7501_v20  ;;  %9184 = vmatprep.mubr.msk.f32.mxu1 %vm338_vm1, %v7514_v3 }
0x32c2   : > { %v7515_v48 = vadd.f32 %v8129_v41, %v7508_v46 }
0x32c4   : > { %9185 = vmatmul.mubr.msk.f32.vlgmr.msra.gmra.mrb[84].mxu1 %vm338_vm1, %v7515_v48 }
0x32c5   : > { %9764 = vmatpush3.bf16.msra.mxu1 %v9761_v55 }
0x32c6   : > { %9766 = vmatprep.subr.bf16.mxu1 %v9765_v28 }
0x32c9   : > { %9768 = vmatpush3.bf16.msra.mxu1 %v9765_v28 }
0x3397   : > { %v9186_v58 = vpop.f32.mrb[84].mxu1 }
0x3398   : > { %v7603_v61 = vadd.f32 %v9186_v58, %v8130_v16  ;;  %v7597_v62 = vpop.f32.mrb[85].mxu1 }
0x3399   : > { %v7598_v32 = vadd.f32 %v8130_v16, %v7597_v62 }
0x339a   : > { %v7607_v63 = vmax.f32 %v7603_v61, 0.0 }
0x339b   : > { %v7606_v33 = vmax.f32 %v7598_v32, 0.0 }
0x339d   : > { %9219 = vmatprep.mubr.f32.mxu0 %v7606_v33 }
0x339e   : > { %9220 = vmatmul.mubr.f32.vlgmr.msra.gmra.mrb[54].mxu0 %v7607_v63 }
0x3471   : > { %v9221_v0 = vpop.f32.mrb[54].mxu0 }
0x3472   : > { %v7701_v1 = vadd.f32 %v9221_v0, %v8133_v47  ;;  %v7695_v4 = vpop.f32.mrb[55].mxu0 }
0x3473   : > { %v7696_v5 = vadd.f32 %v8133_v47, %v7695_v4 }
0x3474   : > { %v7705_v6 = vadd.f32 %v7701_v1, %v7515_v48 }
0x3475   : > { %v7704_v7 = vadd.f32 %v7696_v5, %v7514_v3 }
0x3476   : > { %v7709_v8 = vsel %vm338_vm1, %v7705_v6, 0.0 }
0x3477   : > { %7710 = vadd.xlane.f32.xlu0 %v7709_v8  ;;  %v7706_v9 = vsel %vm338_vm1, %v7704_v7, 0.0 }
0x3478   : > { %7707 = vadd.xlane.f32.xlu1 %v7706_v9 }
0x3504   : > { %v7711_v54 = vpop.xlane.xlu0 %7710 }
0x3505   : > { %v7713_v50 = vmul.f32 0.03125, %v7711_v54  ;;  %v7708_v10 = vpop.xlane.xlu1 %7707 }
0x3506   : > { %v7712_v11 = vmul.f32 0.03125, %v7708_v10 }
0x3507   : > { %v7715_v13 = vsub.f32 %v7705_v6, %v7713_v50 }
0x3508   : > { %v7714_v37 = vsub.f32 %v7704_v7, %v7712_v11 }
0x3509   : > { %v7717_v14 = vmul.f32 %v7715_v13, %v7715_v13 }
0x350a   : > { %v7716_v44 = vmul.f32 %v7714_v37, %v7714_v37 }
0x350b   : > { %v7721_v45 = vsel %vm338_vm1, %v7717_v14, 0.0 }
0x350c   : > { %7722 = vadd.xlane.f32.xlu0 %v7721_v45  ;;  %v7718_v27 = vsel %vm338_vm1, %v7716_v44, 0.0 }
0x350d   : > { %7719 = vadd.xlane.f32.xlu1 %v7718_v27 }
0x3599   : > { %v7723_v43 = vpop.xlane.xlu0 %7722 }
0x359a   : > { %v7725_v17 = vmul.f32 0.03125, %v7723_v43  ;;  %v7720_v18 = vpop.xlane.xlu1 %7719 }
0x359b   : > { %v7724_v2 = vmul.f32 0.03125, %v7720_v18 }
0x359c   : > { %v7727_v22 = vadd.f32 1e-05, %v7725_v17 }
0x359d   : > { %v7726_v60 = vadd.f32 1e-05, %v7724_v2 }
0x359e   : > { %10263 = vrsqrt.f32 %v7727_v22 }
0x359f   : > { %10265 = vrsqrt.f32 %v7726_v60 }
0x35a8   : > { %v10264_v21 = vpop.eup %10263 }
0x35a9   : > { %v10266_v24 = vpop.eup %10265  ;;  %v7731_v25 = vmul.f32 %v10264_v21, %v7715_v13 }
0x35aa   : > { %v7730_v26 = vmul.f32 %v10266_v24, %v7714_v37 }
0x35ab   : > { %v7738_v29 = vmul.f32 %v8134_v23, %v7731_v25 }
0x35ac   : > { %v7737_v31 = vmul.f32 %v8134_v23, %v7730_v26 }
0x35ad   : > { %v7745_v40 = vadd.f32 %v8135_v30, %v7738_v29 }
0x35ae   : > { %v7744_v49 = vadd.f32 %v8135_v30, %v7737_v31 }
0x35b0   : > { %9230 = vmatprep.mubr.msk.f32.mxu1 %vm338_vm1, %v7744_v49 }
0x35b1   : > { %9231 = vmatmul.mubr.msk.f32.vlgmr.msra.gmra.mrb[86].mxu1 %vm338_vm1, %v7745_v40 }
0x3684   : > { %v9232_v51 = vpop.f32.mrb[86].mxu1 }
0x3685   : > { %v7833_v34 = vadd.f32 %v9232_v51, %v8136_v12  ;;  %v7827_v35 = vpop.f32.mrb[87].mxu1 }
0x3686   : > { %v7828_v36 = vadd.f32 %v8136_v12, %v7827_v35 }
0x3687   : > { %v7839_v42 = vmul.f32 0.70710677, %v7833_v34  ;;  %v7837_v48 = vmul.f32 0.5, %v7833_v34 }
0x3688   : > { %v7838_v41 = vmul.f32 0.70710677, %v7828_v36  ;;  %v7836_v3 = vmul.f32 0.5, %v7828_v36 }
0x3689   : > { %10267 = verf.f32 %v7839_v42 }
0x368a   : > { %10269 = verf.f32 %v7838_v41 }
0x3693   : > { %v10268_v59 = vpop.eup %10267 }
0x3694   : > { %v10270_v39 = vpop.eup %10269  ;;  %v7843_v20 = vadd.f32 1.0, %v10268_v59 }
0x3695   : > { %v7842_v46 = vadd.f32 1.0, %v10270_v39 }
0x3696   : > { %v7845_v53 = vmul.f32 %v7843_v20, %v7837_v48 }
0x3697   : > { %v7844_v52 = vmul.f32 %v7842_v46, %v7836_v3 }
0x3698   : > { %7847 = vst.msk [vmem:[%s226_s24 + $0x8] sm:$0xff] %vm245_vm0, %v7845_v53 }
0x3699   : > { %7846 = vst.msk [vmem:[%s226_s24] sm:$0xff] %vm245_vm0, %v7844_v52 }
0x369a PF: > { %s15_s18 = sadd.s32 1, %s10279_s18  }
0x369b   : > { %p12_p4 = scmp.ge.s32.totalorder %s15_s18, 4  }
0x369d   :  { %14 = sbr.rel (!%p12_p4) target bundleno = 1 (0x1), region = 70 }

</bundles_post_ra>
